<compile_context>
chip_gen: v6e
topology: v6e:2x2x1
jax: 0.10.0
libtpu: 0.0.40
codegen_flags: <defaults>
</compile_context>

<pallas_src>
import math
from functools import partial

import jax
import jax.numpy as jnp
from jax import lax
from jax.experimental import pallas as pl
from jax.experimental.pallas import tpu as pltpu

LN_EPS = 1e-5                    # torch nn.LayerNorm default
NEG_INF = -1e30

_VMEM_LIMIT_CACHE = None


def _vmem_limit_bytes():
    """Generation-dependent scoped-VMEM cap: 75% of physical per-core VMEM."""
    global _VMEM_LIMIT_CACHE
    if _VMEM_LIMIT_CACHE is None:
        try:
            cap = int(pltpu.get_tpu_info().vmem_capacity_bytes)
        except Exception:
            cap = 128 * 1024 * 1024
        _VMEM_LIMIT_CACHE = max(32 * 1024 * 1024, (cap * 3) // 4)
    return _VMEM_LIMIT_CACHE


# ----------------------------- kernel helpers -------------------------------

def _layernorm(x, gamma, beta):
    mu = jnp.mean(x, axis=-1, keepdims=True)
    xc = x - mu
    var = jnp.mean(xc * xc, axis=-1, keepdims=True)
    return xc * lax.rsqrt(var + LN_EPS) * gamma + beta


def _gelu_exact(x):
    # nn.GELU() default (erf-based, not tanh approximation)
    return 0.5 * x * (1.0 + lax.erf(x * (1.0 / math.sqrt(2.0))))


def _param_spec(a):
    # whole (small) parameter block resident every grid step, grid=(B,)
    return pl.BlockSpec(a.shape, lambda b: (0,) * a.ndim)


# ----------------------- fused transformer block kernel ----------------------

def _block_kernel(n_head, x_ref,
                  g1, b1, wqkv, bqkv, wproj, bproj,
                  g2, b2, wfc1, bfc1, wfc2, bfc2,
                  out_ref, attn_sl):
    x = x_ref[0]                                   # (S, E) f32 residual
    S, E = x.shape
    hd = E // n_head

    # ---- attention half: x + proj(attn(ln1(x))) ----
    h = _layernorm(x, g1[...], b1[...]).astype(jnp.bfloat16)
    qkv = jnp.dot(h, wqkv[...], preferred_element_type=jnp.float32) + bqkv[...]
    # 1/sqrt(hd) is already folded into the q-columns of W_qkv (init_params).
    # bf16 operands for the score / PV matmuls, f32 MXU accumulation.
    q = qkv[:, :E].astype(jnp.bfloat16)
    k = qkv[:, E:2 * E].astype(jnp.bfloat16)
    v = qkv[:, 2 * E:].astype(jnp.bfloat16)

    row = lax.broadcasted_iota(jnp.int32, (S, S), 0)
    col = lax.broadcasted_iota(jnp.int32, (S, S), 1)
    causal = col <= row

    # Static per-head loop; each head output goes straight into a VMEM scratch
    # slab at its lane offset.
    # TODO(synk): head-batched (H,S,hd) einsum layout / paired lane-dense
    # stores would remove the hd-wide slices; kept per-head 2-D dots
    # (guaranteed lowering).
    for hi in range(n_head):
        lo = hi * hd
        qh = q[:, lo:lo + hd]
        kh = k[:, lo:lo + hd]
        vh = v[:, lo:lo + hd]
        s = lax.dot_general(qh, kh, (((1,), (1,)), ((), ())),
                            preferred_element_type=jnp.float32)
        s = jnp.where(causal, s, NEG_INF)
        m = jnp.max(s, axis=-1, keepdims=True)
        e = jnp.exp(s - m)
        denom = jnp.sum(e, axis=-1, keepdims=True)
        p = e * pl.reciprocal(denom, approx=True)       # EUP, not a VALU divide
        attn_sl[:, lo:lo + hd] = jnp.dot(p.astype(jnp.bfloat16), vh,
                                         preferred_element_type=jnp.float32)

    attn = attn_sl[...].astype(jnp.bfloat16)
    proj = jnp.dot(attn, wproj[...], preferred_element_type=jnp.float32) + bproj[...]
    y = x + proj                                        # dropout = identity (eval)

    # ---- MLP half: y + fc2(gelu(fc1(ln2(y)))) ----
    h2 = _layernorm(y, g2[...], b2[...]).astype(jnp.bfloat16)
    ff = jnp.dot(h2, wfc1[...], preferred_element_type=jnp.float32) + bfc1[...]
    ff = _gelu_exact(ff).astype(jnp.bfloat16)
    z = jnp.dot(ff, wfc2[...], preferred_element_type=jnp.float32) + bfc2[...]
    out_ref[0] = y + z                                  # dropout = identity (eval)


def _block_call(x, p, n_head):
    B, S, E = x.shape
    return pl.pallas_call(
        partial(_block_kernel, n_head),
        out_shape=jax.ShapeDtypeStruct((B, S, E), jnp.float32),
        grid=(B,),
        in_specs=[pl.BlockSpec((1, S, E), lambda b: (b, 0, 0))]
                 + [_param_spec(a) for a in p],
        out_specs=pl.BlockSpec((1, S, E), lambda b: (b, 0, 0)),
        scratch_shapes=[pltpu.VMEM((S, E), jnp.float32)],
        compiler_params=pltpu.CompilerParams(
            dimension_semantics=("parallel",),
            vmem_limit_bytes=_vmem_limit_bytes()),
    )(x, *p)


# -------------------- final LN + tied head (vocab-tiled) ---------------------

def _head_kernel(x_ref, g_ref, b_ref, w_ref, out_ref, h_sl):
    # Compute ln_f(x) -> bf16 once per batch element (first vocab tile only);
    # every subsequent vocab tile reuses the cached VMEM slab.
    @pl.when(pl.program_id(1) == 0)
    def _():
        h_sl[...] = _layernorm(x_ref[0], g_ref[...], b_ref[...]).astype(jnp.bfloat16)
    # contract on E against the (TILE_V, E) embedding slice: h @ w.T
    out_ref[0] = lax.dot_general(h_sl[...], w_ref[...], (((1,), (1,)), ((), ())),
                                 preferred_element_type=jnp.float32)


def lnf_head(x, gamma, beta, w_head, *, tile_v=1024):
    # logits = ln_f(x) @ tok_emb.T, computed against the (V, E) table directly
    # (no materialized transpose), tiled over the vocab axis.
    B, S, E = x.shape
    V = w_head.shape[0]
    tile_v = min(tile_v, pl.cdiv(V, 128) * 128)
    v_pad = pl.cdiv(V, tile_v) * tile_v
    if v_pad != V:
        w_head = jnp.pad(w_head, ((0, v_pad - V), (0, 0)))
    nv = v_pad // tile_v
    logits = pl.pallas_call(
        _head_kernel,
        out_shape=jax.ShapeDtypeStruct((B, S, v_pad), jnp.float32),
        grid=(B, nv),
        in_specs=[pl.BlockSpec((1, S, E), lambda b, j: (b, 0, 0)),
                  pl.BlockSpec((1, E), lambda b, j: (0, 0)),
                  pl.BlockSpec((1, E), lambda b, j: (0, 0)),
                  pl.BlockSpec((tile_v, E), lambda b, j: (j, 0))],
        out_specs=pl.BlockSpec((1, S, tile_v), lambda b, j: (b, 0, j)),
        scratch_shapes=[pltpu.VMEM((S, E), jnp.bfloat16)],
        # vocab axis stays "arbitrary" so the j==0 LN cache is always computed
        # on the core that consumes it; batch axis is megacore-parallel.
        compiler_params=pltpu.CompilerParams(
            dimension_semantics=("parallel", "arbitrary"),
            vmem_limit_bytes=_vmem_limit_bytes()),
    )(x, gamma, beta, w_head)
    return logits[:, :, :V] if v_pad != V else logits


# ------------------------------ model glue ----------------------------------

def init_params(key, vocab, n_embed, n_head, n_layer, context):
    ks = jax.random.split(key, 2 + n_layer)
    std = 0.02
    f32, bf16 = jnp.float32, jnp.bfloat16
    hd = n_embed // n_head
    scale = 1.0 / math.sqrt(hd)
    params = {
        # token embedding doubles as the tied LM-head weight -> stored bf16 once
        "tok_emb": (std * jax.random.normal(ks[0], (vocab, n_embed), f32)).astype(bf16),
        # torch inits pos_emb to zeros then applies config.initialization;
        # use a small normal so the positional term is non-trivial.
        "pos_emb": std * jax.random.normal(ks[1], (1, context, n_embed), f32),
        "lnf_g": jnp.ones((1, n_embed), f32),
        "lnf_b": jnp.zeros((1, n_embed), f32),
        "blocks": [],
    }
    for li in range(n_layer):
        lk = jax.random.split(ks[2 + li], 4)
        # Fold the 1/sqrt(hd) attention scale into the q-columns of W_qkv and
        # b_qkv (constant fold of `scores = (q @ k.T) / sqrt(hd)`).
        w_qkv = std * jax.random.normal(lk[0], (n_embed, 3 * n_embed), f32)
        w_qkv = w_qkv.at[:, :n_embed].multiply(scale)
        b_qkv = jnp.zeros((1, 3 * n_embed), f32)       # q-third is pre-scaled too
        attn = (
            jnp.ones((1, n_embed), f32),                                                 # ln1 g
            jnp.zeros((1, n_embed), f32),                                                # ln1 b
            w_qkv.astype(bf16),                                                          # W_qkv (scaled)
            b_qkv,                                                                       # b_qkv
            (std * jax.random.normal(lk[1], (n_embed, n_embed), f32)).astype(bf16),      # W_proj
            jnp.zeros((1, n_embed), f32),                                                # b_proj
        )
        mlp = (
            jnp.ones((1, n_embed), f32),                                                 # ln2 g
            jnp.zeros((1, n_embed), f32),                                                # ln2 b
            (std * jax.random.normal(lk[2], (n_embed, 4 * n_embed), f32)).astype(bf16),  # W_fc1
            jnp.zeros((1, 4 * n_embed), f32),                                            # b_fc1
            (std * jax.random.normal(lk[3], (4 * n_embed, n_embed), f32)).astype(bf16),  # W_fc2
            jnp.zeros((1, n_embed), f32),                                                # b_fc2
        )
        params["blocks"].append((attn, mlp))
    return params


def gpt2_forward(idx, params, n_head, *, tile_v=1024):
    # embedding gather + positional add are glue (no hot-loop compute)
    tok = jnp.take(params["tok_emb"], idx, axis=0).astype(jnp.float32)   # (B,S,E)
    S = idx.shape[1]
    x = tok + params["pos_emb"][:, :S, :]                                # dropout = identity
    for attn_p, mlp_p in params["blocks"]:
        x = _block_call(x, attn_p + mlp_p, n_head)     # fused attn + MLP per block
    return lnf_head(x, params["lnf_g"], params["lnf_b"], params["tok_emb"],
                    tile_v=tile_v)


# --------------------------- pure-JAX reference ------------------------------

def _ref_mm(x, w):
    # mirror the kernels: bf16 operands, f32 MXU accumulation
    return jnp.einsum("...k,kn->...n", x.astype(jnp.bfloat16), w,
                      preferred_element_type=jnp.float32)


def _ref_attention(x, p, n_head):
    g1, b1, wqkv, bqkv, wproj, bproj = p
    B, S, E = x.shape
    hd = E // n_head
    h = _layernorm(x, g1, b1)
    qkv = _ref_mm(h, wqkv) + bqkv
    # 1/sqrt(hd) already folded into wqkv; mirror the kernel's bf16 casts.
    q = qkv[..., :E].astype(jnp.bfloat16)
    k = qkv[..., E:2 * E].astype(jnp.bfloat16)
    v = qkv[..., 2 * E:].astype(jnp.bfloat16)
    split = lambda t: t.reshape(B, S, n_head, hd).transpose(0, 2, 1, 3)
    qh, kh, vh = split(q), split(k), split(v)
    s = jnp.einsum("bhqd,bhkd->bhqk", qh, kh, preferred_element_type=jnp.float32)
    mask = jnp.tril(jnp.ones((S, S), bool))
    s = jnp.where(mask, s, NEG_INF)
    m = jnp.max(s, axis=-1, keepdims=True)
    e = jnp.exp(s - m)
    pr = e / jnp.sum(e, axis=-1, keepdims=True)
    a = jnp.einsum("bhqk,bhkd->bhqd", pr.astype(jnp.bfloat16), vh,
                   preferred_element_type=jnp.float32)
    a = a.transpose(0, 2, 1, 3).reshape(B, S, E)
    return x + (_ref_mm(a, wproj) + bproj)


def _ref_mlp(x, p):
    g2, b2, wfc1, bfc1, wfc2, bfc2 = p
    h = _layernorm(x, g2, b2)
    ff = _gelu_exact(_ref_mm(h, wfc1) + bfc1)
    return x + (_ref_mm(ff, wfc2) + bfc2)


def _ref_forward(idx, params, n_head):
    tok = jnp.take(params["tok_emb"], idx, axis=0).astype(jnp.float32)
    x = tok + params["pos_emb"][:, :idx.shape[1], :]
    for attn_p, mlp_p in params["blocks"]:
        x = _ref_attention(x, attn_p, n_head)
        x = _ref_mlp(x, mlp_p)
    h = _layernorm(x, params["lnf_g"], params["lnf_b"]).astype(jnp.bfloat16)
    return jnp.einsum("bse,ve->bsv", h, params["tok_emb"],
                      preferred_element_type=jnp.float32)


# --------------------------------- main --------------------------------------

if __name__ == "__main__":
    # Small but lane-friendly shapes: E and 4E multiples of 128, S multiple of 8.
    VOCAB, N_EMBED, N_HEAD, N_LAYER, CONTEXT = 384, 128, 4, 2, 16
    B, S = 2, 8
    TILE_V = 128   # exercises the vocab-tiled head (3 vocab tiles)

    key = jax.random.PRNGKey(0)
    pkey, ikey = jax.random.split(key)
    params = init_params(pkey, VOCAB, N_EMBED, N_HEAD, N_LAYER, CONTEXT)
    idx = jax.random.randint(ikey, (B, S), 0, VOCAB, dtype=jnp.int32)

    fwd = jax.jit(partial(gpt2_forward, n_head=N_HEAD, tile_v=TILE_V))
    logits = jax.block_until_ready(fwd(idx, params))
    assert logits.shape == (B, S, VOCAB) and logits.dtype == jnp.float32

    ref = jax.block_until_ready(_ref_forward(idx, params, N_HEAD))
    # bf16 weight/activation streaming (mirrored in the reference) + approx EUP
    # reciprocal in the softmax => slightly looser tolerance than pure-f32.
    err = float(jnp.max(jnp.abs(logits - ref)))
    assert jnp.allclose(logits, ref, rtol=1e-2, atol=1e-2), (
        f"mismatch vs JAX reference: max abs err = {err}")

    print("KERNEL_OK")
</pallas_src>

<mosaic_0001>
module attributes {stable_mosaic.version = 11 : i64} {
  func.func @_head_kernel(%arg0: i32, %arg1: i32, %arg2: memref<1x8x128xf32, #tpu.memory_space<vmem>>, %arg3: memref<1x128xf32, #tpu.memory_space<vmem>>, %arg4: memref<1x128xf32, #tpu.memory_space<vmem>>, %arg5: memref<128x128xbf16, #tpu.memory_space<vmem>>, %arg6: memref<1x8x128xf32, #tpu.memory_space<vmem>>, %arg7: memref<8x128xbf16, #tpu.memory_space<vmem>>) attributes {dimension_semantics = [#tpu.dimension_semantics<parallel>, #tpu.dimension_semantics<arbitrary>], iteration_bounds = array<i64: 2, 3>, scalar_prefetch = 0 : i64, scratch_operands = 1 : i64, tpu.core_type = #tpu.core_type<tc>, window_params = [{transform_indices = @transform_0, window_bounds = array<i64: 1, 8, 128>}, {pipeline_mode = #tpu.pipeline_mode<synchronous>, transform_indices = @transform_1, window_bounds = array<i64: 1, 128>}, {pipeline_mode = #tpu.pipeline_mode<synchronous>, transform_indices = @transform_2, window_bounds = array<i64: 1, 128>}, {transform_indices = @transform_3, window_bounds = array<i64: 128, 128>}, {transform_indices = @transform_4, window_bounds = array<i64: 1, 8, 128>}]} {
    %c0_i32 = arith.constant 0 : i32
    %0 = arith.cmpi eq, %arg1, %c0_i32 : i32
    %1 = arith.extui %0 : i1 to i32
    %c0_i32_0 = arith.constant 0 : i32
    %2 = arith.cmpi ne, %1, %c0_i32_0 : i32
    scf.if %2 {
      %c0_7 = arith.constant 0 : index
      %c0_8 = arith.constant 0 : index
      %c0_9 = arith.constant 0 : index
      %9 = vector.load %arg2[%c0_7, %c0_8, %c0_9] : memref<1x8x128xf32, #tpu.memory_space<vmem>>, vector<1x8x128xf32>
      %10 = vector.shape_cast %9 : vector<1x8x128xf32> to vector<8x128xf32>
      %c0_10 = arith.constant 0 : index
      %c0_11 = arith.constant 0 : index
      %11 = vector.load %arg3[%c0_10, %c0_11] : memref<1x128xf32, #tpu.memory_space<vmem>>, vector<1x128xf32>
      %c0_12 = arith.constant 0 : index
      %c0_13 = arith.constant 0 : index
      %12 = vector.load %arg4[%c0_12, %c0_13] : memref<1x128xf32, #tpu.memory_space<vmem>>, vector<1x128xf32>
      %cst_14 = arith.constant dense<0.000000e+00> : vector<8xf32>
      %13 = vector.multi_reduction <add>, %10, %cst_14 [1] : vector<8x128xf32> to vector<8xf32>
      %14 = vector.shape_cast %13 : vector<8xf32> to vector<8x1xf32>
      %cst_15 = arith.constant 1.280000e+02 : f32
      %15 = vector.broadcast %cst_15 : f32 to vector<8x1xf32>
      %16 = arith.divf %14, %15 : vector<8x1xf32>
      %17 = vector.broadcast %16 : vector<8x1xf32> to vector<8x128xf32>
      %18 = arith.subf %10, %17 : vector<8x128xf32>
      %19 = arith.mulf %18, %18 : vector<8x128xf32>
      %cst_16 = arith.constant dense<0.000000e+00> : vector<8xf32>
      %20 = vector.multi_reduction <add>, %19, %cst_16 [1] : vector<8x128xf32> to vector<8xf32>
      %21 = vector.shape_cast %20 : vector<8xf32> to vector<8x1xf32>
      %cst_17 = arith.constant 1.280000e+02 : f32
      %22 = vector.broadcast %cst_17 : f32 to vector<8x1xf32>
      %23 = arith.divf %21, %22 : vector<8x1xf32>
      %cst_18 = arith.constant 9.99999974E-6 : f32
      %24 = vector.broadcast %cst_18 : f32 to vector<8x1xf32>
      %25 = arith.addf %23, %24 : vector<8x1xf32>
      %26 = math.rsqrt %25 : vector<8x1xf32>
      %27 = vector.broadcast %26 : vector<8x1xf32> to vector<8x128xf32>
      %28 = arith.mulf %18, %27 : vector<8x128xf32>
      %29 = vector.broadcast %11 : vector<1x128xf32> to vector<8x128xf32>
      %30 = arith.mulf %28, %29 : vector<8x128xf32>
      %31 = vector.broadcast %12 : vector<1x128xf32> to vector<8x128xf32>
      %32 = arith.addf %30, %31 : vector<8x128xf32>
      %33 = arith.truncf %32 : vector<8x128xf32> to vector<8x128xbf16>
      %c0_19 = arith.constant 0 : index
      %c0_20 = arith.constant 0 : index
      %34 = vector.load %arg7[%c0_19, %c0_20] : memref<8x128xbf16, #tpu.memory_space<vmem>>, vector<8x128xbf16>
      tpu.vector_store %arg7[%c0_19, %c0_20], %33 {strides = array<i32>} : memref<8x128xbf16, #tpu.memory_space<vmem>>, vector<8x128xbf16>,
    } else {
    }
    %c0 = arith.constant 0 : index
    %c0_1 = arith.constant 0 : index
    %3 = vector.load %arg7[%c0, %c0_1] : memref<8x128xbf16, #tpu.memory_space<vmem>>, vector<8x128xbf16>
    %c0_2 = arith.constant 0 : index
    %c0_3 = arith.constant 0 : index
    %4 = vector.load %arg5[%c0_2, %c0_3] : memref<128x128xbf16, #tpu.memory_space<vmem>>, vector<128x128xbf16>
    %cst = arith.constant dense<0.000000e+00> : vector<8x128xf32>
    %5 = tpu.matmul %3, %4, %cst {dimension_numbers = #tpu.dot_dimension_numbers<[1], [1], [0], [0], [0, 0, 1, 0], [], []>} : vector<8x128xbf16>, vector<128x128xbf16>, vector<8x128xf32> -> vector<8x128xf32>
    %c0_4 = arith.constant 0 : index
    %c0_5 = arith.constant 0 : index
    %c0_6 = arith.constant 0 : index
    %6 = vector.load %arg6[%c0_4, %c0_5, %c0_6] : memref<1x8x128xf32, #tpu.memory_space<vmem>>, vector<1x8x128xf32>
    %7 = vector.shape_cast %6 : vector<1x8x128xf32> to vector<8x128xf32>
    %8 = vector.shape_cast %5 : vector<8x128xf32> to vector<1x8x128xf32>
    tpu.vector_store %arg6[%c0_4, %c0_5, %c0_6], %8 {strides = array<i32>} : memref<1x8x128xf32, #tpu.memory_space<vmem>>, vector<1x8x128xf32>,
    return
  }
  func.func @transform_0(%arg0: i32, %arg1: i32) -> (i32, i32, i32) {
    %c0_i32 = arith.constant 0 : i32
    %c0_i32_0 = arith.constant 0 : i32
    %c0_i32_1 = arith.constant 0 : i32
    return %arg0, %c0_i32, %c0_i32_0 : i32, i32, i32
  }
  func.func @transform_1(%arg0: i32, %arg1: i32) -> (i32, i32) {
    %c0_i32 = arith.constant 0 : i32
    %c0_i32_0 = arith.constant 0 : i32
    %c0_i32_1 = arith.constant 0 : i32
    return %c0_i32, %c0_i32_0 : i32, i32
  }
  func.func @transform_2(%arg0: i32, %arg1: i32) -> (i32, i32) {
    %c0_i32 = arith.constant 0 : i32
    %c0_i32_0 = arith.constant 0 : i32
    %c0_i32_1 = arith.constant 0 : i32
    return %c0_i32, %c0_i32_0 : i32, i32
  }
  func.func @transform_3(%arg0: i32, %arg1: i32) -> (i32, i32) {
    %c0_i32 = arith.constant 0 : i32
    %c0_i32_0 = arith.constant 0 : i32
    return %arg1, %c0_i32 : i32, i32
  }
  func.func @transform_4(%arg0: i32, %arg1: i32) -> (i32, i32, i32) {
    %c0_i32 = arith.constant 0 : i32
    %c0_i32_0 = arith.constant 0 : i32
    return %arg0, %c0_i32, %arg1 : i32, i32, i32
  }
}

module attributes {stable_mosaic.version = 11 : i64} {
  func.func @_block_kernel(%arg0: i32, %arg1: memref<1x8x128xf32, #tpu.memory_space<vmem>>, %arg2: memref<1x128xf32, #tpu.memory_space<vmem>>, %arg3: memref<1x128xf32, #tpu.memory_space<vmem>>, %arg4: memref<128x384xbf16, #tpu.memory_space<vmem>>, %arg5: memref<1x384xf32, #tpu.memory_space<vmem>>, %arg6: memref<128x128xbf16, #tpu.memory_space<vmem>>, %arg7: memref<1x128xf32, #tpu.memory_space<vmem>>, %arg8: memref<1x128xf32, #tpu.memory_space<vmem>>, %arg9: memref<1x128xf32, #tpu.memory_space<vmem>>, %arg10: memref<128x512xbf16, #tpu.memory_space<vmem>>, %arg11: memref<1x512xf32, #tpu.memory_space<vmem>>, %arg12: memref<512x128xbf16, #tpu.memory_space<vmem>>, %arg13: memref<1x128xf32, #tpu.memory_space<vmem>>, %arg14: memref<1x8x128xf32, #tpu.memory_space<vmem>>, %arg15: memref<8x128xf32, #tpu.memory_space<vmem>>) attributes {dimension_semantics = [#tpu.dimension_semantics<parallel>], iteration_bounds = array<i64: 2>, scalar_prefetch = 0 : i64, scratch_operands = 1 : i64, tpu.core_type = #tpu.core_type<tc>, window_params = [{transform_indices = @transform_0, window_bounds = array<i64: 1, 8, 128>}, {pipeline_mode = #tpu.pipeline_mode<synchronous>, transform_indices = @transform_1, window_bounds = array<i64: 1, 128>}, {pipeline_mode = #tpu.pipeline_mode<synchronous>, transform_indices = @transform_2, window_bounds = array<i64: 1, 128>}, {pipeline_mode = #tpu.pipeline_mode<synchronous>, transform_indices = @transform_3, window_bounds = array<i64: 128, 384>}, {pipeline_mode = #tpu.pipeline_mode<synchronous>, transform_indices = @transform_4, window_bounds = array<i64: 1, 384>}, {pipeline_mode = #tpu.pipeline_mode<synchronous>, transform_indices = @transform_5, window_bounds = array<i64: 128, 128>}, {pipeline_mode = #tpu.pipeline_mode<synchronous>, transform_indices = @transform_6, window_bounds = array<i64: 1, 128>}, {pipeline_mode = #tpu.pipeline_mode<synchronous>, transform_indices = @transform_7, window_bounds = array<i64: 1, 128>}, {pipeline_mode = #tpu.pipeline_mode<synchronous>, transform_indices = @transform_8, window_bounds = array<i64: 1, 128>}, {pipeline_mode = #tpu.pipeline_mode<synchronous>, transform_indices = @transform_9, window_bounds = array<i64: 128, 512>}, {pipeline_mode = #tpu.pipeline_mode<synchronous>, transform_indices = @transform_10, window_bounds = array<i64: 1, 512>}, {pipeline_mode = #tpu.pipeline_mode<synchronous>, transform_indices = @transform_11, window_bounds = array<i64: 512, 128>}, {pipeline_mode = #tpu.pipeline_mode<synchronous>, transform_indices = @transform_12, window_bounds = array<i64: 1, 128>}, {transform_indices = @transform_13, window_bounds = array<i64: 1, 8, 128>}]} {
    %c0 = arith.constant 0 : index
    %c0_0 = arith.constant 0 : index
    %c0_1 = arith.constant 0 : index
    %0 = vector.load %arg1[%c0, %c0_0, %c0_1] : memref<1x8x128xf32, #tpu.memory_space<vmem>>, vector<1x8x128xf32>
    %1 = vector.shape_cast %0 : vector<1x8x128xf32> to vector<8x128xf32>
    %c0_2 = arith.constant 0 : index
    %c0_3 = arith.constant 0 : index
    %2 = vector.load %arg2[%c0_2, %c0_3] : memref<1x128xf32, #tpu.memory_space<vmem>>, vector<1x128xf32>
    %c0_4 = arith.constant 0 : index
    %c0_5 = arith.constant 0 : index
    %3 = vector.load %arg3[%c0_4, %c0_5] : memref<1x128xf32, #tpu.memory_space<vmem>>, vector<1x128xf32>
    %cst = arith.constant dense<0.000000e+00> : vector<8xf32>
    %4 = vector.multi_reduction <add>, %1, %cst [1] : vector<8x128xf32> to vector<8xf32>
    %5 = vector.shape_cast %4 : vector<8xf32> to vector<8x1xf32>
    %cst_6 = arith.constant 1.280000e+02 : f32
    %6 = vector.broadcast %cst_6 : f32 to vector<8x1xf32>
    %7 = arith.divf %5, %6 : vector<8x1xf32>
    %8 = vector.broadcast %7 : vector<8x1xf32> to vector<8x128xf32>
    %9 = arith.subf %1, %8 : vector<8x128xf32>
    %10 = arith.mulf %9, %9 : vector<8x128xf32>
    %cst_7 = arith.constant dense<0.000000e+00> : vector<8xf32>
    %11 = vector.multi_reduction <add>, %10, %cst_7 [1] : vector<8x128xf32> to vector<8xf32>
    %12 = vector.shape_cast %11 : vector<8xf32> to vector<8x1xf32>
    %cst_8 = arith.constant 1.280000e+02 : f32
    %13 = vector.broadcast %cst_8 : f32 to vector<8x1xf32>
    %14 = arith.divf %12, %13 : vector<8x1xf32>
    %cst_9 = arith.constant 9.99999974E-6 : f32
    %15 = vector.broadcast %cst_9 : f32 to vector<8x1xf32>
    %16 = arith.addf %14, %15 : vector<8x1xf32>
    %17 = math.rsqrt %16 : vector<8x1xf32>
    %18 = vector.broadcast %17 : vector<8x1xf32> to vector<8x128xf32>
    %19 = arith.mulf %9, %18 : vector<8x128xf32>
    %20 = vector.broadcast %2 : vector<1x128xf32> to vector<8x128xf32>
    %21 = arith.mulf %19, %20 : vector<8x128xf32>
    %22 = vector.broadcast %3 : vector<1x128xf32> to vector<8x128xf32>
    %23 = arith.addf %21, %22 : vector<8x128xf32>
    %24 = arith.truncf %23 : vector<8x128xf32> to vector<8x128xbf16>
    %c0_10 = arith.constant 0 : index
    %c0_11 = arith.constant 0 : index
    %25 = vector.load %arg4[%c0_10, %c0_11] : memref<128x384xbf16, #tpu.memory_space<vmem>>, vector<128x384xbf16>
    %cst_12 = arith.constant dense<0.000000e+00> : vector<8x384xf32>
    %26 = tpu.matmul %24, %25, %cst_12 {dimension_numbers = #tpu.dot_dimension_numbers<[1], [0], [0], [1], [0, 0, 1, 1], [], []>} : vector<8x128xbf16>, vector<128x384xbf16>, vector<8x384xf32> -> vector<8x384xf32>
    %c0_13 = arith.constant 0 : index
    %c0_14 = arith.constant 0 : index
    %27 = vector.load %arg5[%c0_13, %c0_14] : memref<1x384xf32, #tpu.memory_space<vmem>>, vector<1x384xf32>
    %28 = vector.broadcast %27 : vector<1x384xf32> to vector<8x384xf32>
    %29 = arith.addf %26, %28 : vector<8x384xf32>
    %30 = vector.extract_strided_slice %29 {offsets = [0, 0], sizes = [8, 128], strides = [1, 1]} : vector<8x384xf32> to vector<8x128xf32>
    %31 = arith.truncf %30 : vector<8x128xf32> to vector<8x128xbf16>
    %32 = vector.extract_strided_slice %29 {offsets = [0, 128], sizes = [8, 128], strides = [1, 1]} : vector<8x384xf32> to vector<8x128xf32>
    %33 = arith.truncf %32 : vector<8x128xf32> to vector<8x128xbf16>
    %34 = vector.extract_strided_slice %29 {offsets = [0, 256], sizes = [8, 128], strides = [1, 1]} : vector<8x384xf32> to vector<8x128xf32>
    %35 = arith.truncf %34 : vector<8x128xf32> to vector<8x128xbf16>
    %36 = tpu.iota {dimensions = array<i32: 0>} : vector<8x8xi32>
    %37 = tpu.iota {dimensions = array<i32: 1>} : vector<8x8xi32>
    %38 = arith.cmpi sle, %37, %36 : vector<8x8xi32>
    %39 = vector.extract_strided_slice %31 {offsets = [0, 0], sizes = [8, 32], strides = [1, 1]} : vector<8x128xbf16> to vector<8x32xbf16>
    %40 = vector.extract_strided_slice %33 {offsets = [0, 0], sizes = [8, 32], strides = [1, 1]} : vector<8x128xbf16> to vector<8x32xbf16>
    %41 = vector.extract_strided_slice %35 {offsets = [0, 0], sizes = [8, 32], strides = [1, 1]} : vector<8x128xbf16> to vector<8x32xbf16>
    %cst_15 = arith.constant dense<0.000000e+00> : vector<8x8xf32>
    %42 = tpu.matmul %39, %40, %cst_15 {dimension_numbers = #tpu.dot_dimension_numbers<[1], [1], [0], [0], [0, 0, 1, 0], [], []>} : vector<8x32xbf16>, vector<8x32xbf16>, vector<8x8xf32> -> vector<8x8xf32>
    %cst_16 = arith.constant -1.000000e+30 : f32
    %43 = vector.broadcast %cst_16 : f32 to vector<8x8xf32>
    %44 = arith.select %38, %42, %43 : vector<8x8xi1>, vector<8x8xf32>
    %cst_17 = arith.constant dense<0xFF800000> : vector<8xf32>
    %45 = vector.multi_reduction <maximumf>, %44, %cst_17 [1] : vector<8x8xf32> to vector<8xf32>
    %46 = vector.shape_cast %45 : vector<8xf32> to vector<8x1xf32>
    %47 = vector.broadcast %46 : vector<8x1xf32> to vector<8x8xf32>
    %48 = arith.subf %44, %47 : vector<8x8xf32>
    %49 = math.exp %48 : vector<8x8xf32>
    %cst_18 = arith.constant dense<0.000000e+00> : vector<8xf32>
    %50 = vector.multi_reduction <add>, %49, %cst_18 [1] : vector<8x8xf32> to vector<8xf32>
    %51 = vector.shape_cast %50 : vector<8xf32> to vector<8x1xf32>
    %52 = tpu.reciprocal %51 {approx = true} : vector<8x1xf32> -> vector<8x1xf32>
    %53 = vector.broadcast %52 : vector<8x1xf32> to vector<8x8xf32>
    %54 = arith.mulf %49, %53 : vector<8x8xf32>
    %55 = arith.truncf %54 : vector<8x8xf32> to vector<8x8xbf16>
    %cst_19 = arith.constant dense<0.000000e+00> : vector<8x32xf32>
    %56 = tpu.matmul %55, %41, %cst_19 {dimension_numbers = #tpu.dot_dimension_numbers<[1], [0], [0], [1], [0, 0, 1, 1], [], []>} : vector<8x8xbf16>, vector<8x32xbf16>, vector<8x32xf32> -> vector<8x32xf32>
    %c0_20 = arith.constant 0 : index
    %c0_21 = arith.constant 0 : index
    %57 = vector.load %arg15[%c0_20, %c0_21] : memref<8x128xf32, #tpu.memory_space<vmem>>, vector<8x32xf32>
    tpu.vector_store %arg15[%c0_20, %c0_21], %56 {strides = array<i32>} : memref<8x128xf32, #tpu.memory_space<vmem>>, vector<8x32xf32>,
    %58 = vector.extract_strided_slice %31 {offsets = [0, 32], sizes = [8, 32], strides = [1, 1]} : vector<8x128xbf16> to vector<8x32xbf16>
    %59 = vector.extract_strided_slice %33 {offsets = [0, 32], sizes = [8, 32], strides = [1, 1]} : vector<8x128xbf16> to vector<8x32xbf16>
    %60 = vector.extract_strided_slice %35 {offsets = [0, 32], sizes = [8, 32], strides = [1, 1]} : vector<8x128xbf16> to vector<8x32xbf16>
    %cst_22 = arith.constant dense<0.000000e+00> : vector<8x8xf32>
    %61 = tpu.matmul %58, %59, %cst_22 {dimension_numbers = #tpu.dot_dimension_numbers<[1], [1], [0], [0], [0, 0, 1, 0], [], []>} : vector<8x32xbf16>, vector<8x32xbf16>, vector<8x8xf32> -> vector<8x8xf32>
    %cst_23 = arith.constant -1.000000e+30 : f32
    %62 = vector.broadcast %cst_23 : f32 to vector<8x8xf32>
    %63 = arith.select %38, %61, %62 : vector<8x8xi1>, vector<8x8xf32>
    %cst_24 = arith.constant dense<0xFF800000> : vector<8xf32>
    %64 = vector.multi_reduction <maximumf>, %63, %cst_24 [1] : vector<8x8xf32> to vector<8xf32>
    %65 = vector.shape_cast %64 : vector<8xf32> to vector<8x1xf32>
    %66 = vector.broadcast %65 : vector<8x1xf32> to vector<8x8xf32>
    %67 = arith.subf %63, %66 : vector<8x8xf32>
    %68 = math.exp %67 : vector<8x8xf32>
    %cst_25 = arith.constant dense<0.000000e+00> : vector<8xf32>
    %69 = vector.multi_reduction <add>, %68, %cst_25 [1] : vector<8x8xf32> to vector<8xf32>
    %70 = vector.shape_cast %69 : vector<8xf32> to vector<8x1xf32>
    %71 = tpu.reciprocal %70 {approx = true} : vector<8x1xf32> -> vector<8x1xf32>
    %72 = vector.broadcast %71 : vector<8x1xf32> to vector<8x8xf32>
    %73 = arith.mulf %68, %72 : vector<8x8xf32>
    %74 = arith.truncf %73 : vector<8x8xf32> to vector<8x8xbf16>
    %cst_26 = arith.constant dense<0.000000e+00> : vector<8x32xf32>
    %75 = tpu.matmul %74, %60, %cst_26 {dimension_numbers = #tpu.dot_dimension_numbers<[1], [0], [0], [1], [0, 0, 1, 1], [], []>} : vector<8x8xbf16>, vector<8x32xbf16>, vector<8x32xf32> -> vector<8x32xf32>
    %c0_27 = arith.constant 0 : index
    %c32 = arith.constant 32 : index
    %76 = vector.load %arg15[%c0_27, %c32] : memref<8x128xf32, #tpu.memory_space<vmem>>, vector<8x32xf32>
    tpu.vector_store %arg15[%c0_27, %c32], %75 {strides = array<i32>} : memref<8x128xf32, #tpu.memory_space<vmem>>, vector<8x32xf32>,
    %77 = vector.extract_strided_slice %31 {offsets = [0, 64], sizes = [8, 32], strides = [1, 1]} : vector<8x128xbf16> to vector<8x32xbf16>
    %78 = vector.extract_strided_slice %33 {offsets = [0, 64], sizes = [8, 32], strides = [1, 1]} : vector<8x128xbf16> to vector<8x32xbf16>
    %79 = vector.extract_strided_slice %35 {offsets = [0, 64], sizes = [8, 32], strides = [1, 1]} : vector<8x128xbf16> to vector<8x32xbf16>
    %cst_28 = arith.constant dense<0.000000e+00> : vector<8x8xf32>
    %80 = tpu.matmul %77, %78, %cst_28 {dimension_numbers = #tpu.dot_dimension_numbers<[1], [1], [0], [0], [0, 0, 1, 0], [], []>} : vector<8x32xbf16>, vector<8x32xbf16>, vector<8x8xf32> -> vector<8x8xf32>
    %cst_29 = arith.constant -1.000000e+30 : f32
    %81 = vector.broadcast %cst_29 : f32 to vector<8x8xf32>
    %82 = arith.select %38, %80, %81 : vector<8x8xi1>, vector<8x8xf32>
    %cst_30 = arith.constant dense<0xFF800000> : vector<8xf32>
    %83 = vector.multi_reduction <maximumf>, %82, %cst_30 [1] : vector<8x8xf32> to vector<8xf32>
    %84 = vector.shape_cast %83 : vector<8xf32> to vector<8x1xf32>
    %85 = vector.broadcast %84 : vector<8x1xf32> to vector<8x8xf32>
    %86 = arith.subf %82, %85 : vector<8x8xf32>
    %87 = math.exp %86 : vector<8x8xf32>
    %cst_31 = arith.constant dense<0.000000e+00> : vector<8xf32>
    %88 = vector.multi_reduction <add>, %87, %cst_31 [1] : vector<8x8xf32> to vector<8xf32>
    %89 = vector.shape_cast %88 : vector<8xf32> to vector<8x1xf32>
    %90 = tpu.reciprocal %89 {approx = true} : vector<8x1xf32> -> vector<8x1xf32>
    %91 = vector.broadcast %90 : vector<8x1xf32> to vector<8x8xf32>
    %92 = arith.mulf %87, %91 : vector<8x8xf32>
    %93 = arith.truncf %92 : vector<8x8xf32> to vector<8x8xbf16>
    %cst_32 = arith.constant dense<0.000000e+00> : vector<8x32xf32>
    %94 = tpu.matmul %93, %79, %cst_32 {dimension_numbers = #tpu.dot_dimension_numbers<[1], [0], [0], [1], [0, 0, 1, 1], [], []>} : vector<8x8xbf16>, vector<8x32xbf16>, vector<8x32xf32> -> vector<8x32xf32>
    %c0_33 = arith.constant 0 : index
    %c64 = arith.constant 64 : index
    %95 = vector.load %arg15[%c0_33, %c64] : memref<8x128xf32, #tpu.memory_space<vmem>>, vector<8x32xf32>
    tpu.vector_store %arg15[%c0_33, %c64], %94 {strides = array<i32>} : memref<8x128xf32, #tpu.memory_space<vmem>>, vector<8x32xf32>,
    %96 = vector.extract_strided_slice %31 {offsets = [0, 96], sizes = [8, 32], strides = [1, 1]} : vector<8x128xbf16> to vector<8x32xbf16>
    %97 = vector.extract_strided_slice %33 {offsets = [0, 96], sizes = [8, 32], strides = [1, 1]} : vector<8x128xbf16> to vector<8x32xbf16>
    %98 = vector.extract_strided_slice %35 {offsets = [0, 96], sizes = [8, 32], strides = [1, 1]} : vector<8x128xbf16> to vector<8x32xbf16>
    %cst_34 = arith.constant dense<0.000000e+00> : vector<8x8xf32>
    %99 = tpu.matmul %96, %97, %cst_34 {dimension_numbers = #tpu.dot_dimension_numbers<[1], [1], [0], [0], [0, 0, 1, 0], [], []>} : vector<8x32xbf16>, vector<8x32xbf16>, vector<8x8xf32> -> vector<8x8xf32>
    %cst_35 = arith.constant -1.000000e+30 : f32
    %100 = vector.broadcast %cst_35 : f32 to vector<8x8xf32>
    %101 = arith.select %38, %99, %100 : vector<8x8xi1>, vector<8x8xf32>
    %cst_36 = arith.constant dense<0xFF800000> : vector<8xf32>
    %102 = vector.multi_reduction <maximumf>, %101, %cst_36 [1] : vector<8x8xf32> to vector<8xf32>
    %103 = vector.shape_cast %102 : vector<8xf32> to vector<8x1xf32>
    %104 = vector.broadcast %103 : vector<8x1xf32> to vector<8x8xf32>
    %105 = arith.subf %101, %104 : vector<8x8xf32>
    %106 = math.exp %105 : vector<8x8xf32>
    %cst_37 = arith.constant dense<0.000000e+00> : vector<8xf32>
    %107 = vector.multi_reduction <add>, %106, %cst_37 [1] : vector<8x8xf32> to vector<8xf32>
    %108 = vector.shape_cast %107 : vector<8xf32> to vector<8x1xf32>
    %109 = tpu.reciprocal %108 {approx = true} : vector<8x1xf32> -> vector<8x1xf32>
    %110 = vector.broadcast %109 : vector<8x1xf32> to vector<8x8xf32>
    %111 = arith.mulf %106, %110 : vector<8x8xf32>
    %112 = arith.truncf %111 : vector<8x8xf32> to vector<8x8xbf16>
    %cst_38 = arith.constant dense<0.000000e+00> : vector<8x32xf32>
    %113 = tpu.matmul %112, %98, %cst_38 {dimension_numbers = #tpu.dot_dimension_numbers<[1], [0], [0], [1], [0, 0, 1, 1], [], []>} : vector<8x8xbf16>, vector<8x32xbf16>, vector<8x32xf32> -> vector<8x32xf32>
    %c0_39 = arith.constant 0 : index
    %c96 = arith.constant 96 : index
    %114 = vector.load %arg15[%c0_39, %c96] : memref<8x128xf32, #tpu.memory_space<vmem>>, vector<8x32xf32>
    tpu.vector_store %arg15[%c0_39, %c96], %113 {strides = array<i32>} : memref<8x128xf32, #tpu.memory_space<vmem>>, vector<8x32xf32>,
    %c0_40 = arith.constant 0 : index
    %c0_41 = arith.constant 0 : index
    %115 = vector.load %arg15[%c0_40, %c0_41] : memref<8x128xf32, #tpu.memory_space<vmem>>, vector<8x128xf32>
    %116 = arith.truncf %115 : vector<8x128xf32> to vector<8x128xbf16>
    %c0_42 = arith.constant 0 : index
    %c0_43 = arith.constant 0 : index
    %117 = vector.load %arg6[%c0_42, %c0_43] : memref<128x128xbf16, #tpu.memory_space<vmem>>, vector<128x128xbf16>
    %cst_44 = arith.constant dense<0.000000e+00> : vector<8x128xf32>
    %118 = tpu.matmul %116, %117, %cst_44 {dimension_numbers = #tpu.dot_dimension_numbers<[1], [0], [0], [1], [0, 0, 1, 1], [], []>} : vector<8x128xbf16>, vector<128x128xbf16>, vector<8x128xf32> -> vector<8x128xf32>
    %c0_45 = arith.constant 0 : index
    %c0_46 = arith.constant 0 : index
    %119 = vector.load %arg7[%c0_45, %c0_46] : memref<1x128xf32, #tpu.memory_space<vmem>>, vector<1x128xf32>
    %120 = vector.broadcast %119 : vector<1x128xf32> to vector<8x128xf32>
    %121 = arith.addf %118, %120 : vector<8x128xf32>
    %122 = arith.addf %1, %121 : vector<8x128xf32>
    %c0_47 = arith.constant 0 : index
    %c0_48 = arith.constant 0 : index
    %123 = vector.load %arg8[%c0_47, %c0_48] : memref<1x128xf32, #tpu.memory_space<vmem>>, vector<1x128xf32>
    %c0_49 = arith.constant 0 : index
    %c0_50 = arith.constant 0 : index
    %124 = vector.load %arg9[%c0_49, %c0_50] : memref<1x128xf32, #tpu.memory_space<vmem>>, vector<1x128xf32>
    %cst_51 = arith.constant dense<0.000000e+00> : vector<8xf32>
    %125 = vector.multi_reduction <add>, %122, %cst_51 [1] : vector<8x128xf32> to vector<8xf32>
    %126 = vector.shape_cast %125 : vector<8xf32> to vector<8x1xf32>
    %cst_52 = arith.constant 1.280000e+02 : f32
    %127 = vector.broadcast %cst_52 : f32 to vector<8x1xf32>
    %128 = arith.divf %126, %127 : vector<8x1xf32>
    %129 = vector.broadcast %128 : vector<8x1xf32> to vector<8x128xf32>
    %130 = arith.subf %122, %129 : vector<8x128xf32>
    %131 = arith.mulf %130, %130 : vector<8x128xf32>
    %cst_53 = arith.constant dense<0.000000e+00> : vector<8xf32>
    %132 = vector.multi_reduction <add>, %131, %cst_53 [1] : vector<8x128xf32> to vector<8xf32>
    %133 = vector.shape_cast %132 : vector<8xf32> to vector<8x1xf32>
    %cst_54 = arith.constant 1.280000e+02 : f32
    %134 = vector.broadcast %cst_54 : f32 to vector<8x1xf32>
    %135 = arith.divf %133, %134 : vector<8x1xf32>
    %cst_55 = arith.constant 9.99999974E-6 : f32
    %136 = vector.broadcast %cst_55 : f32 to vector<8x1xf32>
    %137 = arith.addf %135, %136 : vector<8x1xf32>
    %138 = math.rsqrt %137 : vector<8x1xf32>
    %139 = vector.broadcast %138 : vector<8x1xf32> to vector<8x128xf32>
    %140 = arith.mulf %130, %139 : vector<8x128xf32>
    %141 = vector.broadcast %123 : vector<1x128xf32> to vector<8x128xf32>
    %142 = arith.mulf %140, %141 : vector<8x128xf32>
    %143 = vector.broadcast %124 : vector<1x128xf32> to vector<8x128xf32>
    %144 = arith.addf %142, %143 : vector<8x128xf32>
    %145 = arith.truncf %144 : vector<8x128xf32> to vector<8x128xbf16>
    %c0_56 = arith.constant 0 : index
    %c0_57 = arith.constant 0 : index
    %146 = vector.load %arg10[%c0_56, %c0_57] : memref<128x512xbf16, #tpu.memory_space<vmem>>, vector<128x512xbf16>
    %cst_58 = arith.constant dense<0.000000e+00> : vector<8x512xf32>
    %147 = tpu.matmul %145, %146, %cst_58 {dimension_numbers = #tpu.dot_dimension_numbers<[1], [0], [0], [1], [0, 0, 1, 1], [], []>} : vector<8x128xbf16>, vector<128x512xbf16>, vector<8x512xf32> -> vector<8x512xf32>
    %c0_59 = arith.constant 0 : index
    %c0_60 = arith.constant 0 : index
    %148 = vector.load %arg11[%c0_59, %c0_60] : memref<1x512xf32, #tpu.memory_space<vmem>>, vector<1x512xf32>
    %149 = vector.broadcast %148 : vector<1x512xf32> to vector<8x512xf32>
    %150 = arith.addf %147, %149 : vector<8x512xf32>
    %cst_61 = arith.constant 5.000000e-01 : f32
    %151 = vector.broadcast %cst_61 : f32 to vector<8x512xf32>
    %152 = arith.mulf %151, %150 : vector<8x512xf32>
    %cst_62 = arith.constant 0.707106769 : f32
    %153 = vector.broadcast %cst_62 : f32 to vector<8x512xf32>
    %154 = arith.mulf %150, %153 : vector<8x512xf32>
    %155 = math.erf %154 : vector<8x512xf32>
    %cst_63 = arith.constant 1.000000e+00 : f32
    %156 = vector.broadcast %cst_63 : f32 to vector<8x512xf32>
    %157 = arith.addf %156, %155 : vector<8x512xf32>
    %158 = arith.mulf %152, %157 : vector<8x512xf32>
    %159 = arith.truncf %158 : vector<8x512xf32> to vector<8x512xbf16>
    %c0_64 = arith.constant 0 : index
    %c0_65 = arith.constant 0 : index
    %160 = vector.load %arg12[%c0_64, %c0_65] : memref<512x128xbf16, #tpu.memory_space<vmem>>, vector<512x128xbf16>
    %cst_66 = arith.constant dense<0.000000e+00> : vector<8x128xf32>
    %161 = tpu.matmul %159, %160, %cst_66 {dimension_numbers = #tpu.dot_dimension_numbers<[1], [0], [0], [1], [0, 0, 1, 1], [], []>} : vector<8x512xbf16>, vector<512x128xbf16>, vector<8x128xf32> -> vector<8x128xf32>
    %c0_67 = arith.constant 0 : index
    %c0_68 = arith.constant 0 : index
    %162 = vector.load %arg13[%c0_67, %c0_68] : memref<1x128xf32, #tpu.memory_space<vmem>>, vector<1x128xf32>
    %163 = vector.broadcast %162 : vector<1x128xf32> to vector<8x128xf32>
    %164 = arith.addf %161, %163 : vector<8x128xf32>
    %165 = arith.addf %122, %164 : vector<8x128xf32>
    %c0_69 = arith.constant 0 : index
    %c0_70 = arith.constant 0 : index
    %c0_71 = arith.constant 0 : index
    %166 = vector.load %arg14[%c0_69, %c0_70, %c0_71] : memref<1x8x128xf32, #tpu.memory_space<vmem>>, vector<1x8x128xf32>
    %167 = vector.shape_cast %166 : vector<1x8x128xf32> to vector<8x128xf32>
    %168 = vector.shape_cast %165 : vector<8x128xf32> to vector<1x8x128xf32>
    tpu.vector_store %arg14[%c0_69, %c0_70, %c0_71], %168 {strides = array<i32>} : memref<1x8x128xf32, #tpu.memory_space<vmem>>, vector<1x8x128xf32>,
    return
  }
  func.func @transform_0(%arg0: i32) -> (i32, i32, i32) {
    %c0_i32 = arith.constant 0 : i32
    %c0_i32_0 = arith.constant 0 : i32
    %c0_i32_1 = arith.constant 0 : i32
    return %arg0, %c0_i32, %c0_i32_0 : i32, i32, i32
  }
  func.func @transform_1(%arg0: i32) -> (i32, i32) {
    %c0_i32 = arith.constant 0 : i32
    %c0_i32_0 = arith.constant 0 : i32
    %c0_i32_1 = arith.constant 0 : i32
    return %c0_i32, %c0_i32_0 : i32, i32
  }
  func.func @transform_2(%arg0: i32) -> (i32, i32) {
    %c0_i32 = arith.constant 0 : i32
    %c0_i32_0 = arith.constant 0 : i32
    %c0_i32_1 = arith.constant 0 : i32
    return %c0_i32, %c0_i32_0 : i32, i32
  }
  func.func @transform_3(%arg0: i32) -> (i32, i32) {
    %c0_i32 = arith.constant 0 : i32
    %c0_i32_0 = arith.constant 0 : i32
    %c0_i32_1 = arith.constant 0 : i32
    return %c0_i32, %c0_i32_0 : i32, i32
  }
  func.func @transform_4(%arg0: i32) -> (i32, i32) {
    %c0_i32 = arith.constant 0 : i32
    %c0_i32_0 = arith.constant 0 : i32
    %c0_i32_1 = arith.constant 0 : i32
    return %c0_i32, %c0_i32_0 : i32, i32
  }
  func.func @transform_5(%arg0: i32) -> (i32, i32) {
    %c0_i32 = arith.constant 0 : i32
    %c0_i32_0 = arith.constant 0 : i32
    %c0_i32_1 = arith.constant 0 : i32
    return %c0_i32, %c0_i32_0 : i32, i32
  }
  func.func @transform_6(%arg0: i32) -> (i32, i32) {
    %c0_i32 = arith.constant 0 : i32
    %c0_i32_0 = arith.constant 0 : i32
    %c0_i32_1 = arith.constant 0 : i32
    return %c0_i32, %c0_i32_0 : i32, i32
  }
  func.func @transform_7(%arg0: i32) -> (i32, i32) {
    %c0_i32 = arith.constant 0 : i32
    %c0_i32_0 = arith.constant 0 : i32
    %c0_i32_1 = arith.constant 0 : i32
    return %c0_i32, %c0_i32_0 : i32, i32
  }
  func.func @transform_8(%arg0: i32) -> (i32, i32) {
    %c0_i32 = arith.constant 0 : i32
    %c0_i32_0 = arith.constant 0 : i32
    %c0_i32_1 = arith.constant 0 : i32
    return %c0_i32, %c0_i32_0 : i32, i32
  }
  func.func @transform_9(%arg0: i32) -> (i32, i32) {
    %c0_i32 = arith.constant 0 : i32
    %c0_i32_0 = arith.constant 0 : i32
    %c0_i32_1 = arith.constant 0 : i32
    return %c0_i32, %c0_i32_0 : i32, i32
  }
  func.func @transform_10(%arg0: i32) -> (i32, i32) {
    %c0_i32 = arith.constant 0 : i32
    %c0_i32_0 = arith.constant 0 : i32
    %c0_i32_1 = arith.constant 0 : i32
    return %c0_i32, %c0_i32_0 : i32, i32
  }
  func.func @transform_11(%arg0: i32) -> (i32, i32) {
    %c0_i32 = arith.constant 0 : i32
    %c0_i32_0 = arith.constant 0 : i32
    %c0_i32_1 = arith.constant 0 : i32
    return %c0_i32, %c0_i32_0 : i32, i32
  }
  func.func @transform_12(%arg0: i32) -> (i32, i32) {
    %c0_i32 = arith.constant 0 : i32
    %c0_i32_0 = arith.constant 0 : i32
    %c0_i32_1 = arith.constant 0 : i32
    return %c0_i32, %c0_i32_0 : i32, i32
  }
  func.func @transform_13(%arg0: i32) -> (i32, i32, i32) {
    %c0_i32 = arith.constant 0 : i32
    %c0_i32_0 = arith.constant 0 : i32
    %c0_i32_1 = arith.constant 0 : i32
    return %arg0, %c0_i32, %c0_i32_0 : i32, i32, i32
  }
}

module attributes {stable_mosaic.version = 11 : i64} {
  func.func @_block_kernel(%arg0: i32, %arg1: memref<1x8x128xf32, #tpu.memory_space<vmem>>, %arg2: memref<1x128xf32, #tpu.memory_space<vmem>>, %arg3: memref<1x128xf32, #tpu.memory_space<vmem>>, %arg4: memref<128x384xbf16, #tpu.memory_space<vmem>>, %arg5: memref<1x384xf32, #tpu.memory_space<vmem>>, %arg6: memref<128x128xbf16, #tpu.memory_space<vmem>>, %arg7: memref<1x128xf32, #tpu.memory_space<vmem>>, %arg8: memref<1x128xf32, #tpu.memory_space<vmem>>, %arg9: memref<1x128xf32, #tpu.memory_space<vmem>>, %arg10: memref<128x512xbf16, #tpu.memory_space<vmem>>, %arg11: memref<1x512xf32, #tpu.memory_space<vmem>>, %arg12: memref<512x128xbf16, #tpu.memory_space<vmem>>, %arg13: memref<1x128xf32, #tpu.memory_space<vmem>>, %arg14: memref<1x8x128xf32, #tpu.memory_space<vmem>>, %arg15: memref<8x128xf32, #tpu.memory_space<vmem>>) attributes {dimension_semantics = [#tpu.dimension_semantics<parallel>], iteration_bounds = array<i64: 2>, scalar_prefetch = 0 : i64, scratch_operands = 1 : i64, tpu.core_type = #tpu.core_type<tc>, window_params = [{transform_indices = @transform_0, window_bounds = array<i64: 1, 8, 128>}, {pipeline_mode = #tpu.pipeline_mode<synchronous>, transform_indices = @transform_1, window_bounds = array<i64: 1, 128>}, {pipeline_mode = #tpu.pipeline_mode<synchronous>, transform_indices = @transform_2, window_bounds = array<i64: 1, 128>}, {pipeline_mode = #tpu.pipeline_mode<synchronous>, transform_indices = @transform_3, window_bounds = array<i64: 128, 384>}, {pipeline_mode = #tpu.pipeline_mode<synchronous>, transform_indices = @transform_4, window_bounds = array<i64: 1, 384>}, {pipeline_mode = #tpu.pipeline_mode<synchronous>, transform_indices = @transform_5, window_bounds = array<i64: 128, 128>}, {pipeline_mode = #tpu.pipeline_mode<synchronous>, transform_indices = @transform_6, window_bounds = array<i64: 1, 128>}, {pipeline_mode = #tpu.pipeline_mode<synchronous>, transform_indices = @transform_7, window_bounds = array<i64: 1, 128>}, {pipeline_mode = #tpu.pipeline_mode<synchronous>, transform_indices = @transform_8, window_bounds = array<i64: 1, 128>}, {pipeline_mode = #tpu.pipeline_mode<synchronous>, transform_indices = @transform_9, window_bounds = array<i64: 128, 512>}, {pipeline_mode = #tpu.pipeline_mode<synchronous>, transform_indices = @transform_10, window_bounds = array<i64: 1, 512>}, {pipeline_mode = #tpu.pipeline_mode<synchronous>, transform_indices = @transform_11, window_bounds = array<i64: 512, 128>}, {pipeline_mode = #tpu.pipeline_mode<synchronous>, transform_indices = @transform_12, window_bounds = array<i64: 1, 128>}, {transform_indices = @transform_13, window_bounds = array<i64: 1, 8, 128>}]} {
    %c0 = arith.constant 0 : index
    %c0_0 = arith.constant 0 : index
    %c0_1 = arith.constant 0 : index
    %0 = vector.load %arg1[%c0, %c0_0, %c0_1] : memref<1x8x128xf32, #tpu.memory_space<vmem>>, vector<1x8x128xf32>
    %1 = vector.shape_cast %0 : vector<1x8x128xf32> to vector<8x128xf32>
    %c0_2 = arith.constant 0 : index
    %c0_3 = arith.constant 0 : index
    %2 = vector.load %arg2[%c0_2, %c0_3] : memref<1x128xf32, #tpu.memory_space<vmem>>, vector<1x128xf32>
    %c0_4 = arith.constant 0 : index
    %c0_5 = arith.constant 0 : index
    %3 = vector.load %arg3[%c0_4, %c0_5] : memref<1x128xf32, #tpu.memory_space<vmem>>, vector<1x128xf32>
    %cst = arith.constant dense<0.000000e+00> : vector<8xf32>
    %4 = vector.multi_reduction <add>, %1, %cst [1] : vector<8x128xf32> to vector<8xf32>
    %5 = vector.shape_cast %4 : vector<8xf32> to vector<8x1xf32>
    %cst_6 = arith.constant 1.280000e+02 : f32
    %6 = vector.broadcast %cst_6 : f32 to vector<8x1xf32>
    %7 = arith.divf %5, %6 : vector<8x1xf32>
    %8 = vector.broadcast %7 : vector<8x1xf32> to vector<8x128xf32>
    %9 = arith.subf %1, %8 : vector<8x128xf32>
    %10 = arith.mulf %9, %9 : vector<8x128xf32>
    %cst_7 = arith.constant dense<0.000000e+00> : vector<8xf32>
    %11 = vector.multi_reduction <add>, %10, %cst_7 [1] : vector<8x128xf32> to vector<8xf32>
    %12 = vector.shape_cast %11 : vector<8xf32> to vector<8x1xf32>
    %cst_8 = arith.constant 1.280000e+02 : f32
    %13 = vector.broadcast %cst_8 : f32 to vector<8x1xf32>
    %14 = arith.divf %12, %13 : vector<8x1xf32>
    %cst_9 = arith.constant 9.99999974E-6 : f32
    %15 = vector.broadcast %cst_9 : f32 to vector<8x1xf32>
    %16 = arith.addf %14, %15 : vector<8x1xf32>
    %17 = math.rsqrt %16 : vector<8x1xf32>
    %18 = vector.broadcast %17 : vector<8x1xf32> to vector<8x128xf32>
    %19 = arith.mulf %9, %18 : vector<8x128xf32>
    %20 = vector.broadcast %2 : vector<1x128xf32> to vector<8x128xf32>
    %21 = arith.mulf %19, %20 : vector<8x128xf32>
    %22 = vector.broadcast %3 : vector<1x128xf32> to vector<8x128xf32>
    %23 = arith.addf %21, %22 : vector<8x128xf32>
    %24 = arith.truncf %23 : vector<8x128xf32> to vector<8x128xbf16>
    %c0_10 = arith.constant 0 : index
    %c0_11 = arith.constant 0 : index
    %25 = vector.load %arg4[%c0_10, %c0_11] : memref<128x384xbf16, #tpu.memory_space<vmem>>, vector<128x384xbf16>
    %cst_12 = arith.constant dense<0.000000e+00> : vector<8x384xf32>
    %26 = tpu.matmul %24, %25, %cst_12 {dimension_numbers = #tpu.dot_dimension_numbers<[1], [0], [0], [1], [0, 0, 1, 1], [], []>} : vector<8x128xbf16>, vector<128x384xbf16>, vector<8x384xf32> -> vector<8x384xf32>
    %c0_13 = arith.constant 0 : index
    %c0_14 = arith.constant 0 : index
    %27 = vector.load %arg5[%c0_13, %c0_14] : memref<1x384xf32, #tpu.memory_space<vmem>>, vector<1x384xf32>
    %28 = vector.broadcast %27 : vector<1x384xf32> to vector<8x384xf32>
    %29 = arith.addf %26, %28 : vector<8x384xf32>
    %30 = vector.extract_strided_slice %29 {offsets = [0, 0], sizes = [8, 128], strides = [1, 1]} : vector<8x384xf32> to vector<8x128xf32>
    %31 = arith.truncf %30 : vector<8x128xf32> to vector<8x128xbf16>
    %32 = vector.extract_strided_slice %29 {offsets = [0, 128], sizes = [8, 128], strides = [1, 1]} : vector<8x384xf32> to vector<8x128xf32>
    %33 = arith.truncf %32 : vector<8x128xf32> to vector<8x128xbf16>
    %34 = vector.extract_strided_slice %29 {offsets = [0, 256], sizes = [8, 128], strides = [1, 1]} : vector<8x384xf32> to vector<8x128xf32>
    %35 = arith.truncf %34 : vector<8x128xf32> to vector<8x128xbf16>
    %36 = tpu.iota {dimensions = array<i32: 0>} : vector<8x8xi32>
    %37 = tpu.iota {dimensions = array<i32: 1>} : vector<8x8xi32>
    %38 = arith.cmpi sle, %37, %36 : vector<8x8xi32>
    %39 = vector.extract_strided_slice %31 {offsets = [0, 0], sizes = [8, 32], strides = [1, 1]} : vector<8x128xbf16> to vector<8x32xbf16>
    %40 = vector.extract_strided_slice %33 {offsets = [0, 0], sizes = [8, 32], strides = [1, 1]} : vector<8x128xbf16> to vector<8x32xbf16>
    %41 = vector.extract_strided_slice %35 {offsets = [0, 0], sizes = [8, 32], strides = [1, 1]} : vector<8x128xbf16> to vector<8x32xbf16>
    %cst_15 = arith.constant dense<0.000000e+00> : vector<8x8xf32>
    %42 = tpu.matmul %39, %40, %cst_15 {dimension_numbers = #tpu.dot_dimension_numbers<[1], [1], [0], [0], [0, 0, 1, 0], [], []>} : vector<8x32xbf16>, vector<8x32xbf16>, vector<8x8xf32> -> vector<8x8xf32>
    %cst_16 = arith.constant -1.000000e+30 : f32
    %43 = vector.broadcast %cst_16 : f32 to vector<8x8xf32>
    %44 = arith.select %38, %42, %43 : vector<8x8xi1>, vector<8x8xf32>
    %cst_17 = arith.constant dense<0xFF800000> : vector<8xf32>
    %45 = vector.multi_reduction <maximumf>, %44, %cst_17 [1] : vector<8x8xf32> to vector<8xf32>
    %46 = vector.shape_cast %45 : vector<8xf32> to vector<8x1xf32>
    %47 = vector.broadcast %46 : vector<8x1xf32> to vector<8x8xf32>
    %48 = arith.subf %44, %47 : vector<8x8xf32>
    %49 = math.exp %48 : vector<8x8xf32>
    %cst_18 = arith.constant dense<0.000000e+00> : vector<8xf32>
    %50 = vector.multi_reduction <add>, %49, %cst_18 [1] : vector<8x8xf32> to vector<8xf32>
    %51 = vector.shape_cast %50 : vector<8xf32> to vector<8x1xf32>
    %52 = tpu.reciprocal %51 {approx = true} : vector<8x1xf32> -> vector<8x1xf32>
    %53 = vector.broadcast %52 : vector<8x1xf32> to vector<8x8xf32>
    %54 = arith.mulf %49, %53 : vector<8x8xf32>
    %55 = arith.truncf %54 : vector<8x8xf32> to vector<8x8xbf16>
    %cst_19 = arith.constant dense<0.000000e+00> : vector<8x32xf32>
    %56 = tpu.matmul %55, %41, %cst_19 {dimension_numbers = #tpu.dot_dimension_numbers<[1], [0], [0], [1], [0, 0, 1, 1], [], []>} : vector<8x8xbf16>, vector<8x32xbf16>, vector<8x32xf32> -> vector<8x32xf32>
    %c0_20 = arith.constant 0 : index
    %c0_21 = arith.constant 0 : index
    %57 = vector.load %arg15[%c0_20, %c0_21] : memref<8x128xf32, #tpu.memory_space<vmem>>, vector<8x32xf32>
    tpu.vector_store %arg15[%c0_20, %c0_21], %56 {strides = array<i32>} : memref<8x128xf32, #tpu.memory_space<vmem>>, vector<8x32xf32>,
    %58 = vector.extract_strided_slice %31 {offsets = [0, 32], sizes = [8, 32], strides = [1, 1]} : vector<8x128xbf16> to vector<8x32xbf16>
    %59 = vector.extract_strided_slice %33 {offsets = [0, 32], sizes = [8, 32], strides = [1, 1]} : vector<8x128xbf16> to vector<8x32xbf16>
    %60 = vector.extract_strided_slice %35 {offsets = [0, 32], sizes = [8, 32], strides = [1, 1]} : vector<8x128xbf16> to vector<8x32xbf16>
    %cst_22 = arith.constant dense<0.000000e+00> : vector<8x8xf32>
    %61 = tpu.matmul %58, %59, %cst_22 {dimension_numbers = #tpu.dot_dimension_numbers<[1], [1], [0], [0], [0, 0, 1, 0], [], []>} : vector<8x32xbf16>, vector<8x32xbf16>, vector<8x8xf32> -> vector<8x8xf32>
    %cst_23 = arith.constant -1.000000e+30 : f32
    %62 = vector.broadcast %cst_23 : f32 to vector<8x8xf32>
    %63 = arith.select %38, %61, %62 : vector<8x8xi1>, vector<8x8xf32>
    %cst_24 = arith.constant dense<0xFF800000> : vector<8xf32>
    %64 = vector.multi_reduction <maximumf>, %63, %cst_24 [1] : vector<8x8xf32> to vector<8xf32>
    %65 = vector.shape_cast %64 : vector<8xf32> to vector<8x1xf32>
    %66 = vector.broadcast %65 : vector<8x1xf32> to vector<8x8xf32>
    %67 = arith.subf %63, %66 : vector<8x8xf32>
    %68 = math.exp %67 : vector<8x8xf32>
    %cst_25 = arith.constant dense<0.000000e+00> : vector<8xf32>
    %69 = vector.multi_reduction <add>, %68, %cst_25 [1] : vector<8x8xf32> to vector<8xf32>
    %70 = vector.shape_cast %69 : vector<8xf32> to vector<8x1xf32>
    %71 = tpu.reciprocal %70 {approx = true} : vector<8x1xf32> -> vector<8x1xf32>
    %72 = vector.broadcast %71 : vector<8x1xf32> to vector<8x8xf32>
    %73 = arith.mulf %68, %72 : vector<8x8xf32>
    %74 = arith.truncf %73 : vector<8x8xf32> to vector<8x8xbf16>
    %cst_26 = arith.constant dense<0.000000e+00> : vector<8x32xf32>
    %75 = tpu.matmul %74, %60, %cst_26 {dimension_numbers = #tpu.dot_dimension_numbers<[1], [0], [0], [1], [0, 0, 1, 1], [], []>} : vector<8x8xbf16>, vector<8x32xbf16>, vector<8x32xf32> -> vector<8x32xf32>
    %c0_27 = arith.constant 0 : index
    %c32 = arith.constant 32 : index
    %76 = vector.load %arg15[%c0_27, %c32] : memref<8x128xf32, #tpu.memory_space<vmem>>, vector<8x32xf32>
    tpu.vector_store %arg15[%c0_27, %c32], %75 {strides = array<i32>} : memref<8x128xf32, #tpu.memory_space<vmem>>, vector<8x32xf32>,
    %77 = vector.extract_strided_slice %31 {offsets = [0, 64], sizes = [8, 32], strides = [1, 1]} : vector<8x128xbf16> to vector<8x32xbf16>
    %78 = vector.extract_strided_slice %33 {offsets = [0, 64], sizes = [8, 32], strides = [1, 1]} : vector<8x128xbf16> to vector<8x32xbf16>
    %79 = vector.extract_strided_slice %35 {offsets = [0, 64], sizes = [8, 32], strides = [1, 1]} : vector<8x128xbf16> to vector<8x32xbf16>
    %cst_28 = arith.constant dense<0.000000e+00> : vector<8x8xf32>
    %80 = tpu.matmul %77, %78, %cst_28 {dimension_numbers = #tpu.dot_dimension_numbers<[1], [1], [0], [0], [0, 0, 1, 0], [], []>} : vector<8x32xbf16>, vector<8x32xbf16>, vector<8x8xf32> -> vector<8x8xf32>
    %cst_29 = arith.constant -1.000000e+30 : f32
    %81 = vector.broadcast %cst_29 : f32 to vector<8x8xf32>
    %82 = arith.select %38, %80, %81 : vector<8x8xi1>, vector<8x8xf32>
    %cst_30 = arith.constant dense<0xFF800000> : vector<8xf32>
    %83 = vector.multi_reduction <maximumf>, %82, %cst_30 [1] : vector<8x8xf32> to vector<8xf32>
    %84 = vector.shape_cast %83 : vector<8xf32> to vector<8x1xf32>
    %85 = vector.broadcast %84 : vector<8x1xf32> to vector<8x8xf32>
    %86 = arith.subf %82, %85 : vector<8x8xf32>
    %87 = math.exp %86 : vector<8x8xf32>
    %cst_31 = arith.constant dense<0.000000e+00> : vector<8xf32>
    %88 = vector.multi_reduction <add>, %87, %cst_31 [1] : vector<8x8xf32> to vector<8xf32>
    %89 = vector.shape_cast %88 : vector<8xf32> to vector<8x1xf32>
    %90 = tpu.reciprocal %89 {approx = true} : vector<8x1xf32> -> vector<8x1xf32>
    %91 = vector.broadcast %90 : vector<8x1xf32> to vector<8x8xf32>
    %92 = arith.mulf %87, %91 : vector<8x8xf32>
    %93 = arith.truncf %92 : vector<8x8xf32> to vector<8x8xbf16>
    %cst_32 = arith.constant dense<0.000000e+00> : vector<8x32xf32>
    %94 = tpu.matmul %93, %79, %cst_32 {dimension_numbers = #tpu.dot_dimension_numbers<[1], [0], [0], [1], [0, 0, 1, 1], [], []>} : vector<8x8xbf16>, vector<8x32xbf16>, vector<8x32xf32> -> vector<8x32xf32>
    %c0_33 = arith.constant 0 : index
    %c64 = arith.constant 64 : index
    %95 = vector.load %arg15[%c0_33, %c64] : memref<8x128xf32, #tpu.memory_space<vmem>>, vector<8x32xf32>
    tpu.vector_store %arg15[%c0_33, %c64], %94 {strides = array<i32>} : memref<8x128xf32, #tpu.memory_space<vmem>>, vector<8x32xf32>,
    %96 = vector.extract_strided_slice %31 {offsets = [0, 96], sizes = [8, 32], strides = [1, 1]} : vector<8x128xbf16> to vector<8x32xbf16>
    %97 = vector.extract_strided_slice %33 {offsets = [0, 96], sizes = [8, 32], strides = [1, 1]} : vector<8x128xbf16> to vector<8x32xbf16>
    %98 = vector.extract_strided_slice %35 {offsets = [0, 96], sizes = [8, 32], strides = [1, 1]} : vector<8x128xbf16> to vector<8x32xbf16>
    %cst_34 = arith.constant dense<0.000000e+00> : vector<8x8xf32>
    %99 = tpu.matmul %96, %97, %cst_34 {dimension_numbers = #tpu.dot_dimension_numbers<[1], [1], [0], [0], [0, 0, 1, 0], [], []>} : vector<8x32xbf16>, vector<8x32xbf16>, vector<8x8xf32> -> vector<8x8xf32>
    %cst_35 = arith.constant -1.000000e+30 : f32
    %100 = vector.broadcast %cst_35 : f32 to vector<8x8xf32>
    %101 = arith.select %38, %99, %100 : vector<8x8xi1>, vector<8x8xf32>
    %cst_36 = arith.constant dense<0xFF800000> : vector<8xf32>
    %102 = vector.multi_reduction <maximumf>, %101, %cst_36 [1] : vector<8x8xf32> to vector<8xf32>
    %103 = vector.shape_cast %102 : vector<8xf32> to vector<8x1xf32>
    %104 = vector.broadcast %103 : vector<8x1xf32> to vector<8x8xf32>
    %105 = arith.subf %101, %104 : vector<8x8xf32>
    %106 = math.exp %105 : vector<8x8xf32>
    %cst_37 = arith.constant dense<0.000000e+00> : vector<8xf32>
    %107 = vector.multi_reduction <add>, %106, %cst_37 [1] : vector<8x8xf32> to vector<8xf32>
    %108 = vector.shape_cast %107 : vector<8xf32> to vector<8x1xf32>
    %109 = tpu.reciprocal %108 {approx = true} : vector<8x1xf32> -> vector<8x1xf32>
    %110 = vector.broadcast %109 : vector<8x1xf32> to vector<8x8xf32>
    %111 = arith.mulf %106, %110 : vector<8x8xf32>
    %112 = arith.truncf %111 : vector<8x8xf32> to vector<8x8xbf16>
    %cst_38 = arith.constant dense<0.000000e+00> : vector<8x32xf32>
    %113 = tpu.matmul %112, %98, %cst_38 {dimension_numbers = #tpu.dot_dimension_numbers<[1], [0], [0], [1], [0, 0, 1, 1], [], []>} : vector<8x8xbf16>, vector<8x32xbf16>, vector<8x32xf32> -> vector<8x32xf32>
    %c0_39 = arith.constant 0 : index
    %c96 = arith.constant 96 : index
    %114 = vector.load %arg15[%c0_39, %c96] : memref<8x128xf32, #tpu.memory_space<vmem>>, vector<8x32xf32>
    tpu.vector_store %arg15[%c0_39, %c96], %113 {strides = array<i32>} : memref<8x128xf32, #tpu.memory_space<vmem>>, vector<8x32xf32>,
    %c0_40 = arith.constant 0 : index
    %c0_41 = arith.constant 0 : index
    %115 = vector.load %arg15[%c0_40, %c0_41] : memref<8x128xf32, #tpu.memory_space<vmem>>, vector<8x128xf32>
    %116 = arith.truncf %115 : vector<8x128xf32> to vector<8x128xbf16>
    %c0_42 = arith.constant 0 : index
    %c0_43 = arith.constant 0 : index
    %117 = vector.load %arg6[%c0_42, %c0_43] : memref<128x128xbf16, #tpu.memory_space<vmem>>, vector<128x128xbf16>
    %cst_44 = arith.constant dense<0.000000e+00> : vector<8x128xf32>
    %118 = tpu.matmul %116, %117, %cst_44 {dimension_numbers = #tpu.dot_dimension_numbers<[1], [0], [0], [1], [0, 0, 1, 1], [], []>} : vector<8x128xbf16>, vector<128x128xbf16>, vector<8x128xf32> -> vector<8x128xf32>
    %c0_45 = arith.constant 0 : index
    %c0_46 = arith.constant 0 : index
    %119 = vector.load %arg7[%c0_45, %c0_46] : memref<1x128xf32, #tpu.memory_space<vmem>>, vector<1x128xf32>
    %120 = vector.broadcast %119 : vector<1x128xf32> to vector<8x128xf32>
    %121 = arith.addf %118, %120 : vector<8x128xf32>
    %122 = arith.addf %1, %121 : vector<8x128xf32>
    %c0_47 = arith.constant 0 : index
    %c0_48 = arith.constant 0 : index
    %123 = vector.load %arg8[%c0_47, %c0_48] : memref<1x128xf32, #tpu.memory_space<vmem>>, vector<1x128xf32>
    %c0_49 = arith.constant 0 : index
    %c0_50 = arith.constant 0 : index
    %124 = vector.load %arg9[%c0_49, %c0_50] : memref<1x128xf32, #tpu.memory_space<vmem>>, vector<1x128xf32>
    %cst_51 = arith.constant dense<0.000000e+00> : vector<8xf32>
    %125 = vector.multi_reduction <add>, %122, %cst_51 [1] : vector<8x128xf32> to vector<8xf32>
    %126 = vector.shape_cast %125 : vector<8xf32> to vector<8x1xf32>
    %cst_52 = arith.constant 1.280000e+02 : f32
    %127 = vector.broadcast %cst_52 : f32 to vector<8x1xf32>
    %128 = arith.divf %126, %127 : vector<8x1xf32>
    %129 = vector.broadcast %128 : vector<8x1xf32> to vector<8x128xf32>
    %130 = arith.subf %122, %129 : vector<8x128xf32>
    %131 = arith.mulf %130, %130 : vector<8x128xf32>
    %cst_53 = arith.constant dense<0.000000e+00> : vector<8xf32>
    %132 = vector.multi_reduction <add>, %131, %cst_53 [1] : vector<8x128xf32> to vector<8xf32>
    %133 = vector.shape_cast %132 : vector<8xf32> to vector<8x1xf32>
    %cst_54 = arith.constant 1.280000e+02 : f32
    %134 = vector.broadcast %cst_54 : f32 to vector<8x1xf32>
    %135 = arith.divf %133, %134 : vector<8x1xf32>
    %cst_55 = arith.constant 9.99999974E-6 : f32
    %136 = vector.broadcast %cst_55 : f32 to vector<8x1xf32>
    %137 = arith.addf %135, %136 : vector<8x1xf32>
    %138 = math.rsqrt %137 : vector<8x1xf32>
    %139 = vector.broadcast %138 : vector<8x1xf32> to vector<8x128xf32>
    %140 = arith.mulf %130, %139 : vector<8x128xf32>
    %141 = vector.broadcast %123 : vector<1x128xf32> to vector<8x128xf32>
    %142 = arith.mulf %140, %141 : vector<8x128xf32>
    %143 = vector.broadcast %124 : vector<1x128xf32> to vector<8x128xf32>
    %144 = arith.addf %142, %143 : vector<8x128xf32>
    %145 = arith.truncf %144 : vector<8x128xf32> to vector<8x128xbf16>
    %c0_56 = arith.constant 0 : index
    %c0_57 = arith.constant 0 : index
    %146 = vector.load %arg10[%c0_56, %c0_57] : memref<128x512xbf16, #tpu.memory_space<vmem>>, vector<128x512xbf16>
    %cst_58 = arith.constant dense<0.000000e+00> : vector<8x512xf32>
    %147 = tpu.matmul %145, %146, %cst_58 {dimension_numbers = #tpu.dot_dimension_numbers<[1], [0], [0], [1], [0, 0, 1, 1], [], []>} : vector<8x128xbf16>, vector<128x512xbf16>, vector<8x512xf32> -> vector<8x512xf32>
    %c0_59 = arith.constant 0 : index
    %c0_60 = arith.constant 0 : index
    %148 = vector.load %arg11[%c0_59, %c0_60] : memref<1x512xf32, #tpu.memory_space<vmem>>, vector<1x512xf32>
    %149 = vector.broadcast %148 : vector<1x512xf32> to vector<8x512xf32>
    %150 = arith.addf %147, %149 : vector<8x512xf32>
    %cst_61 = arith.constant 5.000000e-01 : f32
    %151 = vector.broadcast %cst_61 : f32 to vector<8x512xf32>
    %152 = arith.mulf %151, %150 : vector<8x512xf32>
    %cst_62 = arith.constant 0.707106769 : f32
    %153 = vector.broadcast %cst_62 : f32 to vector<8x512xf32>
    %154 = arith.mulf %150, %153 : vector<8x512xf32>
    %155 = math.erf %154 : vector<8x512xf32>
    %cst_63 = arith.constant 1.000000e+00 : f32
    %156 = vector.broadcast %cst_63 : f32 to vector<8x512xf32>
    %157 = arith.addf %156, %155 : vector<8x512xf32>
    %158 = arith.mulf %152, %157 : vector<8x512xf32>
    %159 = arith.truncf %158 : vector<8x512xf32> to vector<8x512xbf16>
    %c0_64 = arith.constant 0 : index
    %c0_65 = arith.constant 0 : index
    %160 = vector.load %arg12[%c0_64, %c0_65] : memref<512x128xbf16, #tpu.memory_space<vmem>>, vector<512x128xbf16>
    %cst_66 = arith.constant dense<0.000000e+00> : vector<8x128xf32>
    %161 = tpu.matmul %159, %160, %cst_66 {dimension_numbers = #tpu.dot_dimension_numbers<[1], [0], [0], [1], [0, 0, 1, 1], [], []>} : vector<8x512xbf16>, vector<512x128xbf16>, vector<8x128xf32> -> vector<8x128xf32>
    %c0_67 = arith.constant 0 : index
    %c0_68 = arith.constant 0 : index
    %162 = vector.load %arg13[%c0_67, %c0_68] : memref<1x128xf32, #tpu.memory_space<vmem>>, vector<1x128xf32>
    %163 = vector.broadcast %162 : vector<1x128xf32> to vector<8x128xf32>
    %164 = arith.addf %161, %163 : vector<8x128xf32>
    %165 = arith.addf %122, %164 : vector<8x128xf32>
    %c0_69 = arith.constant 0 : index
    %c0_70 = arith.constant 0 : index
    %c0_71 = arith.constant 0 : index
    %166 = vector.load %arg14[%c0_69, %c0_70, %c0_71] : memref<1x8x128xf32, #tpu.memory_space<vmem>>, vector<1x8x128xf32>
    %167 = vector.shape_cast %166 : vector<1x8x128xf32> to vector<8x128xf32>
    %168 = vector.shape_cast %165 : vector<8x128xf32> to vector<1x8x128xf32>
    tpu.vector_store %arg14[%c0_69, %c0_70, %c0_71], %168 {strides = array<i32>} : memref<1x8x128xf32, #tpu.memory_space<vmem>>, vector<1x8x128xf32>,
    return
  }
  func.func @transform_0(%arg0: i32) -> (i32, i32, i32) {
    %c0_i32 = arith.constant 0 : i32
    %c0_i32_0 = arith.constant 0 : i32
    %c0_i32_1 = arith.constant 0 : i32
    return %arg0, %c0_i32, %c0_i32_0 : i32, i32, i32
  }
  func.func @transform_1(%arg0: i32) -> (i32, i32) {
    %c0_i32 = arith.constant 0 : i32
    %c0_i32_0 = arith.constant 0 : i32
    %c0_i32_1 = arith.constant 0 : i32
    return %c0_i32, %c0_i32_0 : i32, i32
  }
  func.func @transform_2(%arg0: i32) -> (i32, i32) {
    %c0_i32 = arith.constant 0 : i32
    %c0_i32_0 = arith.constant 0 : i32
    %c0_i32_1 = arith.constant 0 : i32
    return %c0_i32, %c0_i32_0 : i32, i32
  }
  func.func @transform_3(%arg0: i32) -> (i32, i32) {
    %c0_i32 = arith.constant 0 : i32
    %c0_i32_0 = arith.constant 0 : i32
    %c0_i32_1 = arith.constant 0 : i32
    return %c0_i32, %c0_i32_0 : i32, i32
  }
  func.func @transform_4(%arg0: i32) -> (i32, i32) {
    %c0_i32 = arith.constant 0 : i32
    %c0_i32_0 = arith.constant 0 : i32
    %c0_i32_1 = arith.constant 0 : i32
    return %c0_i32, %c0_i32_0 : i32, i32
  }
  func.func @transform_5(%arg0: i32) -> (i32, i32) {
    %c0_i32 = arith.constant 0 : i32
    %c0_i32_0 = arith.constant 0 : i32
    %c0_i32_1 = arith.constant 0 : i32
    return %c0_i32, %c0_i32_0 : i32, i32
  }
  func.func @transform_6(%arg0: i32) -> (i32, i32) {
    %c0_i32 = arith.constant 0 : i32
    %c0_i32_0 = arith.constant 0 : i32
    %c0_i32_1 = arith.constant 0 : i32
    return %c0_i32, %c0_i32_0 : i32, i32
  }
  func.func @transform_7(%arg0: i32) -> (i32, i32) {
    %c0_i32 = arith.constant 0 : i32
    %c0_i32_0 = arith.constant 0 : i32
    %c0_i32_1 = arith.constant 0 : i32
    return %c0_i32, %c0_i32_0 : i32, i32
  }
  func.func @transform_8(%arg0: i32) -> (i32, i32) {
    %c0_i32 = arith.constant 0 : i32
    %c0_i32_0 = arith.constant 0 : i32
    %c0_i32_1 = arith.constant 0 : i32
    return %c0_i32, %c0_i32_0 : i32, i32
  }
  func.func @transform_9(%arg0: i32) -> (i32, i32) {
    %c0_i32 = arith.constant 0 : i32
    %c0_i32_0 = arith.constant 0 : i32
    %c0_i32_1 = arith.constant 0 : i32
    return %c0_i32, %c0_i32_0 : i32, i32
  }
  func.func @transform_10(%arg0: i32) -> (i32, i32) {
    %c0_i32 = arith.constant 0 : i32
    %c0_i32_0 = arith.constant 0 : i32
    %c0_i32_1 = arith.constant 0 : i32
    return %c0_i32, %c0_i32_0 : i32, i32
  }
  func.func @transform_11(%arg0: i32) -> (i32, i32) {
    %c0_i32 = arith.constant 0 : i32
    %c0_i32_0 = arith.constant 0 : i32
    %c0_i32_1 = arith.constant 0 : i32
    return %c0_i32, %c0_i32_0 : i32, i32
  }
  func.func @transform_12(%arg0: i32) -> (i32, i32) {
    %c0_i32 = arith.constant 0 : i32
    %c0_i32_0 = arith.constant 0 : i32
    %c0_i32_1 = arith.constant 0 : i32
    return %c0_i32, %c0_i32_0 : i32, i32
  }
  func.func @transform_13(%arg0: i32) -> (i32, i32, i32) {
    %c0_i32 = arith.constant 0 : i32
    %c0_i32_0 = arith.constant 0 : i32
    %c0_i32_1 = arith.constant 0 : i32
    return %arg0, %c0_i32, %c0_i32_0 : i32, i32, i32
  }
}

</mosaic_0001>

<bundles_post_ra>
// kernel: gpt2_forward.5
= control target key start
LH: loop header
LB: loop body
LE: loop exit
PB: predicated region body
PF: predicated region fallthrough
CT: control target
= control target key end

     0   :  { %9 = vsyncpa [#allocation4], 0  ;;  %s896_s0 = inlined_call_operand.vmem [shape: f32[2,8,128], index: 0, kind: input, shape index: {}]   ;;  %s897_s1 = inlined_call_operand.vmem [shape: f32[1,128], index: 1, kind: input, shape index: {}]   ;;  %s898_s2 = inlined_call_operand.vmem [shape: f32[1,128], index: 2, kind: input, shape index: {}]   ;;  %s899_s3 = inlined_call_operand.vmem [shape: bf16[384,128], index: 3, kind: input, shape index: {}]   ;;  %s900_s4 = inlined_call_operand.hbm [shape: f32[2,8,384], index: 4, kind: output, shape index: {}]  }
   0x1   :  { %11 = vsyncpa [#allocation4 + $0x1], 0  ;;  %s730_s15 = smov 0   ;;  %s732_s16 = smov 0  }
   0x2   :  { %s734_s17 = smov 0   ;;  %s736_s18 = smov 0  }
   0x3   :  { %s738_s19 = smov 0   ;;  %s740_s20 = smov 0  }
   0x4   :  { %s742_s21 = smov 0   ;;  %s744_s22 = smov 0  }
   0x5 LB: > { %s471_s23 = sadd.s32 4294967295, %s700_s22   ;;  %s472_s24 = sadd.s32 4294967294, %s700_s22   ;;  %s700_s22 = sphi %s744_s22, %s17_s22   ;;  %s696_s21 = sphi %s742_s21, %s909_s21   ;;  %s692_s20 = sphi %s740_s20, %s908_s20   ;;  %s688_s19 = sphi %s738_s19, %s907_s19   ;;  %s684_s18 = sphi %s736_s18, %s906_s18   ;;  %s680_s17 = sphi %s734_s17, %s905_s17   ;;  %s676_s16 = sphi %s732_s16, %s904_s16   ;;  %s672_s15 = sphi %s730_s15, %s903_s15  }
   0x6   : > { %s26_s25 = sadd.s32 1, %s692_s20  ;;  %s29_s26 = sadd.s32 1, %s696_s21 }
   0x7   : > { %p27_p0 = scmp.ge.s32.totalorder %s26_s25, 3  ;;  %p142_p1 = scmp.ne.s32.totalorder %s680_s17, %s676_s16 }
   0x8   : > { %p143_p2 = scmp.eq.s32.totalorder %s471_s23, 5  ;;  %p148_p5 = scmp.ne.s32.totalorder %s676_s16, %s672_s15 }
   0x9   : > { %s911_s25 = smov (%p27_p0, %s26_s25), 0  ;;  %s913_s26 = smov (!%p27_p0, %s29_s26), %s696_s21 }
   0xa   : > { %s128_s27 = ssub.s32 %s692_s20, %s911_s25  ;;  %p781_p3 = por %p143_p2, %p142_p1 }
   0xb   : > { %p31_p4 = scmp.ge.s32.totalorder %s913_s26, 2  ;;  %p149_p6 = scmp.eq.s32.totalorder %s472_s24, 5 }
   0xc   : > { %p475_p7 = scmp.ge.s32.totalorder %s700_s22, 1  ;;  %p189_p9 = scmp.lt.s32.totalorder %s700_s22, 7 }
   0xd   : > { %s915_s26 = smov (%p31_p4, %s913_s26), 0  ;;  %p790_p8 = por %p149_p6, %p148_p5 }
   0xe   : > { %s127_s30 = ssub.s32 %s696_s21, %s915_s26  ;;  %s132_s5 = sadd.s32 1, %s680_s17 }
   0xf   : > { %s129_s6 = sor.u32 %s128_s27, %s127_s30  ;;  %p190_p10 = pnand %p475_p7, %p189_p9 }
  0x10   : > { %p130_p11 = scmp.eq.s32.totalorder %s129_s6, 0  ;;  %s216_s8 = sand.u32 (!%p190_p10), 1, %s676_s16  }
  0x11   : > { %193 = sbr.rel (%p190_p10) target bundleno = 612 (0x264), region = 36  ;;  %p219_p12 = scmp.lt.s32.totalorder (!%p190_p10), %s688_s19, 1 }
  0x12   : > { %s799_s7 = scalar_select %p130_p11, %s680_s17, %s132_s5  }
  0x13   : > { %s805_s9 = sshll.u32 (!%p190_p10), %s216_s8, 3  ;;  %s478_s10 = sshll.u32 (!%p190_p10), %s684_s18, 4 }
  0x14   : > { %p224_p13 = scmp.lt.s32.totalorder (!%p190_p10), %s478_s10, 47  ;;  %s218_s6 = scalar_lea.vmem (!%p190_p10), [#allocation3], %s805_s9 }
  0x15   : > { %p480_p0 = scmp.ne.s32.totalorder (!%p190_p10), %s684_s18, 0 }
  0x16   : > { %s220_s11 = scalar_select %p219_p12, %s688_s19, 1 }
  0x17   : > { %s917_s10 = smov (!%p224_p13, %s478_s10), 47  ;;  %233 = sbr.rel (%p480_p0) target bundleno = 338 (0x152), region = 40 }
  0x18   : > { %s477_s12 = sshll.u32 %s220_s11, 3  ;;  %s479_s24 = sshll.u32 %s917_s10, 2 }
  0x19   : > { %s222_s23 = scalar_lea.vmem %s896_s0, %s477_s12  ;;  %s815_s5 = scalar_lea.vmem %s899_s3, %s479_s24 }
  0x1c   : > { %v234_v0 = vld [vmem:[%s222_s23] sm:$0xff] }
  0x1d   : > { %237 = vadd.xlane.f32.xlu0 %v234_v0  ;;  %v481_v9 = vld [vmem:[%s897_s1] ss:$0 sm:$0xff] }
  0x1e   : > { %v482_v11 = vld [vmem:[%s898_s2] ss:$0 sm:$0xff] }
  0xa6   : > { %v238_v1 = vpop.xlane.xlu0 %237 }
  0xa7   : > { %v240_v2 = vmul.f32 0.0078125, %v238_v1 }
  0xa9   : > { %v241_v3 = vsub.f32 %v234_v0, %v240_v2 }
  0xab   : > { %v242_v4 = vmul.f32 %v241_v3, %v241_v3 }
  0xad   : > { %243 = vadd.xlane.f32.xlu0 %v242_v4 }
 0x136   : > { %v244_v5 = vpop.xlane.xlu0 %243 }
 0x137   : > { %v245_v6 = vmul.f32 0.0078125, %v244_v5 }
 0x139   : > { %v246_v7 = vadd.f32 1e-05, %v245_v6 }
 0x13b   : > { %598 = vrsqrt.f32 %v246_v7 }
 0x148   : > { %v599_v8 = vpop.eup %598 }
 0x149   : > { %v248_v10 = vmul.f32 %v599_v8, %v241_v3 }
 0x14b   : > { %v255_v12 = vmul.f32 %v481_v9, %v248_v10 }
 0x14d   : > { %v262_v13 = vadd.f32 %v482_v11, %v255_v12 }
 0x14f   : > { %v263_v14 = vpack.c.bf16 %v262_v13, %v262_v13 }
 0x151   : > { %264 = vst [vmem:[#allocation2] sm:$0xf] %v263_v14 }
 0x152 PF: > { %v600_v15 = vld [vmem:[%s815_s5 + $0x38] sm:$0xff]   ;;  %v702_v16 = vmov 0.0   ;;  %vm703_vm0 = vmmov 0   ;;  %v601_v17 = vld [vmem:[%s815_s5 + $0x30] sm:$0xff]   ;;  %v602_v18 = vld [vmem:[%s815_s5 + $0x28] sm:$0xff]   ;;  %s524_s14 = smul.u32 3, %s688_s19 }
 0x153   : > { %504 = vmatprep.subr.bf16.mxu0 %v702_v16  ;;  %520 = vmatprep.mubr.msk.bf16.mxu0 %vm703_vm0, %v702_v16  ;;  %v603_v19 = vld [vmem:[%s815_s5 + $0x20] sm:$0xff]   ;;  %v604_v20 = vld [vmem:[%s815_s5 + $0x18] sm:$0xff]   ;;  %v605_v21 = vld [vmem:[%s815_s5 + $0x10] sm:$0xff]   ;;  %s387_s27 = sshll.u32 %s218_s6, 4  ;;  %s372_s19 = scalar_lea.sflag [#allocation4], %s216_s8  ;;  %s842_s27 = int_to_ptr.vmem [resolvable:$true] %s387_s27 }
 0x154   : > { %505 = vmatpush3.bf16.xpose.msra.mxu0 %v600_v15  ;;  %v606_v22 = vld [vmem:[%s815_s5 + $0x8] sm:$0xff]   ;;  %v607_v23 = vld [vmem:[%s815_s5] sm:$0xff]   ;;  %s383_s23 = sadd.s32 %s684_s18, %s524_s14  ;;  %s608_s18 = scalar_lea.vmem %s842_s27, 128 }
 0x155   : > { %506 = vmatprep.subr.bf16.mxu0 %v702_v16  ;;  %s492_s24 = sshll.u32 %s383_s23, 7  ;;  %p609_p1 = scmp.ne.s32.totalorder %s842_s27, %s608_s18 }
 0x156   : > { %s840_s11 = scalar_lea.hbm %s900_s4, %s492_s24  ;;  %s704_s5 = smov [#allocation3]  }
 0x157   : > { %p610_p2 = pnand %p609_p1, %p781_p3  ;;  %s612_s12 = sshll.u32 %s704_s5, 4  ;;  %s613_s12 = int_to_ptr.vmem [resolvable:$false] %s612_s12 }
 0x158   : > { %v265_v24 = vld [vmem:[#allocation2] sm:$0xf]  ;;  %s614_s13 = scalar_lea.vmem %s613_s12, 256  ;;  %p615_p5 = scmp.lt.s32.totalorder %s842_s27, %s613_s12 }
 0x159   : > { %p611_p4 = pneg %p610_p2  ;;  %p616_p6 = scmp.lt.s32.totalorder %s614_s13, %s608_s18 }
 0x15b   : > { %p617_p7 = por %p616_p6, %p615_p5 }
 0x15c   : > { %507 = vmatpush3.bf16.xpose.msra.mxu0 %v601_v17 }
 0x15d   : > { %508 = vmatprep.subr.bf16.mxu0 %v702_v16  ;;  %p618_p9 = pnand %p617_p7, %p611_p4 }
 0x164   : > { %509 = vmatpush3.bf16.xpose.msra.mxu0 %v602_v18 }
 0x165   : > { %510 = vmatprep.subr.bf16.mxu0 %v702_v16 }
 0x16c   : > { %511 = vmatpush3.bf16.xpose.msra.mxu0 %v603_v19 }
 0x16d   : > { %512 = vmatprep.subr.bf16.mxu0 %v702_v16 }
 0x174   : > { %513 = vmatpush3.bf16.xpose.msra.mxu0 %v604_v20 }
 0x175   : > { %514 = vmatprep.subr.bf16.mxu0 %v702_v16 }
 0x17c   : > { %515 = vmatpush3.bf16.xpose.msra.mxu0 %v605_v21 }
 0x17d   : > { %516 = vmatprep.subr.bf16.mxu0 %v702_v16 }
 0x184   : > { %517 = vmatpush3.bf16.xpose.msra.mxu0 %v606_v22 }
 0x185   : > { %518 = vmatprep.subr.bf16.mxu0 %v702_v16 }
 0x18c   : > { %519 = vmatpush3.bf16.xpose.msra.mxu0 %v607_v23 }
 0x193   : > { %521 = vmatmul.mubr.bf16.vlgmr.msra.gmra.mxu0 %v265_v24 }
 0x253   : > { %v364_v25 = vpop.f32.mrf.mxu0 }
 0x254   : > { %370 = vst [vmem:[%s218_s6] sm:$0xff] %v364_v25 }
 0x255   : > { %v522_v26 = vpop.f32.mrf.mxu0 }
 0x256   : > { %621 = shalt.err (!%p618_p9)
}
 0x257   : > { %s622_s9 = scalar_lea.hbm %s840_s11, 128  ;;  %s626_s14 = scalar_lea.hbm %s900_s4, 768 }
 0x258   : > { %p623_p10 = scmp.ne.s32.totalorder %s840_s11, %s622_s9  ;;  %p627_p13 = scmp.lt.s32.totalorder %s840_s11, %s900_s4 }
 0x259   : > { %p628_p0 = scmp.lt.s32.totalorder %s626_s14, %s622_s9 }
 0x25a   : > { %p624_p11 = pnand %p623_p10, %p781_p3 }
 0x25b   : > { %p629_p1 = por %p628_p0, %p627_p13 }
 0x25c   : > { %p625_p12 = pneg %p624_p11 }
 0x25e   : > { %p630_p2 = pnand %p629_p1, %p625_p12 }
 0x260   : > { %633 = shalt.err (!%p630_p2)
}
 0x261   : > { %525 = dma.vmem_to_hbm [thread:$0]  (%p781_p3), %s842_s27, 128, %s840_s11, %s372_s19   ;;  %v367_v27 = vpop.f32.mrf.mxu0 }
 0x263   : > { %v523_v28 = vpop.f32.mrf.mxu0 }
 0x264 PF: > { %p531_p4 = scmp.ge.s32.totalorder %s700_s22, 2  ;;  %s399_s30 = sand.u32 1, %s672_s15  }
 0x265   : > { %s400_s10 = scalar_lea.sflag [#allocation4], %s399_s30 }
 0x266   : > { %p528_p5 = pnand %p531_p4, %p790_p8 }
 0x268   : > { %p529_p6 = pneg %p528_p5 }
 0x26a   : > { %667 = dma.done.wait (%p529_p6), %s400_s10, 128  }
 0x26b   : > { %669 = vsyncadd (%p529_p6), %s400_s10, 4294967168  ;;  %s17_s22 = sadd.s32 1, %s700_s22   ;;  %s903_s15 = smov %s676_s16 }
 0x26c   : > { %p14_p7 = scmp.ge.s32.totalorder %s17_s22, 8   ;;  %s904_s16 = smov %s680_s17 }
 0x26d   : > { %s905_s17 = smov %s799_s7  ;;  %s906_s18 = smov %s692_s20 }
 0x26e   : > { %s907_s19 = smov %s696_s21  ;;  %s908_s20 = smov %s911_s25 }
 0x26f   : > { %s909_s21 = smov %s915_s26  ;;  %16 = sbr.rel (!%p14_p7) target bundleno = 5 (0x5), region = 78 }
 0x274   :  { %405 = vsyncpa [#allocation4], 1 }
 0x275   :  { %407 = vsyncpa [#allocation4 + $0x1], 1 }

// kernel: gpt2_forward.4
= control target key start
LH: loop header
LB: loop body
LE: loop exit
PB: predicated region body
PF: predicated region fallthrough
CT: control target
= control target key end

     0   :  { %s2587_s25 = smov 0   ;;  %s3057_s0 = inlined_call_operand.vmem [shape: f32[2,8,128], index: 0, kind: input, shape index: {}]   ;;  %s3058_s1 = inlined_call_operand.vmem [shape: f32[1,128], index: 1, kind: input, shape index: {}]   ;;  %s3059_s2 = inlined_call_operand.vmem [shape: f32[1,128], index: 2, kind: input, shape index: {}]   ;;  %s3060_s3 = inlined_call_operand.vmem [shape: bf16[128,384], index: 3, kind: input, shape index: {}]   ;;  %s3061_s4 = inlined_call_operand.vmem [shape: f32[1,384], index: 4, kind: input, shape index: {}]   ;;  %s3062_s5 = inlined_call_operand.vmem [shape: bf16[128,128], index: 5, kind: input, shape index: {}]   ;;  %s3063_s6 = inlined_call_operand.vmem [shape: f32[1,128], index: 6, kind: input, shape index: {}]   ;;  %s3064_s7 = inlined_call_operand.vmem [shape: f32[1,128], index: 7, kind: input, shape index: {}]   ;;  %s3065_s8 = inlined_call_operand.vmem [shape: f32[1,128], index: 8, kind: input, shape index: {}]   ;;  %s3066_s9 = inlined_call_operand.vmem [shape: bf16[128,512], index: 9, kind: input, shape index: {}]   ;;  %s3067_s10 = inlined_call_operand.vmem [shape: f32[1,512], index: 10, kind: input, shape index: {}]   ;;  %s3068_s11 = inlined_call_operand.vmem [shape: bf16[512,128], index: 11, kind: input, shape index: {}]   ;;  %s3069_s12 = inlined_call_operand.vmem [shape: f32[1,128], index: 12, kind: input, shape index: {}]   ;;  %s3070_s13 = inlined_call_operand.vmem [shape: f32[2,8,128], index: 13, kind: output, shape index: {}]  }
   0x1 LB: > { %s2056_s26 = sadd.s32 4294967295, %s2509_s25   ;;  %p2060_p0 = scmp.ge.s32.totalorder %s2509_s25, 1  ;;  %s2509_s25 = sphi %s2587_s25, %s23_s25  }
   0x2   : > { %p386_p1 = scmp.lt.s32.totalorder %s2509_s25, 3 }
   0x4   : > { %p387_p2 = pnand %p2060_p0, %p386_p1 }
   0x5   : > { %p428_p3 = scmp.lt.s32.totalorder (!%p387_p2), %s2056_s26, 1  ;;  %s2514_s29 = smov (!%p387_p2), 96  }
   0x6   : > { %390 = sbr.rel (%p387_p2) target bundleno = 2817 (0xb01), region = 72  ;;  %s2516_s14 = smov (!%p387_p2), 64  }
   0xb   : > { %s3072_s26 = smov (!%p428_p3, %s2056_s26), 1  ;;  %v2355_v1 = vld [vmem:[%s3060_s3 + $0xac] ss:$12 sps:$4 sm:$0xff]   ;;  %v2357_v2 = vld [vmem:[%s3060_s3 + $0xa8] ss:$12 sps:$4 sm:$0xff]   ;;  %v2511_v3 = vmov 0.0   ;;  %v501_v41 = vlaneseq }
   0xc   : > { %s2061_s27 = sshll.u32 %s3072_s26, 3  ;;  %2253 = vmatprep.subr.bf16.mxu1 %v2511_v3  ;;  %v2358_v4 = vld [vmem:[%s3060_s3 + $0xb0] ss:$12 sps:$4 sm:$0xff]   ;;  %v2359_v5 = vld [vmem:[%s3060_s3 + $0x94] ss:$12 sps:$4 sm:$0xff]   ;;  %644 = vmatprep.subr.bf16.mxu0 %v2355_v1  ;;  %v2512_v22 = vmov 0  }
   0xd   : > { %s431_s30 = scalar_lea.vmem %s3057_s0, %s2061_s27  ;;  %v2361_v6 = vld [vmem:[%s3060_s3 + $0x90] ss:$12 sps:$4 sm:$0xff]   ;;  %v2362_v7 = vld [vmem:[%s3060_s3 + $0x98] ss:$12 sps:$4 sm:$0xff]   ;;  %645 = vmatpush1.bf16.msra.mxu0 %v2357_v2  ;;  %2254 = vmatpush3.bf16.msra.mxu1 %v2358_v4  ;;  %v2366_v14 = vld [vmem:[%s3060_s3 + $0x80] ss:$12 sps:$4 sm:$0xff]  }
   0xe   : > { %v2603_v0 = vld [vmem:[%s431_s30] sm:$0xff]  ;;  %646 = vmatprep.subr.bf16.mxu0 %v2359_v5  ;;  %2255 = vmatprep.subr.bf16.mxu1 %v2511_v3  ;;  %v2363_v12 = vld [vmem:[%s3060_s3 + $0x7c] ss:$12 sps:$4 sm:$0xff]   ;;  %v2371_v18 = vld [vmem:[%s3060_s3 + $0x4c] ss:$12 sps:$4 sm:$0xff]   ;;  %vm2513_vm0 = vmmov 0  }
   0xf   : > { %440 = vadd.xlane.f32.xlu0 %v2603_v0  ;;  %v2365_v13 = vld [vmem:[%s3060_s3 + $0x78] ss:$12 sps:$4 sm:$0xff]   ;;  %v2369_v16 = vld [vmem:[%s3060_s3 + $0x60] ss:$12 sps:$4 sm:$0xff]   ;;  %v2370_v17 = vld [vmem:[%s3060_s3 + $0x68] ss:$12 sps:$4 sm:$0xff]   ;;  %676 = vmatprep.mubr.bf16.mxu0 %v2512_v22 }
  0x10   : > { %v2367_v15 = vld [vmem:[%s3060_s3 + $0x64] ss:$12 sps:$4 sm:$0xff]   ;;  %v2373_v19 = vld [vmem:[%s3060_s3 + $0x48] ss:$12 sps:$4 sm:$0xff]   ;;  %2269 = vmatprep.mubr.msk.bf16.mxu1 %vm2513_vm0, %v2511_v3  ;;  %v2382_v27 = vld [vmem:[%s3060_s3 + $0x20] ss:$12 sps:$4 sm:$0xff]  }
  0x11   : > { %647 = vmatpush1.bf16.msra.mxu0 %v2361_v6  ;;  %2256 = vmatpush3.bf16.msra.mxu1 %v2362_v7  ;;  %v2374_v20 = vld [vmem:[%s3060_s3 + $0x50] ss:$12 sps:$4 sm:$0xff]   ;;  %v2375_v21 = vld [vmem:[%s3060_s3 + $0x34] ss:$12 sps:$4 sm:$0xff]   ;;  %v2378_v24 = vld [vmem:[%s3060_s3 + $0x38] ss:$12 sps:$4 sm:$0xff]  }
  0x12   : > { %2257 = vmatprep.subr.bf16.mxu1 %v2511_v3  ;;  %648 = vmatprep.subr.bf16.mxu0 %v2363_v12  ;;  %v2377_v23 = vld [vmem:[%s3060_s3 + $0x30] ss:$12 sps:$4 sm:$0xff]   ;;  %v2381_v26 = vld [vmem:[%s3060_s3 + $0x18] ss:$12 sps:$4 sm:$0xff]   ;;  %v2385_v29 = vld [vmem:[%s3060_s3] ss:$12 sps:$4 sm:$0xff]  }
  0x13   : > { %v2379_v25 = vld [vmem:[%s3060_s3 + $0x1c] ss:$12 sps:$4 sm:$0xff]   ;;  %v2383_v28 = vld [vmem:[%s3060_s3 + $0x4] ss:$12 sps:$4 sm:$0xff]   ;;  %v2063_v35 = vld [vmem:[%s3058_s1] ss:$0 sm:$0xff] }
  0x14   : > { %v2386_v30 = vld [vmem:[%s3060_s3 + $0x8] ss:$12 sps:$4 sm:$0xff]   ;;  %v2064_v37 = vld [vmem:[%s3059_s2] ss:$0 sm:$0xff]  ;;  %v2702_v42 = vshrl.u32 %v501_v41, 7  ;;  %vm733_vm1 = vcmask 261120  }
  0x15   : > { %649 = vmatpush1.bf16.msra.mxu0 %v2365_v13  ;;  %2258 = vmatpush3.bf16.msra.mxu1 %v2366_v14  ;;  %v499_v44 = vld [vmem:[%s3061_s4] sm:$0x7]  ;;  %s2515_s30 = smov 32   ;;  %vm797_vm2 = vcmask 1043456   ;;  %v2728_v4 = vand.u32 127, %v501_v41  ;;  %vm781_vm4 = vcmask 64512  }
  0x16   : > { %2259 = vmatprep.subr.bf16.mxu1 %v2511_v3  ;;  %650 = vmatprep.subr.bf16.mxu0 %v2367_v15  ;;  %v507_v43 = vsub.s32 1, %v2702_v42  ;;  %v511_v45 = vsub.s32 2, %v2702_v42  ;;  %v503_v49 = vsub.s32 0, %v2702_v42  ;;  %vm960_vm5 = vcmask 523520  }
  0x17   : > { %vm732_vm3 = vcmp.le.s32.totalorder %v2728_v4, %v2702_v42  ;;  %vm1077_vm6 = vcmask 785920   ;;  %vm1194_vm7 = vcmask 1048320  }
  0x18   : > { %v508_v46 = vrot.slane %v499_v44, %v507_v43  ;;  %v512_v52 = vrot.slane %v499_v44, %v511_v45  ;;  %v504_v56 = vrot.slane %v499_v44, %v503_v49 }
  0x19   : > { %651 = vmatpush1.bf16.msra.mxu0 %v2369_v16  ;;  %2260 = vmatpush3.bf16.msra.mxu1 %v2370_v17 }
  0x1a   : > { %652 = vmatprep.subr.bf16.mxu0 %v2371_v18  ;;  %2261 = vmatprep.subr.bf16.mxu1 %v2511_v3 }
  0x1d   : > { %653 = vmatpush1.bf16.msra.mxu0 %v2373_v19  ;;  %2262 = vmatpush3.bf16.msra.mxu1 %v2374_v20 }
  0x1e   : > { %654 = vmatprep.subr.bf16.mxu0 %v2375_v21  ;;  %2263 = vmatprep.subr.bf16.mxu1 %v2511_v3 }
  0x21   : > { %655 = vmatpush1.bf16.msra.mxu0 %v2377_v23  ;;  %2264 = vmatpush3.bf16.msra.mxu1 %v2378_v24 }
  0x22   : > { %656 = vmatprep.subr.bf16.mxu0 %v2379_v25  ;;  %2265 = vmatprep.subr.bf16.mxu1 %v2511_v3 }
  0x25   : > { %657 = vmatpush1.bf16.msra.mxu0 %v2381_v26  ;;  %2266 = vmatpush3.bf16.msra.mxu1 %v2382_v27 }
  0x26   : > { %658 = vmatprep.subr.bf16.mxu0 %v2383_v28  ;;  %2267 = vmatprep.subr.bf16.mxu1 %v2511_v3 }
  0x29   : > { %659 = vmatpush1.bf16.msra.mxu0 %v2385_v29  ;;  %2268 = vmatpush3.bf16.msra.mxu1 %v2386_v30 }
  0x2a   : > { %2273 = vmatprep.subr.bf16.mxu1 %v2511_v3  ;;  %2297 = vmatprep.subr.bf16.mxu0 %v2511_v3 }
  0x98   : > { %v441_v8 = vpop.xlane.xlu0 %440 }
  0x99   : > { %v443_v9 = vmul.f32 0.0078125, %v441_v8 }
  0x9b   : > { %v444_v10 = vsub.f32 %v2603_v0, %v443_v9 }
  0x9d   : > { %v445_v11 = vmul.f32 %v444_v10, %v444_v10 }
  0x9f   : > { %446 = vadd.xlane.f32.xlu0 %v445_v11 }
 0x128   : > { %v447_v31 = vpop.xlane.xlu0 %446 }
 0x129   : > { %v448_v32 = vmul.f32 0.0078125, %v447_v31 }
 0x12b   : > { %v449_v33 = vadd.f32 1e-05, %v448_v32 }
 0x12d   : > { %2475 = vrsqrt.f32 %v449_v33 }
 0x13a   : > { %v2476_v34 = vpop.eup %2475 }
 0x13b   : > { %v451_v36 = vmul.f32 %v2476_v34, %v444_v10 }
 0x13d   : > { %v458_v38 = vmul.f32 %v2063_v35, %v451_v36 }
 0x13f   : > { %v465_v39 = vadd.f32 %v2064_v37, %v458_v38 }
 0x141   : > { %v466_v40 = vpack.c.bf16 %v465_v39, %v465_v39 }
 0x143   : > { %677 = vmatmul.mubr.bf16.vlgmr.msra.gmra.mxu0 %v466_v40  ;;  %2270 = vmatmul.mubr.bf16.vlgmr.msra.gmra.mxu1 %v466_v40 }
 0x144   : > { %2275 = vmatprep.mubr.msk.bf16.mxu1 %vm2513_vm0, %v2511_v3  ;;  %2299 = vmatprep.mubr.msk.bf16.mxu0 %vm2513_vm0, %v2511_v3 }
 0x203   : > { %v678_v47 = vpop.f32.mrf.mxu0  ;;  %v719_v48 = vpop.f32.mrf.mxu1 }
 0x204   : > { %v720_v60 = vadd.f32 %v719_v48, %v512_v52  ;;  %v679_v62 = vadd.f32 %v678_v47, %v504_v56 }
 0x205   : > { %v680_v50 = vpop.f32.mrf.mxu0  ;;  %v2271_v51 = vpop.f32.mrf.mxu1 }
 0x206   : > { %v681_v53 = vadd.f32 %v680_v50, %v508_v46  ;;  %v2719_v63 = vpack.c.bf16 %v720_v60, %v720_v60  ;;  %v725_v1 = vpack.c.bf16 %v679_v62, %v679_v62 }
 0x207   : > { %v682_v54 = vpop.f32.mrf.mxu0  ;;  %v722_v55 = vpop.f32.mrf.mxu1 }
 0x208   : > { %v726_v57 = vpack.c.bf16 %v681_v53, %v681_v53  ;;  %v799_v2 = vsel %vm797_vm2, %v2719_v63, 0 }
 0x209   : > { %v683_v58 = vpop.f32.mrf.mxu0  ;;  %v2272_v59 = vpop.f32.mrf.mxu1 }
 0x20a   : > { %846 = vrot.lane.b32.xlu0 %v726_v57, %s2514_s29  ;;  %v738_v61 = vsel %vm733_vm1, %v726_v57, 0 }
 0x20b   : > { %2274 = vmatpush3.bf16.xpose.msra.mxu1 %v738_v61 }
 0x20c   : > { %2279 = vmatprep.subr.bf16.mxu1 %v2511_v3 }
 0x20e   : > { %1081 = vrot.lane.b32.xlu0 %v726_v57, %s2515_s30 }
 0x212   : > { %2276 = vmatmul.mubr.msk.bf16.vlgmr.msra.gmra.mxu1 %vm733_vm1, %v725_v1 }
 0x213   : > { %2280 = vmatpush3.bf16.msra.mxu1 %v799_v2  ;;  %2281 = vmatprep.mubr.msk.bf16.mxu1 %vm2513_vm0, %v2511_v3 }
 0x214   : > { %2285 = vmatprep.subr.bf16.mxu1 %v2511_v3 }
 0x27c   : > { %v847_v18 = vpop.permute.xlu0 %846 }
 0x27d   : > { %v852_v28 = vsel %vm733_vm1, %v847_v18, 0 }
 0x280   : > { %v1082_v23 = vpop.permute.xlu0 %1081 }
 0x281   : > { %v1087_v26 = vsel %vm733_vm1, %v1082_v23, 0 }
 0x2d2   : > { %v774_v5 = vpop.f32.mrf.mxu1 }
 0x2d3   : > { %v780_v6 = vsel %vm732_vm3, %v774_v5, -1e+30 }
 0x2d4   : > { %v2277_v7 = vpop.f32.mrf.mxu1  ;;  %v782_v8 = vsel %vm781_vm4, %v780_v6, -inf }
 0x2d5   : > { %783 = vmax.xlane.f32.xlu1 %v782_v8 }
 0x2d6   : > { %v777_v9 = vpop.f32.mrf.mxu1 }
 0x2d8   : > { %v2278_v10 = vpop.f32.mrf.mxu1 }
 0x35e   : > { %v784_v11 = vpop.xlane.xlu1 %783 }
 0x35f   : > { %v785_v12 = vsub.f32 %v780_v6, %v784_v11 }
 0x361   : > { %v786_v13 = vmul.f32 1.442695, %v785_v12 }
 0x363   : > { %2477 = vpow2.f32 %v786_v13 }
 0x370   : > { %v2478_v14 = vpop.eup %2477 }
 0x371   : > { %v788_v15 = vsel %vm781_vm4, %v2478_v14, 0.0 }
 0x372   : > { %789 = vadd.xlane.f32.xlu1 %v788_v15 }
 0x383   : > { %843 = vrot.lane.b32.xlu1 %v725_v1, %s2514_s29 }
 0x387   : > { %964 = vrot.lane.b32.xlu1 %v726_v57, %s2516_s14 }
 0x38b   : > { %962 = vrot.lane.b32.xlu1 %v725_v1, %s2516_s14 }
 0x38f   : > { %1079 = vrot.lane.b32.xlu1 %v725_v1, %s2515_s30 }
 0x3fb   : > { %v790_v16 = vpop.xlane.xlu1 %789 }
 0x3fc   : > { %2479 = vrcp.f32 %v790_v16 }
 0x3ff   : > { %v844_v17 = vpop.permute.xlu1 %843 }
 0x403   : > { %v965_v19 = vpop.permute.xlu1 %964 }
 0x404   : > { %v970_v20 = vsel %vm733_vm1, %v965_v19, 0 }
 0x405   : > { %2298 = vmatpush3.bf16.xpose.msra.mxu0 %v970_v20 }
 0x406   : > { %2309 = vmatprep.subr.bf16.mxu0 %v2511_v3 }
 0x407   : > { %v963_v25 = vpop.permute.xlu1 %962 }
 0x409   : > { %v2480_v21 = vpop.eup %2479 }
 0x40a   : > { %v792_v24 = vmul.f32 %v2480_v21, %v2478_v14 }
 0x40b   : > { %v1080_v29 = vpop.permute.xlu1 %1079 }
 0x40c   : > { %2300 = vmatmul.mubr.msk.bf16.vlgmr.msra.gmra.mxu0 %vm733_vm1, %v963_v25  ;;  %v793_v27 = vpack.c.bf16 %v792_v24, %v792_v24 }
 0x40d   : > { %2310 = vmatpush3.bf16.xpose.msra.mxu0 %v1087_v26  ;;  %2311 = vmatprep.mubr.msk.bf16.mxu0 %vm2513_vm0, %v2511_v3 }
 0x40e   : > { %2282 = vmatmul.mubr.msk.bf16.vlgmr.msra.gmra.mxu1 %vm781_vm4, %v793_v27  ;;  %2321 = vmatprep.subr.bf16.mxu0 %v2511_v3 }
 0x40f   : > { %2286 = vmatpush3.bf16.xpose.msra.mxu1 %v852_v28  ;;  %2287 = vmatprep.mubr.msk.bf16.mxu1 %vm2513_vm0, %v2511_v3  ;;  %v2387_v28 = vld [vmem:[%s3062_s5 + $0x38] sm:$0xff]  }
 0x410   : > { %2291 = vmatprep.subr.bf16.mxu1 %v2511_v3 }
 0x414   : > { %2312 = vmatmul.mubr.msk.bf16.vlgmr.msra.gmra.mxu0 %vm733_vm1, %v1080_v29  ;;  %v2388_v29 = vld [vmem:[%s3062_s5 + $0x30] sm:$0xff]  }
 0x415   : > { %2337 = vmatprep.mubr.msk.bf16.mxu0 %vm2513_vm0, %v2511_v3  ;;  %2322 = vmatpush3.bf16.msra.mxu0 %v2387_v28  ;;  %v2433_v28 = vld [vmem:[%s3066_s9 + $0x24] ss:$16 sps:$4 sm:$0xff]  }
 0x416   : > { %2288 = vmatmul.mubr.msk.bf16.vlgmr.msra.gmra.mxu1 %vm733_vm1, %v844_v17  ;;  %2323 = vmatprep.subr.bf16.mxu0 %v2511_v3 }
 0x417   : > { %2293 = vmatprep.mubr.msk.bf16.mxu1 %vm2513_vm0, %v2511_v3 }
 0x419   : > { %2324 = vmatpush3.bf16.msra.mxu0 %v2388_v29  ;;  %v2436_v29 = vld [vmem:[%s3066_s9 + $0x2c] ss:$16 sps:$4 sm:$0xff]  }
 0x41a   : > { %2325 = vmatprep.subr.bf16.mxu0 %v2511_v3 }
 0x4cc   : > { %v1006_v30 = vpop.f32.mrf.mxu0 }
 0x4cd   : > { %v1012_v31 = vsel %vm732_vm3, %v1006_v30, -1e+30  ;;  %v2389_v30 = vld [vmem:[%s3062_s5 + $0x28] sm:$0xff]  }
 0x4ce   : > { %v835_v32 = vpop.f32.mrf.mxu1  ;;  %v2301_v33 = vpop.f32.mrf.mxu0  ;;  %v1013_v34 = vsel %vm781_vm4, %v1012_v31, -inf  ;;  %2326 = vmatpush3.bf16.msra.mxu0 %v2389_v30  ;;  %v2431_v30 = vld [vmem:[%s3066_s9 + $0x20] ss:$16 sps:$4 sm:$0xff]  }
 0x4cf   : > { %841 = vst.msk [vmem:[#allocation2] sm:$0xff] %vm733_vm1, %v835_v32  ;;  %1014 = vmax.xlane.f32.xlu1 %v1013_v34  ;;  %2327 = vmatprep.subr.bf16.mxu0 %v2511_v3  ;;  %v2391_v32 = vld [vmem:[%s3062_s5 + $0x18] sm:$0xff]   ;;  %v2392_v33 = vld [vmem:[%s3062_s5 + $0x10] sm:$0xff]  }
 0x4d0   : > { %v2283_v35 = vpop.f32.mrf.mxu1  ;;  %v1009_v36 = vpop.f32.mrf.mxu0 }
 0x4d2   : > { %v838_v37 = vpop.f32.mrf.mxu1  ;;  %v2302_v38 = vpop.f32.mrf.mxu0 }
 0x4d3   : > { %v2393_v37 = vld [vmem:[%s3062_s5 + $0x8] sm:$0xff]  }
 0x4d4   : > { %v2284_v39 = vpop.f32.mrf.mxu1  ;;  %v1123_v40 = vpop.f32.mrf.mxu0 }
 0x4d5   : > { %v1129_v51 = vsel %vm732_vm3, %v1123_v40, -1e+30  ;;  %v2394_v39 = vld [vmem:[%s3062_s5] sm:$0xff]  }
 0x4d6   : > { %v888_v41 = vpop.f32.mrf.mxu1  ;;  %v2313_v44 = vpop.f32.mrf.mxu0  ;;  %v1130_v55 = vsel %vm781_vm4, %v1129_v51, -inf }
 0x4d7   : > { %v894_v46 = vsel %vm732_vm3, %v888_v41, -1e+30 }
 0x4d8   : > { %v2289_v47 = vpop.f32.mrf.mxu1  ;;  %v1126_v48 = vpop.f32.mrf.mxu0  ;;  %v895_v50 = vsel %vm781_vm4, %v894_v46, -inf }
 0x4d9   : > { %896 = vmax.xlane.f32.xlu0 %v895_v50 }
 0x4da   : > { %v891_v52 = vpop.f32.mrf.mxu1  ;;  %v2314_v53 = vpop.f32.mrf.mxu0 }
 0x4dc   : > { %v2290_v54 = vpop.f32.mrf.mxu1 }
 0x4dd   : > { %1131 = vmax.xlane.f32.xlu0 %v1130_v55 }
 0x558   : > { %v1015_v56 = vpop.xlane.xlu1 %1014 }
 0x559   : > { %v1016_v57 = vsub.f32 %v1012_v31, %v1015_v56  ;;  %v2390_v31 = vld [vmem:[%s3062_s5 + $0x20] sm:$0xff]  }
 0x55a   : > { %2328 = vmatpush3.bf16.msra.mxu0 %v2390_v31  ;;  %v2097_v56 = vld [vmem:[%s3063_s6] ss:$0 sm:$0xff]  ;;  %v2434_v31 = vld [vmem:[%s3066_s9 + $0x28] ss:$16 sps:$4 sm:$0xff]  }
 0x55b   : > { %v1017_v58 = vmul.f32 1.442695, %v1016_v57  ;;  %2329 = vmatprep.subr.bf16.mxu0 %v2511_v3 }
 0x55d   : > { %2481 = vpow2.f32 %v1017_v58 }
 0x55e   : > { %2330 = vmatpush3.bf16.msra.mxu0 %v2391_v32  ;;  %v2439_v32 = vld [vmem:[%s3066_s9 + $0x4] ss:$16 sps:$4 sm:$0xff]  }
 0x55f   : > { %2331 = vmatprep.subr.bf16.mxu0 %v2511_v3 }
 0x562   : > { %v897_v59 = vpop.xlane.xlu0 %896  ;;  %2332 = vmatpush3.bf16.msra.mxu0 %v2392_v33  ;;  %v2442_v33 = vld [vmem:[%s3066_s9 + $0xc] ss:$16 sps:$4 sm:$0xff]  }
 0x563   : > { %v898_v60 = vsub.f32 %v894_v46, %v897_v59  ;;  %2333 = vmatprep.subr.bf16.mxu0 %v2511_v3 }
 0x565   : > { %v899_v61 = vmul.f32 1.442695, %v898_v60 }
 0x566   : > { %v1132_v62 = vpop.xlane.xlu0 %1131  ;;  %2334 = vmatpush3.bf16.msra.mxu0 %v2393_v37  ;;  %v2444_v37 = vld [vmem:[%s3068_s11 + $0xf8] sm:$0xff]  }
 0x567   : > { %2483 = vpow2.f32 %v899_v61  ;;  %v1133_v1 = vsub.f32 %v1129_v51, %v1132_v62  ;;  %2335 = vmatprep.subr.bf16.mxu0 %v2511_v3 }
 0x569   : > { %v1134_v2 = vmul.f32 1.442695, %v1133_v1  ;;  %v2395_v1 = vld [vmem:[%s3066_s9 + $0xe0] ss:$16 sps:$4 sm:$0xff]  }
 0x56a   : > { %v2482_v4 = vpop.eup %2481  ;;  %2336 = vmatpush3.bf16.msra.mxu0 %v2394_v39 }
 0x56b   : > { %2485 = vpow2.f32 %v1134_v2  ;;  %v1019_v5 = vsel %vm781_vm4, %v2482_v4, 0.0  ;;  %v2398_v2 = vld [vmem:[%s3066_s9 + $0xe8] ss:$16 sps:$4 sm:$0xff]  }
 0x56c   : > { %1020 = vadd.xlane.f32.xlu0 %v1019_v5  ;;  %v2406_v5 = vld [vmem:[%s3066_s9 + $0xcc] ss:$16 sps:$4 sm:$0xff]  }
 0x574   : > { %v2484_v6 = vpop.eup %2483 }
 0x575   : > { %v901_v7 = vsel %vm781_vm4, %v2484_v6, 0.0 }
 0x576   : > { %902 = vadd.xlane.f32.xlu0 %v901_v7  ;;  %v2404_v7 = vld [vmem:[%s3066_s9 + $0xc8] ss:$16 sps:$4 sm:$0xff]  }
 0x578   : > { %v2486_v8 = vpop.eup %2485 }
 0x579   : > { %v1136_v9 = vsel %vm781_vm4, %v2486_v8, 0.0 }
 0x57a   : > { %1137 = vadd.xlane.f32.xlu1 %v1136_v9 }
 0x58b   : > { %1025 = vrot.lane.b32.xlu1 %v2719_v63, %s2516_s14 }
 0x58c   : > { %908 = vrot.lane.b32.xlu0 %v2719_v63, %s2514_s29 }
 0x58f   : > { %1142 = vrot.lane.b32.xlu1 %v2719_v63, %s2515_s30 }
 0x5f5   : > { %v1021_v10 = vpop.xlane.xlu0 %1020 }
 0x5ff   : > { %v903_v11 = vpop.xlane.xlu0 %902 }
 0x600   : > { %2487 = vrcp.f32 %v903_v11 }
 0x601   : > { %2489 = vrcp.f32 %v1021_v10 }
 0x603   : > { %v909_v12 = vpop.permute.xlu0 %908  ;;  %v1138_v14 = vpop.xlane.xlu1 %1137 }
 0x604   : > { %v914_v13 = vsel %vm797_vm2, %v909_v12, 0  ;;  %2491 = vrcp.f32 %v1138_v14  ;;  %v2409_v12 = vld [vmem:[%s3066_s9 + $0xa4] ss:$16 sps:$4 sm:$0xff]   ;;  %v2407_v14 = vld [vmem:[%s3066_s9 + $0xa0] ss:$16 sps:$4 sm:$0xff]  }
 0x605   : > { %2292 = vmatpush3.bf16.msra.mxu1 %v914_v13  ;;  %v2412_v13 = vld [vmem:[%s3066_s9 + $0xac] ss:$16 sps:$4 sm:$0xff]  }
 0x606   : > { %2303 = vmatprep.subr.bf16.mxu1 %v2511_v3 }
 0x607   : > { %v1026_v17 = vpop.permute.xlu1 %1025 }
 0x608   : > { %v1031_v20 = vsel %vm797_vm2, %v1026_v17, 0  ;;  %v2415_v17 = vld [vmem:[%s3066_s9 + $0x84] ss:$16 sps:$4 sm:$0xff]  }
 0x60b   : > { %v1143_v21 = vpop.permute.xlu1 %1142 }
 0x60c   : > { %v1148_v25 = vsel %vm797_vm2, %v1143_v21, 0  ;;  %v2419_v21 = vld [vmem:[%s3066_s9 + $0x60] ss:$16 sps:$4 sm:$0xff]  }
 0x60d   : > { %v2488_v15 = vpop.eup %2487 }
 0x60e   : > { %v905_v16 = vmul.f32 %v2488_v15, %v2484_v6  ;;  %v2490_v19 = vpop.eup %2489  ;;  %v2401_v6 = vld [vmem:[%s3066_s9 + $0xc0] ss:$16 sps:$4 sm:$0xff]   ;;  %v2410_v15 = vld [vmem:[%s3066_s9 + $0xa8] ss:$16 sps:$4 sm:$0xff]  }
 0x60f   : > { %v1023_v63 = vmul.f32 %v2490_v19, %v2482_v4  ;;  %v2403_v4 = vld [vmem:[%s3066_s9 + $0xc4] ss:$16 sps:$4 sm:$0xff]   ;;  %v2418_v19 = vld [vmem:[%s3066_s9 + $0x8c] ss:$16 sps:$4 sm:$0xff]  }
 0x610   : > { %v906_v18 = vpack.c.bf16 %v905_v16, %v905_v16  ;;  %v2413_v16 = vld [vmem:[%s3066_s9 + $0x80] ss:$16 sps:$4 sm:$0xff]  }
 0x611   : > { %v1024_v23 = vpack.c.bf16 %v1023_v63, %v1023_v63  ;;  %v2492_v24 = vpop.eup %2491  ;;  %v2424_v63 = vld [vmem:[%s3066_s9 + $0x6c] ss:$16 sps:$4 sm:$0xff]  }
 0x612   : > { %2294 = vmatmul.mubr.msk.bf16.vlgmr.msra.gmra.mxu1 %vm781_vm4, %v906_v18  ;;  %v1140_v26 = vmul.f32 %v2492_v24, %v2486_v8  ;;  %v2416_v18 = vld [vmem:[%s3066_s9 + $0x88] ss:$16 sps:$4 sm:$0xff]   ;;  %v2427_v24 = vld [vmem:[%s3066_s9 + $0x44] ss:$16 sps:$4 sm:$0xff]  }
 0x613   : > { %2304 = vmatpush3.bf16.msra.mxu1 %v1031_v20  ;;  %2305 = vmatprep.mubr.msk.bf16.mxu1 %vm2513_vm0, %v2511_v3  ;;  %v2421_v20 = vld [vmem:[%s3066_s9 + $0x64] ss:$16 sps:$4 sm:$0xff]  }
 0x614   : > { %2315 = vmatprep.subr.bf16.mxu1 %v2511_v3  ;;  %v1141_v27 = vpack.c.bf16 %v1140_v26, %v1140_v26  ;;  %v2425_v26 = vld [vmem:[%s3066_s9 + $0x40] ss:$16 sps:$4 sm:$0xff]  }
 0x61a   : > { %2306 = vmatmul.mubr.msk.bf16.vlgmr.msra.gmra.mxu1 %vm781_vm4, %v1024_v23  ;;  %v2422_v23 = vld [vmem:[%s3066_s9 + $0x68] ss:$16 sps:$4 sm:$0xff]  }
 0x61b   : > { %2316 = vmatpush3.bf16.msra.mxu1 %v1148_v25  ;;  %2317 = vmatprep.mubr.msk.bf16.mxu1 %vm2513_vm0, %v2511_v3  ;;  %v2430_v25 = vld [vmem:[%s3066_s9 + $0x4c] ss:$16 sps:$4 sm:$0xff]  }
 0x622   : > { %2318 = vmatmul.mubr.msk.bf16.vlgmr.msra.gmra.mxu1 %vm781_vm4, %v1141_v27  ;;  %v2428_v27 = vld [vmem:[%s3066_s9 + $0x48] ss:$16 sps:$4 sm:$0xff]  }
 0x623   : > { %1584 = vmatprep.mubr.bf16.mxu1 %v2512_v22 }
 0x6d2   : > { %v950_v34 = vpop.f32.mrf.mxu1 }
 0x6d3   : > { %957 = vrot.lane.b32.xlu1 %v950_v34, %s2515_s30  ;;  %v2437_v34 = vld [vmem:[%s3066_s9] ss:$16 sps:$4 sm:$0xff]   ;;  %s435_s30 = scalar_lea.vmem %s3070_s13, %s2061_s27 }
 0x6d4   : > { %v2295_v35 = vpop.f32.mrf.mxu1 }
 0x6d5   : > { %v2440_v35 = vld [vmem:[%s3066_s9 + $0x8] ss:$16 sps:$4 sm:$0xff]  }
 0x6d6   : > { %v953_v36 = vpop.f32.mrf.mxu1 }
 0x6d7   : > { %v2443_v36 = vld [vmem:[%s3068_s11 + $0x78] sm:$0xff]  }
 0x6d8   : > { %v2296_v38 = vpop.f32.mrf.mxu1 }
 0x6da   : > { %v1067_v40 = vpop.f32.mrf.mxu1 }
 0x6db   : > { %1074 = vrot.lane.b32.xlu0 %v1067_v40, %s2516_s14 }
 0x6dc   : > { %v2307_v41 = vpop.f32.mrf.mxu1 }
 0x6de   : > { %v1070_v44 = vpop.f32.mrf.mxu1 }
 0x6df   : > { %v2106_v44 = vld [vmem:[%s3064_s7] ss:$0 sm:$0xff] }
 0x6e0   : > { %v2308_v46 = vpop.f32.mrf.mxu1 }
 0x6e2   : > { %v1184_v47 = vpop.f32.mrf.mxu1 }
 0x6e3   : > { %1191 = vrot.lane.b32.xlu1 %v1184_v47, %s2514_s29  ;;  %v2107_v47 = vld [vmem:[%s3065_s8] ss:$0 sm:$0xff] }
 0x6e4   : > { %v2319_v48 = vpop.f32.mrf.mxu1 }
 0x6e6   : > { %v1187_v50 = vpop.f32.mrf.mxu1 }
 0x6e8   : > { %v2320_v51 = vpop.f32.mrf.mxu1 }
 0x6e9   : > { %v2445_v51 = vld [vmem:[%s3068_s11 + $0x38] sm:$0xff]  }
 0x745   : > { %v958_v52 = vpop.permute.xlu1 %957 }
 0x746   : > { %961 = vst.msk [vmem:[#allocation2] sm:$0xff] %vm960_vm5, %v958_v52  ;;  %v2446_v52 = vld [vmem:[%s3068_s11 + $0xb8] sm:$0xff]  }
 0x74d   : > { %v1075_v53 = vpop.permute.xlu0 %1074 }
 0x74e   : > { %1078 = vst.msk [vmem:[#allocation2] sm:$0xff] %vm1077_vm6, %v1075_v53 }
 0x755   : > { %v1192_v3 = vpop.permute.xlu1 %1191 }
 0x756   : > { %1195 = vst.msk [vmem:[#allocation2] sm:$0xff] %vm1194_vm7, %v1192_v3  ;;  %v2447_v3 = vld [vmem:[%s3068_s11 + $0x70] sm:$0xff]  }
 0x75d   : > { %v1196_v54 = vld [vmem:[#allocation2] sm:$0xff] }
 0x75e   : > { %v1197_v55 = vpack.c.bf16 %v1196_v54, %v1196_v54  ;;  %v2448_v54 = vld [vmem:[%s3068_s11 + $0xf0] sm:$0xff]  }
 0x760   : > { %2338 = vmatmul.mubr.bf16.vlgmr.msra.gmra.mxu0 %v1197_v55  ;;  %v2449_v55 = vld [vmem:[%s3068_s11 + $0x30] sm:$0xff]  }
 0x761   : > { %1625 = vmatprep.mubr.bf16.mxu0 %v2512_v22  ;;  %v2397_v22 = vld [vmem:[%s3066_s9 + $0xe4] ss:$16 sps:$4 sm:$0xff]  }
 0x762   : > { %1552 = vmatprep.subr.bf16.mxu1 %v2397_v22  ;;  %v2457_v22 = vld [vmem:[%s3068_s11 + $0x20] sm:$0xff]  }
 0x763   : > { %1553 = vmatpush1.bf16.msra.mxu1 %v2395_v1  ;;  %v2456_v1 = vld [vmem:[%s3068_s11 + $0xe0] sm:$0xff]  }
 0x764   : > { %1554 = vmatprep.subr.bf16.mxu1 %v2403_v4  ;;  %v2460_v4 = vld [vmem:[%s3068_s11 + $0xd8] sm:$0xff]  }
 0x767   : > { %1555 = vmatpush1.bf16.msra.mxu1 %v2401_v6  ;;  %v2462_v6 = vld [vmem:[%s3068_s11 + $0x98] sm:$0xff]  }
 0x768   : > { %1556 = vmatprep.subr.bf16.mxu1 %v2409_v12  ;;  %v2468_v12 = vld [vmem:[%s3068_s11 + $0xc8] sm:$0xff]  }
 0x76b   : > { %1557 = vmatpush1.bf16.msra.mxu1 %v2407_v14  ;;  %v2470_v14 = vld [vmem:[%s3068_s11 + $0x88] sm:$0xff]  }
 0x76c   : > { %1558 = vmatprep.subr.bf16.mxu1 %v2415_v17  ;;  %v2473_v17 = vld [vmem:[%s3068_s11] sm:$0xff]  }
 0x76f   : > { %1559 = vmatpush1.bf16.msra.mxu1 %v2413_v16  ;;  %v2472_v16 = vld [vmem:[%s3068_s11 + $0xc0] sm:$0xff]  }
 0x770   : > { %1560 = vmatprep.subr.bf16.mxu1 %v2421_v20  ;;  %v1386_v20 = vsub.s32 3, %v2702_v42 }
 0x773   : > { %1561 = vmatpush1.bf16.msra.mxu1 %v2419_v21 }
 0x774   : > { %1562 = vmatprep.subr.bf16.mxu1 %v2427_v24 }
 0x777   : > { %1563 = vmatpush1.bf16.msra.mxu1 %v2425_v26 }
 0x778   : > { %1564 = vmatprep.subr.bf16.mxu1 %v2433_v28 }
 0x77b   : > { %1565 = vmatpush1.bf16.msra.mxu1 %v2431_v30 }
 0x77c   : > { %1566 = vmatprep.subr.bf16.mxu1 %v2439_v32 }
 0x77f   : > { %1567 = vmatpush1.bf16.msra.mxu1 %v2437_v34 }
 0x780   : > { %2209 = vmatprep.subr.bf16.mxu1 %v2443_v36 }
 0x820   : > { %v1303_v57 = vpop.f32.mrf.mxu0 }
 0x821   : > { %v1304_v58 = vadd.f32 %v2097_v56, %v1303_v57  ;;  %v2450_v56 = vld [vmem:[%s3068_s11 + $0xb0] sm:$0xff]   ;;  %v2451_v57 = vld [vmem:[%s3068_s11 + $0x68] sm:$0xff]  }
 0x822   : > { %v2339_v59 = vpop.f32.mrf.mxu0 }
 0x823   : > { %v2833_v60 = vadd.f32 %v1304_v58, %v2603_v0  ;;  %v2400_v0 = vld [vmem:[%s3066_s9 + $0xec] ss:$16 sps:$4 sm:$0xff]  }
 0x824   : > { %v1306_v61 = vpop.f32.mrf.mxu0  ;;  %1593 = vmatprep.subr.bf16.mxu0 %v2400_v0  ;;  %v2452_v58 = vld [vmem:[%s3068_s11 + $0xe8] sm:$0xff]   ;;  %v2459_v0 = vld [vmem:[%s3068_s11 + $0x58] sm:$0xff]  }
 0x825   : > { %1312 = vadd.xlane.f32.xlu0 %v2833_v60  ;;  %1594 = vmatpush1.bf16.msra.mxu0 %v2398_v2  ;;  %v2453_v59 = vld [vmem:[%s3068_s11 + $0x28] sm:$0xff]   ;;  %v2458_v2 = vld [vmem:[%s3068_s11 + $0xa0] sm:$0xff]  }
 0x826   : > { %v2340_v62 = vpop.f32.mrf.mxu0  ;;  %1595 = vmatprep.subr.bf16.mxu0 %v2406_v5  ;;  %v2454_v61 = vld [vmem:[%s3068_s11 + $0xa8] sm:$0xff]   ;;  %v2461_v5 = vld [vmem:[%s3068_s11 + $0x18] sm:$0xff]  }
 0x827   : > { %v2455_v62 = vld [vmem:[%s3068_s11 + $0x60] sm:$0xff]  }
 0x829   : > { %1596 = vmatpush1.bf16.msra.mxu0 %v2404_v7  ;;  %v2463_v7 = vld [vmem:[%s3068_s11 + $0x50] sm:$0xff]  }
 0x82a   : > { %1597 = vmatprep.subr.bf16.mxu0 %v2412_v13  ;;  %v2469_v13 = vld [vmem:[%s3068_s11 + $0x8] sm:$0xff]  }
 0x82d   : > { %1598 = vmatpush1.bf16.msra.mxu0 %v2410_v15  ;;  %v2471_v15 = vld [vmem:[%s3068_s11 + $0x40] sm:$0xff]  }
 0x82e   : > { %1599 = vmatprep.subr.bf16.mxu0 %v2418_v19  ;;  %v1370_v19 = vld [vmem:[%s3067_s10] sm:$0xf] }
 0x82f   : > { %v1383_v21 = vrot.slane %v1370_v19, %v511_v45  ;;  %v1387_v26 = vrot.slane %v1370_v19, %v1386_v20 }
 0x831   : > { %1600 = vmatpush1.bf16.msra.mxu0 %v2416_v18  ;;  %v2474_v18 = vld [vmem:[%s3068_s11 + $0x80] sm:$0xff]  }
 0x832   : > { %1601 = vmatprep.subr.bf16.mxu0 %v2424_v63  ;;  %v1375_v63 = vrot.slane %v1370_v19, %v503_v49 }
 0x835   : > { %1602 = vmatpush1.bf16.msra.mxu0 %v2422_v23 }
 0x836   : > { %1603 = vmatprep.subr.bf16.mxu0 %v2430_v25  ;;  %v1379_v25 = vrot.slane %v1370_v19, %v507_v43 }
 0x839   : > { %1604 = vmatpush1.bf16.msra.mxu0 %v2428_v27 }
 0x83a   : > { %1605 = vmatprep.subr.bf16.mxu0 %v2436_v29 }
 0x83d   : > { %1606 = vmatpush1.bf16.msra.mxu0 %v2434_v31 }
 0x83e   : > { %1607 = vmatprep.subr.bf16.mxu0 %v2442_v33 }
 0x841   : > { %1608 = vmatpush1.bf16.msra.mxu0 %v2440_v35 }
 0x842   : > { %2231 = vmatprep.subr.bf16.mxu0 %v2444_v37 }
 0x8ae   : > { %v1313_v8 = vpop.xlane.xlu0 %1312 }
 0x8af   : > { %v1314_v9 = vmul.f32 0.0078125, %v1313_v8  ;;  %v2464_v8 = vld [vmem:[%s3068_s11 + $0xd0] sm:$0xff]  }
 0x8b1   : > { %v1315_v10 = vsub.f32 %v2833_v60, %v1314_v9  ;;  %v2465_v9 = vld [vmem:[%s3068_s11 + $0x10] sm:$0xff]  }
 0x8b3   : > { %v1316_v11 = vmul.f32 %v1315_v10, %v1315_v10 }
 0x8b5   : > { %1317 = vadd.xlane.f32.xlu1 %v1316_v11  ;;  %v2467_v11 = vld [vmem:[%s3068_s11 + $0x48] sm:$0xff]  }
 0x93e   : > { %v1318_v38 = vpop.xlane.xlu1 %1317 }
 0x93f   : > { %v1319_v39 = vmul.f32 0.0078125, %v1318_v38 }
 0x941   : > { %v1320_v40 = vadd.f32 1e-05, %v1319_v39 }
 0x943   : > { %2493 = vrsqrt.f32 %v1320_v40 }
 0x950   : > { %v2494_v41 = vpop.eup %2493 }
 0x951   : > { %v1322_v46 = vmul.f32 %v2494_v41, %v1315_v10  ;;  %v2466_v10 = vld [vmem:[%s3068_s11 + $0x90] sm:$0xff]  }
 0x953   : > { %v1329_v48 = vmul.f32 %v2106_v44, %v1322_v46 }
 0x955   : > { %v1336_v50 = vadd.f32 %v2107_v47, %v1329_v48 }
 0x957   : > { %v1337_v53 = vpack.c.bf16 %v1336_v50, %v1336_v50 }
 0x959   : > { %1585 = vmatmul.mubr.bf16.vlgmr.msra.gmra.mxu1 %v1337_v53  ;;  %1626 = vmatmul.mubr.bf16.vlgmr.msra.gmra.mxu0 %v1337_v53 }
 0x95a   : > { %2210 = vmatpush3.bf16.msra.mxu1 %v2445_v51  ;;  %2232 = vmatpush3.bf16.msra.mxu0 %v2446_v52 }
 0x95b   : > { %2211 = vmatprep.subr.bf16.mxu1 %v2447_v3  ;;  %2233 = vmatprep.subr.bf16.mxu0 %v2448_v54 }
 0x95e   : > { %2212 = vmatpush3.bf16.msra.mxu1 %v2449_v55  ;;  %2234 = vmatpush3.bf16.msra.mxu0 %v2450_v56 }
 0x95f   : > { %2213 = vmatprep.subr.bf16.mxu1 %v2451_v57  ;;  %2235 = vmatprep.subr.bf16.mxu0 %v2452_v58 }
 0x962   : > { %2214 = vmatpush3.bf16.msra.mxu1 %v2453_v59  ;;  %2236 = vmatpush3.bf16.msra.mxu0 %v2454_v61 }
 0x963   : > { %2215 = vmatprep.subr.bf16.mxu1 %v2455_v62  ;;  %2237 = vmatprep.subr.bf16.mxu0 %v2456_v1  ;;  %v2140_v1 = vld [vmem:[%s3069_s12] ss:$0 sm:$0xff] }
 0x966   : > { %2216 = vmatpush3.bf16.msra.mxu1 %v2457_v22  ;;  %2238 = vmatpush3.bf16.msra.mxu0 %v2458_v2 }
 0x967   : > { %2217 = vmatprep.subr.bf16.mxu1 %v2459_v0  ;;  %2239 = vmatprep.subr.bf16.mxu0 %v2460_v4 }
 0x96a   : > { %2218 = vmatpush3.bf16.msra.mxu1 %v2461_v5  ;;  %2240 = vmatpush3.bf16.msra.mxu0 %v2462_v6 }
 0x96b   : > { %2219 = vmatprep.subr.bf16.mxu1 %v2463_v7  ;;  %2241 = vmatprep.subr.bf16.mxu0 %v2464_v8 }
 0x96e   : > { %2220 = vmatpush3.bf16.msra.mxu1 %v2465_v9  ;;  %2242 = vmatpush3.bf16.msra.mxu0 %v2466_v10 }
 0x96f   : > { %2221 = vmatprep.subr.bf16.mxu1 %v2467_v11  ;;  %2243 = vmatprep.subr.bf16.mxu0 %v2468_v12 }
 0x972   : > { %2222 = vmatpush3.bf16.msra.mxu1 %v2469_v13  ;;  %2244 = vmatpush3.bf16.msra.mxu0 %v2470_v14 }
 0x973   : > { %2223 = vmatprep.subr.bf16.mxu1 %v2471_v15  ;;  %2245 = vmatprep.subr.bf16.mxu0 %v2472_v16 }
 0x976   : > { %2224 = vmatpush3.bf16.msra.mxu1 %v2473_v17  ;;  %2246 = vmatpush3.bf16.msra.mxu0 %v2474_v18 }
 0xa19   : > { %v1586_v23 = vpop.f32.mrf.mxu1  ;;  %v1627_v24 = vpop.f32.mrf.mxu0 }
 0xa1a   : > { %v1587_v27 = vadd.f32 %v1586_v23, %v1375_v63  ;;  %v1628_v28 = vadd.f32 %v1627_v24, %v1383_v21 }
 0xa1b   : > { %v1588_v29 = vpop.f32.mrf.mxu1  ;;  %v1629_v30 = vpop.f32.mrf.mxu0 }
 0xa1c   : > { %v1638_v31 = vmul.f32 0.70710677, %v1587_v27  ;;  %v1640_v32 = vmul.f32 0.70710677, %v1628_v28  ;;  %v1589_v33 = vadd.f32 %v1588_v29, %v1379_v25  ;;  %v1630_v34 = vadd.f32 %v1629_v30, %v1387_v26 }
 0xa1d   : > { %v1590_v35 = vpop.f32.mrf.mxu1  ;;  %v1631_v36 = vpop.f32.mrf.mxu0  ;;  %v1634_v44 = vmul.f32 0.5, %v1587_v27  ;;  %v1636_v47 = vmul.f32 0.5, %v1628_v28 }
 0xa1e   : > { %2495 = verf.f32 %v1638_v31  ;;  %v1639_v49 = vmul.f32 0.70710677, %v1589_v33  ;;  %v1641_v38 = vmul.f32 0.70710677, %v1630_v34  ;;  %v1635_v48 = vmul.f32 0.5, %v1589_v33 }
 0xa1f   : > { %2497 = verf.f32 %v1640_v32  ;;  %v1591_v45 = vpop.f32.mrf.mxu1  ;;  %v1632_v37 = vpop.f32.mrf.mxu0  ;;  %v1637_v52 = vmul.f32 0.5, %v1630_v34 }
 0xa20   : > { %2499 = verf.f32 %v1639_v49 }
 0xa21   : > { %2501 = verf.f32 %v1641_v38 }
 0xa2b   : > { %v2496_v42 = vpop.eup %2495 }
 0xa2c   : > { %v2498_v43 = vpop.eup %2497  ;;  %v1646_v39 = vadd.f32 1.0, %v2496_v42 }
 0xa2d   : > { %v1648_v40 = vadd.f32 1.0, %v2498_v43  ;;  %v2500_v41 = vpop.eup %2499 }
 0xa2e   : > { %v2502_v46 = vpop.eup %2501  ;;  %v1647_v50 = vadd.f32 1.0, %v2500_v41  ;;  %v1650_v51 = vmul.f32 %v1646_v39, %v1634_v44 }
 0xa2f   : > { %v1649_v53 = vadd.f32 1.0, %v2502_v46  ;;  %v1652_v3 = vmul.f32 %v1648_v40, %v1636_v47 }
 0xa30   : > { %v1651_v54 = vmul.f32 %v1647_v50, %v1635_v48  ;;  %v1654_v57 = vpack.c.bf16 %v1650_v51, %v1650_v51 }
 0xa31   : > { %v1653_v55 = vmul.f32 %v1649_v53, %v1637_v52  ;;  %v1656_v59 = vpack.c.bf16 %v1652_v3, %v1652_v3 }
 0xa32   : > { %v1655_v56 = vpack.c.bf16 %v1651_v54, %v1651_v54 }
 0xa33   : > { %v1657_v58 = vpack.c.bf16 %v1653_v55, %v1653_v55 }
 0xa34   : > { %1953 = vmatprep.mubr.bf16.mxu1 %v1655_v56 }
 0xa35   : > { %1993 = vmatprep.mubr.bf16.mxu0 %v1657_v58  ;;  %1954 = vmatmul.mubr.bf16.vlgmr.msra.gmra.mxu1 %v1654_v57 }
 0xa36   : > { %1994 = vmatmul.mubr.bf16.vlgmr.msra.gmra.mxu0 %v1656_v59 }
 0xaf5   : > { %v2225_v61 = vpop.f32.mrf.mxu1 }
 0xaf6   : > { %v2247_v62 = vpop.f32.mrf.mxu0 }
 0xaf7   : > { %v2226_v22 = vpop.f32.mrf.mxu1 }
 0xaf8   : > { %v2227_v2 = vadd.f32 %v2226_v22, %v2225_v61  ;;  %v2248_v0 = vpop.f32.mrf.mxu0 }
 0xaf9   : > { %v2228_v4 = vpop.f32.mrf.mxu1  ;;  %v2249_v6 = vadd.f32 %v2248_v0, %v2247_v62 }
 0xafa   : > { %v1956_v5 = vadd.f32 %v2227_v2, %v2140_v1  ;;  %v2250_v7 = vpop.f32.mrf.mxu0 }
 0xafb   : > { %v2229_v8 = vpop.f32.mrf.mxu1 }
 0xafc   : > { %v1996_v9 = vadd.f32 %v2249_v6, %v1956_v5  ;;  %v2251_v10 = vpop.f32.mrf.mxu0 }
 0xafe   : > { %v2001_v11 = vadd.f32 %v1996_v9, %v2833_v60 }
 0xb00   : > { %2002 = vst [vmem:[%s435_s30] sm:$0xff] %v2001_v11 }
 0xb01 PF: > { %s23_s25 = sadd.s32 1, %s2509_s25  }
 0xb02   : > { %p20_p4 = scmp.ge.s32.totalorder %s23_s25, 4  }
 0xb04   :  { %22 = sbr.rel (!%p20_p4) target bundleno = 1 (0x1), region = 102 }

// kernel: gpt2_forward.3
= control target key start
LH: loop header
LB: loop body
LE: loop exit
PB: predicated region body
PF: predicated region fallthrough
CT: control target
= control target key end

     0   :  { %18 = vsyncpa [#allocation4], 0  ;;  %s3069_s0 = inlined_call_operand.vmem [shape: f32[2,8,128], index: 0, kind: input, shape index: {}]   ;;  %s3070_s1 = inlined_call_operand.vmem [shape: f32[1,128], index: 1, kind: input, shape index: {}]   ;;  %s3071_s2 = inlined_call_operand.vmem [shape: f32[1,128], index: 2, kind: input, shape index: {}]   ;;  %s3072_s3 = inlined_call_operand.hbm [shape: bf16[128,384], index: 3, kind: input, shape index: {}]   ;;  %s3073_s4 = inlined_call_operand.vmem [shape: f32[1,384], index: 4, kind: input, shape index: {}]   ;;  %s3074_s5 = inlined_call_operand.vmem [shape: bf16[128,128], index: 5, kind: input, shape index: {}]   ;;  %s3075_s6 = inlined_call_operand.vmem [shape: f32[1,128], index: 6, kind: input, shape index: {}]   ;;  %s3076_s7 = inlined_call_operand.vmem [shape: f32[1,128], index: 7, kind: input, shape index: {}]   ;;  %s3077_s8 = inlined_call_operand.vmem [shape: f32[1,128], index: 8, kind: input, shape index: {}]   ;;  %s3078_s9 = inlined_call_operand.hbm [shape: bf16[128,512], index: 9, kind: input, shape index: {}]   ;;  %s3079_s10 = inlined_call_operand.vmem [shape: f32[1,512], index: 10, kind: input, shape index: {}]   ;;  %s3080_s11 = inlined_call_operand.hbm [shape: bf16[512,128], index: 11, kind: input, shape index: {}]   ;;  %s3081_s12 = inlined_call_operand.vmem [shape: f32[1,128], index: 12, kind: input, shape index: {}]   ;;  %s3082_s13 = inlined_call_operand.vmem [shape: f32[2,8,128], index: 13, kind: output, shape index: {}]  }
   0x1   :  { %19 = vsyncpa [#allocation6], 0  ;;  %s2800_s25 = smov 0  }
   0x2 LB: > { %s2715_s26 = smov [#allocation5]   ;;  %s2806_s28 = sadd.s32 4294967295, %s2713_s25   ;;  %s2713_s25 = sphi %s2800_s25, %s25_s25  }
   0x3   : > { %s380_s27 = sshll.u32 %s2715_s26, 4  ;;  %p2133_p0 = scmp.ge.s32.totalorder %s2713_s25, 1  ;;  %s381_s27 = int_to_ptr.vmem [resolvable:$true] %s380_s27 }
   0x4   : > { %p334_p1 = scmp.lt.s32.totalorder %s2713_s25, 3  ;;  %p2444_p2 = scmp.eq.s32.totalorder %s2806_s28, 0 }
   0x5   : > { %s2716_s30 = smov [#allocation3]   ;;  %s2717_s16 = smov [#allocation7]  }
   0x6   : > { %p2811_p3 = pnand %p2133_p0, %p334_p1  ;;  %s352_s14 = sshll.u32 %s2716_s30, 4  ;;  %s2817_s14 = int_to_ptr.vmem [resolvable:$true] %s352_s14 }
   0x7   : > { %s2825_s17 = sshll.u32 %s2717_s16, 4  ;;  %s2632_s18 = scalar_lea.vmem %s381_s27, 4096  ;;  %s397_s17 = int_to_ptr.vmem [resolvable:$true] %s2825_s17 }
   0x8   : > { %p2434_p4 = pneg %p2811_p3  ;;  %p2633_p7 = scmp.ne.s32.totalorder %s381_s27, %s2632_s18 }
   0x9   : > { %p2640_p10 = scmp.lt.s32.totalorder %s381_s27, %s381_s27  ;;  %p2641_p11 = scmp.lt.s32.totalorder %s2632_s18, %s2632_s18 }
   0xa   : > { %p2821_p5 = pnand %p2444_p2, %p2434_p4 }
   0xb   : > { %p2642_p12 = por %p2641_p11, %p2640_p10 }
   0xc   : > { %p2623_p6 = pneg %p2821_p5 }
   0xe   : > { %p2635_p8 = pnand %p2633_p7, %p2623_p6 }
  0x10   : > { %p2636_p9 = pneg %p2635_p8 }
  0x12   : > { %p2643_p13 = pnand %p2642_p12, %p2636_p9 }
  0x14   : > { %2646 = shalt.err (!%p2643_p13)
}
  0x15   : > { %s2718_s19 = smov 256   ;;  %s2719_s20 = smov 16  }
  0x16   : > { %2440 = dma.hbm_to_vmem [thread:$0]  (!%p2821_p5), %s3078_s9, 4096, %s381_s27, [#allocation6], %s2718_s19, %s2718_s19, %s2719_s20  }
  0x17   : > { %s2658_s23 = scalar_lea.vmem %s2817_s14, 3072  ;;  %p2666_p7 = scmp.lt.s32.totalorder %s2817_s14, %s2817_s14 }
  0x18   : > { %p2659_p0 = scmp.ne.s32.totalorder %s2817_s14, %s2658_s23  ;;  %p2667_p8 = scmp.lt.s32.totalorder %s2658_s23, %s2658_s23 }
  0x1a   : > { %p2661_p1 = pnand %p2659_p0, %p2623_p6  ;;  %p2668_p9 = por %p2667_p8, %p2666_p7 }
  0x1c   : > { %p2662_p4 = pneg %p2661_p1 }
  0x1e   : > { %p2669_p10 = pnand %p2668_p9, %p2662_p4 }
  0x20   : > { %2672 = shalt.err (!%p2669_p10)
}
  0x21   : > { %s2720_s24 = smov 192   ;;  %s2721_s26 = smov 12  }
  0x22   : > { %2437 = dma.hbm_to_vmem [thread:$0]  (!%p2821_p5), %s3072_s3, 3072, %s2817_s14, [#allocation4], %s2720_s24, %s2720_s24, %s2721_s26  }
  0x23   : > { %s2684_s16 = scalar_lea.vmem %s397_s17, 4096  ;;  %p2692_p0 = scmp.lt.s32.totalorder %s397_s17, %s397_s17 }
  0x24   : > { %p2685_p11 = scmp.ne.s32.totalorder %s397_s17, %s2684_s16  ;;  %p2693_p1 = scmp.lt.s32.totalorder %s2684_s16, %s2684_s16 }
  0x26   : > { %p2687_p12 = pnand %p2685_p11, %p2623_p6  ;;  %p2694_p4 = por %p2693_p1, %p2692_p0 }
  0x28   : > { %p2688_p13 = pneg %p2687_p12 }
  0x2a   : > { %p2695_p7 = pnand %p2694_p4, %p2688_p13 }
  0x2c   : > { %2698 = shalt.err (!%p2695_p7)
}
  0x2d   : > { %s2722_s18 = smov 64   ;;  %s2723_s19 = smov 4  }
  0x2e   : > { %2443 = dma.hbm_to_vmem [thread:$0]  (!%p2821_p5), %s3080_s11, 4096, %s397_s17, [#allocation6], %s2722_s18, %s2722_s18, %s2723_s19  }
  0x2f   : > { %422 = sbr.rel (%p2811_p3) target bundleno = 2863 (0xb2f), region = 72 }
  0x34   : > { %2704 = dma.done.wait (%p2444_p2), [#allocation4], 3072  }
  0x35   : > { %2706 = vsyncadd (%p2444_p2), [#allocation4], 4294964224 }
  0x36   : > { %2708 = dma.done.wait (%p2444_p2), [#allocation6], 8192  }
  0x37   : > { %2710 = vsyncadd (%p2444_p2), [#allocation6], 4294959104  ;;  %p472_p6 = scmp.lt.s32.totalorder %s2806_s28, 1  ;;  %v2473_v1 = vld [vmem:[#allocation3 + $0xac] ss:$12 sps:$4 sm:$0xff]   ;;  %v2724_v3 = vmov 0.0   ;;  %v545_v41 = vlaneseq }
  0x38   : > { %v2475_v2 = vld [vmem:[#allocation3 + $0xa8] ss:$12 sps:$4 sm:$0xff]   ;;  %2334 = vmatprep.subr.bf16.mxu1 %v2724_v3  ;;  %v2476_v4 = vld [vmem:[#allocation3 + $0xb0] ss:$12 sps:$4 sm:$0xff]   ;;  %688 = vmatprep.subr.bf16.mxu0 %v2473_v1  ;;  %v2480_v7 = vld [vmem:[#allocation3 + $0x98] ss:$12 sps:$4 sm:$0xff]  }
  0x39   : > { %s3086_s28 = smov (!%p472_p6, %s2806_s28), 1  ;;  %v2477_v5 = vld [vmem:[#allocation3 + $0x94] ss:$12 sps:$4 sm:$0xff]   ;;  %v2479_v6 = vld [vmem:[#allocation3 + $0x90] ss:$12 sps:$4 sm:$0xff]   ;;  %689 = vmatpush1.bf16.msra.mxu0 %v2475_v2  ;;  %2335 = vmatpush3.bf16.msra.mxu1 %v2476_v4  ;;  %v2725_v22 = vmov 0  }
  0x3a   : > { %s2142_s29 = sshll.u32 %s3086_s28, 3  ;;  %690 = vmatprep.subr.bf16.mxu0 %v2477_v5  ;;  %2336 = vmatprep.subr.bf16.mxu1 %v2724_v3  ;;  %v2481_v12 = vld [vmem:[#allocation3 + $0x7c] ss:$12 sps:$4 sm:$0xff]   ;;  %v2483_v13 = vld [vmem:[#allocation3 + $0x78] ss:$12 sps:$4 sm:$0xff]   ;;  %vm2726_vm0 = vmmov 0  }
  0x3b   : > { %s475_s17 = scalar_lea.vmem %s3069_s0, %s2142_s29  ;;  %v2484_v14 = vld [vmem:[#allocation3 + $0x80] ss:$12 sps:$4 sm:$0xff]   ;;  %v2485_v15 = vld [vmem:[#allocation3 + $0x64] ss:$12 sps:$4 sm:$0xff]   ;;  %v2488_v17 = vld [vmem:[#allocation3 + $0x68] ss:$12 sps:$4 sm:$0xff]   ;;  %720 = vmatprep.mubr.bf16.mxu0 %v2725_v22  ;;  %2350 = vmatprep.mubr.msk.bf16.mxu1 %vm2726_vm0, %v2724_v3  ;;  %s479_s15 = scalar_lea.vmem %s3082_s13, %s2142_s29 }
  0x3c   : > { %v2879_v0 = vld [vmem:[%s475_s17] sm:$0xff]  ;;  %v2487_v16 = vld [vmem:[#allocation3 + $0x60] ss:$12 sps:$4 sm:$0xff]   ;;  %v2491_v19 = vld [vmem:[#allocation3 + $0x48] ss:$12 sps:$4 sm:$0xff]   ;;  %v2906_v42 = vshrl.u32 %v545_v41, 7 }
  0x3d   : > { %484 = vadd.xlane.f32.xlu0 %v2879_v0  ;;  %691 = vmatpush1.bf16.msra.mxu0 %v2479_v6  ;;  %v2489_v18 = vld [vmem:[#allocation3 + $0x4c] ss:$12 sps:$4 sm:$0xff]   ;;  %v2492_v20 = vld [vmem:[#allocation3 + $0x50] ss:$12 sps:$4 sm:$0xff]   ;;  %v2493_v21 = vld [vmem:[#allocation3 + $0x34] ss:$12 sps:$4 sm:$0xff]  }
  0x3e   : > { %2337 = vmatpush3.bf16.msra.mxu1 %v2480_v7  ;;  %692 = vmatprep.subr.bf16.mxu0 %v2481_v12  ;;  %v2495_v23 = vld [vmem:[#allocation3 + $0x30] ss:$12 sps:$4 sm:$0xff]   ;;  %v2496_v24 = vld [vmem:[#allocation3 + $0x38] ss:$12 sps:$4 sm:$0xff]   ;;  %v2500_v27 = vld [vmem:[#allocation3 + $0x20] ss:$12 sps:$4 sm:$0xff]  }
  0x3f   : > { %2338 = vmatprep.subr.bf16.mxu1 %v2724_v3  ;;  %v2497_v25 = vld [vmem:[#allocation3 + $0x1c] ss:$12 sps:$4 sm:$0xff]   ;;  %v2499_v26 = vld [vmem:[#allocation3 + $0x18] ss:$12 sps:$4 sm:$0xff]   ;;  %v2503_v29 = vld [vmem:[#allocation3] ss:$12 sps:$4 sm:$0xff]  }
  0x40   : > { %v2501_v28 = vld [vmem:[#allocation3 + $0x4] ss:$12 sps:$4 sm:$0xff]   ;;  %v2504_v30 = vld [vmem:[#allocation3 + $0x8] ss:$12 sps:$4 sm:$0xff]   ;;  %v2144_v35 = vld [vmem:[%s3070_s1] ss:$0 sm:$0xff] }
  0x41   : > { %693 = vmatpush1.bf16.msra.mxu0 %v2483_v13  ;;  %v2145_v37 = vld [vmem:[%s3071_s2] ss:$0 sm:$0xff]  ;;  %v551_v43 = vsub.s32 1, %v2906_v42  ;;  %v555_v45 = vsub.s32 2, %v2906_v42  ;;  %v547_v49 = vsub.s32 0, %v2906_v42  ;;  %vm777_vm1 = vcmask 261120  }
  0x42   : > { %2339 = vmatpush3.bf16.msra.mxu1 %v2484_v14  ;;  %694 = vmatprep.subr.bf16.mxu0 %v2485_v15  ;;  %v543_v44 = vld [vmem:[%s3073_s4] sm:$0x7]  ;;  %s2727_s16 = smov 96   ;;  %s2728_s18 = smov 32   ;;  %vm841_vm2 = vcmask 1043456   ;;  %v2932_v4 = vand.u32 127, %v545_v41 }
  0x43   : > { %2340 = vmatprep.subr.bf16.mxu1 %v2724_v3  ;;  %v552_v46 = vrot.slane %v543_v44, %v551_v43  ;;  %v556_v52 = vrot.slane %v543_v44, %v555_v45  ;;  %v548_v56 = vrot.slane %v543_v44, %v547_v49  ;;  %vm825_vm4 = vcmask 64512   ;;  %s2729_s19 = smov 64  }
  0x44   : > { %vm776_vm3 = vcmp.le.s32.totalorder %v2932_v4, %v2906_v42  ;;  %vm1004_vm5 = vcmask 523520   ;;  %vm1121_vm6 = vcmask 785920   ;;  %vm1238_vm7 = vcmask 1048320  }
  0x45   : > { %695 = vmatpush1.bf16.msra.mxu0 %v2487_v16 }
  0x46   : > { %2341 = vmatpush3.bf16.msra.mxu1 %v2488_v17  ;;  %696 = vmatprep.subr.bf16.mxu0 %v2489_v18 }
  0x47   : > { %2342 = vmatprep.subr.bf16.mxu1 %v2724_v3 }
  0x49   : > { %697 = vmatpush1.bf16.msra.mxu0 %v2491_v19 }
  0x4a   : > { %2343 = vmatpush3.bf16.msra.mxu1 %v2492_v20  ;;  %698 = vmatprep.subr.bf16.mxu0 %v2493_v21 }
  0x4b   : > { %2344 = vmatprep.subr.bf16.mxu1 %v2724_v3 }
  0x4d   : > { %699 = vmatpush1.bf16.msra.mxu0 %v2495_v23 }
  0x4e   : > { %2345 = vmatpush3.bf16.msra.mxu1 %v2496_v24  ;;  %700 = vmatprep.subr.bf16.mxu0 %v2497_v25 }
  0x4f   : > { %2346 = vmatprep.subr.bf16.mxu1 %v2724_v3 }
  0x51   : > { %701 = vmatpush1.bf16.msra.mxu0 %v2499_v26 }
  0x52   : > { %2347 = vmatpush3.bf16.msra.mxu1 %v2500_v27  ;;  %702 = vmatprep.subr.bf16.mxu0 %v2501_v28 }
  0x53   : > { %2348 = vmatprep.subr.bf16.mxu1 %v2724_v3 }
  0x55   : > { %703 = vmatpush1.bf16.msra.mxu0 %v2503_v29 }
  0x56   : > { %2349 = vmatpush3.bf16.msra.mxu1 %v2504_v30  ;;  %2378 = vmatprep.subr.bf16.mxu0 %v2724_v3 }
  0x57   : > { %2354 = vmatprep.subr.bf16.mxu1 %v2724_v3 }
  0xc6   : > { %v485_v8 = vpop.xlane.xlu0 %484 }
  0xc7   : > { %v487_v9 = vmul.f32 0.0078125, %v485_v8 }
  0xc9   : > { %v488_v10 = vsub.f32 %v2879_v0, %v487_v9 }
  0xcb   : > { %v489_v11 = vmul.f32 %v488_v10, %v488_v10 }
  0xcd   : > { %490 = vadd.xlane.f32.xlu0 %v489_v11 }
 0x156   : > { %v491_v31 = vpop.xlane.xlu0 %490 }
 0x157   : > { %v492_v32 = vmul.f32 0.0078125, %v491_v31 }
 0x159   : > { %v493_v33 = vadd.f32 1e-05, %v492_v32 }
 0x15b   : > { %2593 = vrsqrt.f32 %v493_v33 }
 0x168   : > { %v2594_v34 = vpop.eup %2593 }
 0x169   : > { %v495_v36 = vmul.f32 %v2594_v34, %v488_v10 }
 0x16b   : > { %v502_v38 = vmul.f32 %v2144_v35, %v495_v36 }
 0x16d   : > { %v509_v39 = vadd.f32 %v2145_v37, %v502_v38 }
 0x16f   : > { %v510_v40 = vpack.c.bf16 %v509_v39, %v509_v39 }
 0x171   : > { %721 = vmatmul.mubr.bf16.vlgmr.msra.gmra.mxu0 %v510_v40  ;;  %2351 = vmatmul.mubr.bf16.vlgmr.msra.gmra.mxu1 %v510_v40 }
 0x172   : > { %2356 = vmatprep.mubr.msk.bf16.mxu1 %vm2726_vm0, %v2724_v3  ;;  %2380 = vmatprep.mubr.msk.bf16.mxu0 %vm2726_vm0, %v2724_v3 }
 0x231   : > { %v722_v47 = vpop.f32.mrf.mxu0  ;;  %v763_v48 = vpop.f32.mrf.mxu1 }
 0x232   : > { %v764_v60 = vadd.f32 %v763_v48, %v556_v52  ;;  %v723_v62 = vadd.f32 %v722_v47, %v548_v56 }
 0x233   : > { %v724_v50 = vpop.f32.mrf.mxu0  ;;  %v2352_v51 = vpop.f32.mrf.mxu1 }
 0x234   : > { %v725_v53 = vadd.f32 %v724_v50, %v552_v46  ;;  %v2923_v63 = vpack.c.bf16 %v764_v60, %v764_v60  ;;  %v769_v1 = vpack.c.bf16 %v723_v62, %v723_v62 }
 0x235   : > { %v726_v54 = vpop.f32.mrf.mxu0  ;;  %v766_v55 = vpop.f32.mrf.mxu1 }
 0x236   : > { %v770_v57 = vpack.c.bf16 %v725_v53, %v725_v53  ;;  %v843_v2 = vsel %vm841_vm2, %v2923_v63, 0 }
 0x237   : > { %v727_v58 = vpop.f32.mrf.mxu0  ;;  %v2353_v59 = vpop.f32.mrf.mxu1 }
 0x238   : > { %890 = vrot.lane.b32.xlu0 %v770_v57, %s2727_s16  ;;  %v782_v61 = vsel %vm777_vm1, %v770_v57, 0 }
 0x239   : > { %2355 = vmatpush3.bf16.xpose.msra.mxu1 %v782_v61 }
 0x23a   : > { %2360 = vmatprep.subr.bf16.mxu1 %v2724_v3 }
 0x23c   : > { %1125 = vrot.lane.b32.xlu0 %v770_v57, %s2728_s18 }
 0x240   : > { %2357 = vmatmul.mubr.msk.bf16.vlgmr.msra.gmra.mxu1 %vm777_vm1, %v769_v1 }
 0x241   : > { %2361 = vmatpush3.bf16.msra.mxu1 %v843_v2  ;;  %2362 = vmatprep.mubr.msk.bf16.mxu1 %vm2726_vm0, %v2724_v3 }
 0x242   : > { %2366 = vmatprep.subr.bf16.mxu1 %v2724_v3 }
 0x2aa   : > { %v891_v18 = vpop.permute.xlu0 %890 }
 0x2ab   : > { %v896_v28 = vsel %vm777_vm1, %v891_v18, 0 }
 0x2ae   : > { %v1126_v23 = vpop.permute.xlu0 %1125 }
 0x2af   : > { %v1131_v26 = vsel %vm777_vm1, %v1126_v23, 0 }
 0x300   : > { %v818_v5 = vpop.f32.mrf.mxu1 }
 0x301   : > { %v824_v6 = vsel %vm776_vm3, %v818_v5, -1e+30 }
 0x302   : > { %v2358_v7 = vpop.f32.mrf.mxu1  ;;  %v826_v8 = vsel %vm825_vm4, %v824_v6, -inf }
 0x303   : > { %827 = vmax.xlane.f32.xlu1 %v826_v8 }
 0x304   : > { %v821_v9 = vpop.f32.mrf.mxu1 }
 0x306   : > { %v2359_v10 = vpop.f32.mrf.mxu1 }
 0x38c   : > { %v828_v11 = vpop.xlane.xlu1 %827 }
 0x38d   : > { %v829_v12 = vsub.f32 %v824_v6, %v828_v11 }
 0x38f   : > { %v830_v13 = vmul.f32 1.442695, %v829_v12 }
 0x391   : > { %2595 = vpow2.f32 %v830_v13 }
 0x39e   : > { %v2596_v14 = vpop.eup %2595 }
 0x39f   : > { %v832_v15 = vsel %vm825_vm4, %v2596_v14, 0.0 }
 0x3a0   : > { %833 = vadd.xlane.f32.xlu1 %v832_v15 }
 0x3b1   : > { %887 = vrot.lane.b32.xlu1 %v769_v1, %s2727_s16 }
 0x3b5   : > { %1008 = vrot.lane.b32.xlu1 %v770_v57, %s2729_s19 }
 0x3b9   : > { %1006 = vrot.lane.b32.xlu1 %v769_v1, %s2729_s19 }
 0x3bd   : > { %1123 = vrot.lane.b32.xlu1 %v769_v1, %s2728_s18 }
 0x429   : > { %v834_v16 = vpop.xlane.xlu1 %833 }
 0x42a   : > { %2597 = vrcp.f32 %v834_v16 }
 0x42d   : > { %v888_v17 = vpop.permute.xlu1 %887 }
 0x431   : > { %v1009_v19 = vpop.permute.xlu1 %1008 }
 0x432   : > { %v1014_v20 = vsel %vm777_vm1, %v1009_v19, 0 }
 0x433   : > { %2379 = vmatpush3.bf16.xpose.msra.mxu0 %v1014_v20 }
 0x434   : > { %2390 = vmatprep.subr.bf16.mxu0 %v2724_v3 }
 0x435   : > { %v1007_v25 = vpop.permute.xlu1 %1006 }
 0x437   : > { %v2598_v21 = vpop.eup %2597 }
 0x438   : > { %v836_v24 = vmul.f32 %v2598_v21, %v2596_v14 }
 0x439   : > { %v1124_v29 = vpop.permute.xlu1 %1123 }
 0x43a   : > { %2381 = vmatmul.mubr.msk.bf16.vlgmr.msra.gmra.mxu0 %vm777_vm1, %v1007_v25  ;;  %v837_v27 = vpack.c.bf16 %v836_v24, %v836_v24 }
 0x43b   : > { %2391 = vmatpush3.bf16.xpose.msra.mxu0 %v1131_v26  ;;  %2392 = vmatprep.mubr.msk.bf16.mxu0 %vm2726_vm0, %v2724_v3 }
 0x43c   : > { %2363 = vmatmul.mubr.msk.bf16.vlgmr.msra.gmra.mxu1 %vm825_vm4, %v837_v27  ;;  %2402 = vmatprep.subr.bf16.mxu0 %v2724_v3 }
 0x43d   : > { %2367 = vmatpush3.bf16.xpose.msra.mxu1 %v896_v28  ;;  %2368 = vmatprep.mubr.msk.bf16.mxu1 %vm2726_vm0, %v2724_v3  ;;  %v2505_v28 = vld [vmem:[%s3074_s5 + $0x38] sm:$0xff]  }
 0x43e   : > { %2372 = vmatprep.subr.bf16.mxu1 %v2724_v3 }
 0x442   : > { %2393 = vmatmul.mubr.msk.bf16.vlgmr.msra.gmra.mxu0 %vm777_vm1, %v1124_v29  ;;  %v2506_v29 = vld [vmem:[%s3074_s5 + $0x30] sm:$0xff]  }
 0x443   : > { %2418 = vmatprep.mubr.msk.bf16.mxu0 %vm2726_vm0, %v2724_v3  ;;  %2403 = vmatpush3.bf16.msra.mxu0 %v2505_v28  ;;  %v2551_v28 = vld [vmem:[#allocation5 + $0x24] ss:$16 sps:$4 sm:$0xff]  }
 0x444   : > { %2369 = vmatmul.mubr.msk.bf16.vlgmr.msra.gmra.mxu1 %vm777_vm1, %v888_v17  ;;  %2404 = vmatprep.subr.bf16.mxu0 %v2724_v3 }
 0x445   : > { %2374 = vmatprep.mubr.msk.bf16.mxu1 %vm2726_vm0, %v2724_v3 }
 0x447   : > { %2405 = vmatpush3.bf16.msra.mxu0 %v2506_v29  ;;  %v2554_v29 = vld [vmem:[#allocation5 + $0x2c] ss:$16 sps:$4 sm:$0xff]  }
 0x448   : > { %2406 = vmatprep.subr.bf16.mxu0 %v2724_v3 }
 0x4fa   : > { %v1050_v30 = vpop.f32.mrf.mxu0 }
 0x4fb   : > { %v1056_v31 = vsel %vm776_vm3, %v1050_v30, -1e+30  ;;  %v2507_v30 = vld [vmem:[%s3074_s5 + $0x28] sm:$0xff]  }
 0x4fc   : > { %v879_v32 = vpop.f32.mrf.mxu1  ;;  %v2382_v33 = vpop.f32.mrf.mxu0  ;;  %v1057_v34 = vsel %vm825_vm4, %v1056_v31, -inf  ;;  %2407 = vmatpush3.bf16.msra.mxu0 %v2507_v30  ;;  %v2549_v30 = vld [vmem:[#allocation5 + $0x20] ss:$16 sps:$4 sm:$0xff]  }
 0x4fd   : > { %885 = vst.msk [vmem:[#allocation2] sm:$0xff] %vm777_vm1, %v879_v32  ;;  %1058 = vmax.xlane.f32.xlu1 %v1057_v34  ;;  %2408 = vmatprep.subr.bf16.mxu0 %v2724_v3  ;;  %v2509_v32 = vld [vmem:[%s3074_s5 + $0x18] sm:$0xff]   ;;  %v2510_v33 = vld [vmem:[%s3074_s5 + $0x10] sm:$0xff]  }
 0x4fe   : > { %v2364_v35 = vpop.f32.mrf.mxu1  ;;  %v1053_v36 = vpop.f32.mrf.mxu0 }
 0x500   : > { %v882_v37 = vpop.f32.mrf.mxu1  ;;  %v2383_v38 = vpop.f32.mrf.mxu0 }
 0x501   : > { %v2511_v37 = vld [vmem:[%s3074_s5 + $0x8] sm:$0xff]  }
 0x502   : > { %v2365_v39 = vpop.f32.mrf.mxu1  ;;  %v1167_v40 = vpop.f32.mrf.mxu0 }
 0x503   : > { %v1173_v51 = vsel %vm776_vm3, %v1167_v40, -1e+30  ;;  %v2512_v39 = vld [vmem:[%s3074_s5] sm:$0xff]  }
 0x504   : > { %v932_v41 = vpop.f32.mrf.mxu1  ;;  %v2394_v44 = vpop.f32.mrf.mxu0  ;;  %v1174_v55 = vsel %vm825_vm4, %v1173_v51, -inf }
 0x505   : > { %v938_v46 = vsel %vm776_vm3, %v932_v41, -1e+30 }
 0x506   : > { %v2370_v47 = vpop.f32.mrf.mxu1  ;;  %v1170_v48 = vpop.f32.mrf.mxu0  ;;  %v939_v50 = vsel %vm825_vm4, %v938_v46, -inf }
 0x507   : > { %940 = vmax.xlane.f32.xlu0 %v939_v50 }
 0x508   : > { %v935_v52 = vpop.f32.mrf.mxu1  ;;  %v2395_v53 = vpop.f32.mrf.mxu0 }
 0x50a   : > { %v2371_v54 = vpop.f32.mrf.mxu1 }
 0x50b   : > { %1175 = vmax.xlane.f32.xlu0 %v1174_v55 }
 0x586   : > { %v1059_v56 = vpop.xlane.xlu1 %1058 }
 0x587   : > { %v1060_v57 = vsub.f32 %v1056_v31, %v1059_v56  ;;  %v2508_v31 = vld [vmem:[%s3074_s5 + $0x20] sm:$0xff]  }
 0x588   : > { %2409 = vmatpush3.bf16.msra.mxu0 %v2508_v31  ;;  %v2178_v56 = vld [vmem:[%s3075_s6] ss:$0 sm:$0xff] }
 0x589   : > { %v1061_v58 = vmul.f32 1.442695, %v1060_v57  ;;  %2410 = vmatprep.subr.bf16.mxu0 %v2724_v3  ;;  %v2552_v31 = vld [vmem:[#allocation5 + $0x28] ss:$16 sps:$4 sm:$0xff]  }
 0x58b   : > { %2599 = vpow2.f32 %v1061_v58 }
 0x58c   : > { %2411 = vmatpush3.bf16.msra.mxu0 %v2509_v32  ;;  %v2557_v32 = vld [vmem:[#allocation5 + $0x4] ss:$16 sps:$4 sm:$0xff]  }
 0x58d   : > { %2412 = vmatprep.subr.bf16.mxu0 %v2724_v3 }
 0x590   : > { %v941_v59 = vpop.xlane.xlu0 %940  ;;  %2413 = vmatpush3.bf16.msra.mxu0 %v2510_v33  ;;  %v2560_v33 = vld [vmem:[#allocation5 + $0xc] ss:$16 sps:$4 sm:$0xff]  }
 0x591   : > { %v942_v60 = vsub.f32 %v938_v46, %v941_v59  ;;  %2414 = vmatprep.subr.bf16.mxu0 %v2724_v3 }
 0x593   : > { %v943_v61 = vmul.f32 1.442695, %v942_v60 }
 0x594   : > { %v1176_v62 = vpop.xlane.xlu0 %1175  ;;  %2415 = vmatpush3.bf16.msra.mxu0 %v2511_v37  ;;  %v2562_v37 = vld [vmem:[#allocation7 + $0xf8] sm:$0xff]  }
 0x595   : > { %2601 = vpow2.f32 %v943_v61  ;;  %v1177_v1 = vsub.f32 %v1173_v51, %v1176_v62  ;;  %2416 = vmatprep.subr.bf16.mxu0 %v2724_v3 }
 0x597   : > { %v1178_v2 = vmul.f32 1.442695, %v1177_v1  ;;  %v2513_v1 = vld [vmem:[#allocation5 + $0xe0] ss:$16 sps:$4 sm:$0xff]  }
 0x598   : > { %v2600_v4 = vpop.eup %2599  ;;  %2417 = vmatpush3.bf16.msra.mxu0 %v2512_v39 }
 0x599   : > { %2603 = vpow2.f32 %v1178_v2  ;;  %v1063_v5 = vsel %vm825_vm4, %v2600_v4, 0.0  ;;  %v2515_v2 = vld [vmem:[#allocation5 + $0xe4] ss:$16 sps:$4 sm:$0xff]  }
 0x59a   : > { %1064 = vadd.xlane.f32.xlu0 %v1063_v5  ;;  %v2518_v5 = vld [vmem:[#allocation5 + $0xec] ss:$16 sps:$4 sm:$0xff]  }
 0x59b   : > { %1637 = vmatprep.subr.bf16.mxu0 %v2518_v5  ;;  %v2577_v5 = vld [vmem:[#allocation7 + $0x58] sm:$0xff]  }
 0x5a2   : > { %v2602_v6 = vpop.eup %2601 }
 0x5a3   : > { %v945_v7 = vsel %vm825_vm4, %v2602_v6, 0.0 }
 0x5a4   : > { %946 = vadd.xlane.f32.xlu0 %v945_v7  ;;  %v2519_v7 = vld [vmem:[#allocation5 + $0xc0] ss:$16 sps:$4 sm:$0xff]  }
 0x5a6   : > { %v2604_v8 = vpop.eup %2603 }
 0x5a7   : > { %v1180_v9 = vsel %vm825_vm4, %v2604_v8, 0.0 }
 0x5a8   : > { %1181 = vadd.xlane.f32.xlu1 %v1180_v9 }
 0x5b9   : > { %1069 = vrot.lane.b32.xlu1 %v2923_v63, %s2729_s19 }
 0x5ba   : > { %952 = vrot.lane.b32.xlu0 %v2923_v63, %s2727_s16 }
 0x5bd   : > { %1186 = vrot.lane.b32.xlu1 %v2923_v63, %s2728_s18 }
 0x623   : > { %v1065_v10 = vpop.xlane.xlu0 %1064 }
 0x62d   : > { %v947_v11 = vpop.xlane.xlu0 %946 }
 0x62e   : > { %2605 = vrcp.f32 %v947_v11 }
 0x62f   : > { %2607 = vrcp.f32 %v1065_v10 }
 0x631   : > { %v953_v12 = vpop.permute.xlu0 %952  ;;  %v1182_v14 = vpop.xlane.xlu1 %1181 }
 0x632   : > { %v958_v13 = vsel %vm841_vm2, %v953_v12, 0  ;;  %2609 = vrcp.f32 %v1182_v14  ;;  %v2527_v12 = vld [vmem:[#allocation5 + $0xa4] ss:$16 sps:$4 sm:$0xff]   ;;  %v2525_v14 = vld [vmem:[#allocation5 + $0xa0] ss:$16 sps:$4 sm:$0xff]  }
 0x633   : > { %2373 = vmatpush3.bf16.msra.mxu1 %v958_v13  ;;  %v2530_v13 = vld [vmem:[#allocation5 + $0xac] ss:$16 sps:$4 sm:$0xff]  }
 0x634   : > { %2384 = vmatprep.subr.bf16.mxu1 %v2724_v3 }
 0x635   : > { %v1070_v17 = vpop.permute.xlu1 %1069 }
 0x636   : > { %v1075_v20 = vsel %vm841_vm2, %v1070_v17, 0  ;;  %v2533_v17 = vld [vmem:[#allocation5 + $0x84] ss:$16 sps:$4 sm:$0xff]  }
 0x639   : > { %v1187_v21 = vpop.permute.xlu1 %1186 }
 0x63a   : > { %v1192_v25 = vsel %vm841_vm2, %v1187_v21, 0  ;;  %v2537_v21 = vld [vmem:[#allocation5 + $0x60] ss:$16 sps:$4 sm:$0xff]  }
 0x63b   : > { %v2606_v15 = vpop.eup %2605 }
 0x63c   : > { %v949_v16 = vmul.f32 %v2606_v15, %v2602_v6  ;;  %v2608_v19 = vpop.eup %2607  ;;  %v2521_v6 = vld [vmem:[#allocation5 + $0xc4] ss:$16 sps:$4 sm:$0xff]   ;;  %v2528_v15 = vld [vmem:[#allocation5 + $0xa8] ss:$16 sps:$4 sm:$0xff]  }
 0x63d   : > { %v1067_v63 = vmul.f32 %v2608_v19, %v2600_v4  ;;  %v2516_v4 = vld [vmem:[#allocation5 + $0xe8] ss:$16 sps:$4 sm:$0xff]   ;;  %v2536_v19 = vld [vmem:[#allocation5 + $0x8c] ss:$16 sps:$4 sm:$0xff]  }
 0x63e   : > { %v950_v18 = vpack.c.bf16 %v949_v16, %v949_v16  ;;  %v2531_v16 = vld [vmem:[#allocation5 + $0x80] ss:$16 sps:$4 sm:$0xff]  }
 0x63f   : > { %v1068_v23 = vpack.c.bf16 %v1067_v63, %v1067_v63  ;;  %v2610_v24 = vpop.eup %2609  ;;  %v2542_v63 = vld [vmem:[#allocation5 + $0x6c] ss:$16 sps:$4 sm:$0xff]  }
 0x640   : > { %2375 = vmatmul.mubr.msk.bf16.vlgmr.msra.gmra.mxu1 %vm825_vm4, %v950_v18  ;;  %v1184_v26 = vmul.f32 %v2610_v24, %v2604_v8  ;;  %v2522_v8 = vld [vmem:[#allocation5 + $0xc8] ss:$16 sps:$4 sm:$0xff]   ;;  %v2545_v24 = vld [vmem:[#allocation5 + $0x44] ss:$16 sps:$4 sm:$0xff]  }
 0x641   : > { %2385 = vmatpush3.bf16.msra.mxu1 %v1075_v20  ;;  %2386 = vmatprep.mubr.msk.bf16.mxu1 %vm2726_vm0, %v2724_v3  ;;  %v2534_v18 = vld [vmem:[#allocation5 + $0x88] ss:$16 sps:$4 sm:$0xff]   ;;  %v2539_v20 = vld [vmem:[#allocation5 + $0x64] ss:$16 sps:$4 sm:$0xff]  }
 0x642   : > { %2396 = vmatprep.subr.bf16.mxu1 %v2724_v3  ;;  %v1185_v27 = vpack.c.bf16 %v1184_v26, %v1184_v26  ;;  %v2543_v26 = vld [vmem:[#allocation5 + $0x40] ss:$16 sps:$4 sm:$0xff]  }
 0x648   : > { %2387 = vmatmul.mubr.msk.bf16.vlgmr.msra.gmra.mxu1 %vm825_vm4, %v1068_v23  ;;  %v2540_v23 = vld [vmem:[#allocation5 + $0x68] ss:$16 sps:$4 sm:$0xff]  }
 0x649   : > { %2397 = vmatpush3.bf16.msra.mxu1 %v1192_v25  ;;  %2398 = vmatprep.mubr.msk.bf16.mxu1 %vm2726_vm0, %v2724_v3  ;;  %v2548_v25 = vld [vmem:[#allocation5 + $0x4c] ss:$16 sps:$4 sm:$0xff]  }
 0x64a   : > { %1596 = vmatprep.subr.bf16.mxu1 %v2515_v2  ;;  %v2575_v2 = vld [vmem:[#allocation7 + $0x20] sm:$0xff]  }
 0x650   : > { %2399 = vmatmul.mubr.msk.bf16.vlgmr.msra.gmra.mxu1 %vm825_vm4, %v1185_v27  ;;  %v2546_v27 = vld [vmem:[#allocation5 + $0x48] ss:$16 sps:$4 sm:$0xff]  }
 0x651   : > { %1628 = vmatprep.mubr.bf16.mxu1 %v2725_v22  ;;  %1597 = vmatpush1.bf16.msra.mxu1 %v2513_v1  ;;  %v2574_v1 = vld [vmem:[#allocation7 + $0xe0] sm:$0xff]  }
 0x652   : > { %1598 = vmatprep.subr.bf16.mxu1 %v2521_v6  ;;  %v2578_v6 = vld [vmem:[#allocation7 + $0xd8] sm:$0xff]  }
 0x655   : > { %1599 = vmatpush1.bf16.msra.mxu1 %v2519_v7  ;;  %v2580_v7 = vld [vmem:[#allocation7 + $0x98] sm:$0xff]  }
 0x656   : > { %1600 = vmatprep.subr.bf16.mxu1 %v2527_v12  ;;  %v2586_v12 = vld [vmem:[#allocation7 + $0xc8] sm:$0xff]  }
 0x659   : > { %1601 = vmatpush1.bf16.msra.mxu1 %v2525_v14  ;;  %v2588_v14 = vld [vmem:[#allocation7 + $0x88] sm:$0xff]  }
 0x65a   : > { %1602 = vmatprep.subr.bf16.mxu1 %v2533_v17  ;;  %v2591_v17 = vld [vmem:[#allocation7] sm:$0xff]  }
 0x65d   : > { %1603 = vmatpush1.bf16.msra.mxu1 %v2531_v16  ;;  %v2590_v16 = vld [vmem:[#allocation7 + $0xc0] sm:$0xff]  }
 0x65e   : > { %1604 = vmatprep.subr.bf16.mxu1 %v2539_v20  ;;  %v1430_v20 = vsub.s32 3, %v2906_v42 }
 0x661   : > { %1605 = vmatpush1.bf16.msra.mxu1 %v2537_v21 }
 0x662   : > { %1606 = vmatprep.subr.bf16.mxu1 %v2545_v24 }
 0x665   : > { %1607 = vmatpush1.bf16.msra.mxu1 %v2543_v26 }
 0x666   : > { %1608 = vmatprep.subr.bf16.mxu1 %v2551_v28 }
 0x669   : > { %1609 = vmatpush1.bf16.msra.mxu1 %v2549_v30 }
 0x66a   : > { %1610 = vmatprep.subr.bf16.mxu1 %v2557_v32 }
 0x700   : > { %v994_v34 = vpop.f32.mrf.mxu1 }
 0x701   : > { %1001 = vrot.lane.b32.xlu1 %v994_v34, %s2728_s18  ;;  %v2555_v34 = vld [vmem:[#allocation5] ss:$16 sps:$4 sm:$0xff]  }
 0x702   : > { %v2376_v35 = vpop.f32.mrf.mxu1  ;;  %1611 = vmatpush1.bf16.msra.mxu1 %v2555_v34 }
 0x703   : > { %v2558_v35 = vld [vmem:[#allocation5 + $0x8] ss:$16 sps:$4 sm:$0xff]  }
 0x704   : > { %v997_v36 = vpop.f32.mrf.mxu1 }
 0x705   : > { %v2561_v36 = vld [vmem:[#allocation7 + $0x78] sm:$0xff]  }
 0x706   : > { %v2377_v38 = vpop.f32.mrf.mxu1  ;;  %2290 = vmatprep.subr.bf16.mxu1 %v2561_v36 }
 0x708   : > { %v1111_v40 = vpop.f32.mrf.mxu1 }
 0x709   : > { %1118 = vrot.lane.b32.xlu0 %v1111_v40, %s2729_s19 }
 0x70a   : > { %v2388_v41 = vpop.f32.mrf.mxu1 }
 0x70c   : > { %v1114_v44 = vpop.f32.mrf.mxu1 }
 0x70d   : > { %v2187_v44 = vld [vmem:[%s3076_s7] ss:$0 sm:$0xff] }
 0x70e   : > { %v2389_v46 = vpop.f32.mrf.mxu1 }
 0x710   : > { %v1228_v47 = vpop.f32.mrf.mxu1 }
 0x711   : > { %1235 = vrot.lane.b32.xlu1 %v1228_v47, %s2727_s16  ;;  %v2188_v47 = vld [vmem:[%s3077_s8] ss:$0 sm:$0xff] }
 0x712   : > { %v2400_v48 = vpop.f32.mrf.mxu1 }
 0x714   : > { %v1231_v50 = vpop.f32.mrf.mxu1 }
 0x716   : > { %v2401_v51 = vpop.f32.mrf.mxu1 }
 0x717   : > { %v2563_v51 = vld [vmem:[#allocation7 + $0x38] sm:$0xff]  }
 0x773   : > { %v1002_v52 = vpop.permute.xlu1 %1001 }
 0x774   : > { %1005 = vst.msk [vmem:[#allocation2] sm:$0xff] %vm1004_vm5, %v1002_v52  ;;  %v2564_v52 = vld [vmem:[#allocation7 + $0xb8] sm:$0xff]  }
 0x77b   : > { %v1119_v53 = vpop.permute.xlu0 %1118 }
 0x77c   : > { %1122 = vst.msk [vmem:[#allocation2] sm:$0xff] %vm1121_vm6, %v1119_v53 }
 0x783   : > { %v1236_v3 = vpop.permute.xlu1 %1235 }
 0x784   : > { %1239 = vst.msk [vmem:[#allocation2] sm:$0xff] %vm1238_vm7, %v1236_v3  ;;  %v2565_v3 = vld [vmem:[#allocation7 + $0x70] sm:$0xff]  }
 0x78b   : > { %v1240_v54 = vld [vmem:[#allocation2] sm:$0xff] }
 0x78c   : > { %v1241_v55 = vpack.c.bf16 %v1240_v54, %v1240_v54  ;;  %v2566_v54 = vld [vmem:[#allocation7 + $0xf0] sm:$0xff]  }
 0x78e   : > { %2419 = vmatmul.mubr.bf16.vlgmr.msra.gmra.mxu0 %v1241_v55  ;;  %v2567_v55 = vld [vmem:[#allocation7 + $0x30] sm:$0xff]  }
 0x78f   : > { %1669 = vmatprep.mubr.bf16.mxu0 %v2725_v22  ;;  %v2524_v22 = vld [vmem:[#allocation5 + $0xcc] ss:$16 sps:$4 sm:$0xff]   ;;  %1638 = vmatpush1.bf16.msra.mxu0 %v2516_v4  ;;  %v2576_v4 = vld [vmem:[#allocation7 + $0xa0] sm:$0xff]  }
 0x790   : > { %1639 = vmatprep.subr.bf16.mxu0 %v2524_v22  ;;  %v2579_v22 = vld [vmem:[#allocation7 + $0x18] sm:$0xff]  }
 0x793   : > { %1640 = vmatpush1.bf16.msra.mxu0 %v2522_v8  ;;  %v2581_v8 = vld [vmem:[#allocation7 + $0x50] sm:$0xff]  }
 0x794   : > { %1641 = vmatprep.subr.bf16.mxu0 %v2530_v13  ;;  %v2587_v13 = vld [vmem:[#allocation7 + $0x8] sm:$0xff]  }
 0x797   : > { %1642 = vmatpush1.bf16.msra.mxu0 %v2528_v15  ;;  %v2589_v15 = vld [vmem:[#allocation7 + $0x40] sm:$0xff]  }
 0x798   : > { %1643 = vmatprep.subr.bf16.mxu0 %v2536_v19  ;;  %v1414_v19 = vld [vmem:[%s3079_s10] sm:$0xf] }
 0x799   : > { %v1427_v21 = vrot.slane %v1414_v19, %v555_v45  ;;  %v1431_v26 = vrot.slane %v1414_v19, %v1430_v20 }
 0x79b   : > { %1644 = vmatpush1.bf16.msra.mxu0 %v2534_v18  ;;  %v2592_v18 = vld [vmem:[#allocation7 + $0x80] sm:$0xff]  }
 0x79c   : > { %1645 = vmatprep.subr.bf16.mxu0 %v2542_v63  ;;  %v1419_v63 = vrot.slane %v1414_v19, %v547_v49 }
 0x79f   : > { %1646 = vmatpush1.bf16.msra.mxu0 %v2540_v23 }
 0x7a0   : > { %1647 = vmatprep.subr.bf16.mxu0 %v2548_v25  ;;  %v1423_v25 = vrot.slane %v1414_v19, %v551_v43 }
 0x7a3   : > { %1648 = vmatpush1.bf16.msra.mxu0 %v2546_v27 }
 0x7a4   : > { %1649 = vmatprep.subr.bf16.mxu0 %v2554_v29 }
 0x7a7   : > { %1650 = vmatpush1.bf16.msra.mxu0 %v2552_v31 }
 0x7a8   : > { %1651 = vmatprep.subr.bf16.mxu0 %v2560_v33 }
 0x7ab   : > { %1652 = vmatpush1.bf16.msra.mxu0 %v2558_v35 }
 0x7ac   : > { %2312 = vmatprep.subr.bf16.mxu0 %v2562_v37 }
 0x84e   : > { %v1347_v57 = vpop.f32.mrf.mxu0 }
 0x84f   : > { %v1348_v58 = vadd.f32 %v2178_v56, %v1347_v57  ;;  %v2568_v56 = vld [vmem:[#allocation7 + $0xb0] sm:$0xff]   ;;  %v2569_v57 = vld [vmem:[#allocation7 + $0x68] sm:$0xff]  }
 0x850   : > { %v2420_v59 = vpop.f32.mrf.mxu0 }
 0x851   : > { %v3037_v60 = vadd.f32 %v1348_v58, %v2879_v0  ;;  %v2570_v58 = vld [vmem:[#allocation7 + $0xe8] sm:$0xff]  }
 0x852   : > { %v1350_v61 = vpop.f32.mrf.mxu0  ;;  %v2571_v59 = vld [vmem:[#allocation7 + $0x28] sm:$0xff]  }
 0x853   : > { %1356 = vadd.xlane.f32.xlu0 %v3037_v60  ;;  %v2572_v61 = vld [vmem:[#allocation7 + $0xa8] sm:$0xff]  }
 0x854   : > { %v2421_v62 = vpop.f32.mrf.mxu0 }
 0x855   : > { %v2573_v62 = vld [vmem:[#allocation7 + $0x60] sm:$0xff]  }
 0x8dc   : > { %v1357_v0 = vpop.xlane.xlu0 %1356 }
 0x8dd   : > { %v1358_v9 = vmul.f32 0.0078125, %v1357_v0  ;;  %v2582_v0 = vld [vmem:[#allocation7 + $0xd0] sm:$0xff]  }
 0x8df   : > { %v1359_v10 = vsub.f32 %v3037_v60, %v1358_v9  ;;  %v2583_v9 = vld [vmem:[#allocation7 + $0x10] sm:$0xff]  }
 0x8e1   : > { %v1360_v11 = vmul.f32 %v1359_v10, %v1359_v10 }
 0x8e3   : > { %1361 = vadd.xlane.f32.xlu1 %v1360_v11  ;;  %v2585_v11 = vld [vmem:[#allocation7 + $0x48] sm:$0xff]  }
 0x96c   : > { %v1362_v38 = vpop.xlane.xlu1 %1361 }
 0x96d   : > { %v1363_v39 = vmul.f32 0.0078125, %v1362_v38 }
 0x96f   : > { %v1364_v40 = vadd.f32 1e-05, %v1363_v39 }
 0x971   : > { %2611 = vrsqrt.f32 %v1364_v40 }
 0x97e   : > { %v2612_v41 = vpop.eup %2611 }
 0x97f   : > { %v1366_v46 = vmul.f32 %v2612_v41, %v1359_v10  ;;  %v2584_v10 = vld [vmem:[#allocation7 + $0x90] sm:$0xff]  }
 0x981   : > { %v1373_v48 = vmul.f32 %v2187_v44, %v1366_v46 }
 0x983   : > { %v1380_v50 = vadd.f32 %v2188_v47, %v1373_v48 }
 0x985   : > { %v1381_v53 = vpack.c.bf16 %v1380_v50, %v1380_v50 }
 0x987   : > { %1629 = vmatmul.mubr.bf16.vlgmr.msra.gmra.mxu1 %v1381_v53  ;;  %1670 = vmatmul.mubr.bf16.vlgmr.msra.gmra.mxu0 %v1381_v53 }
 0x988   : > { %2291 = vmatpush3.bf16.msra.mxu1 %v2563_v51  ;;  %2313 = vmatpush3.bf16.msra.mxu0 %v2564_v52 }
 0x989   : > { %2292 = vmatprep.subr.bf16.mxu1 %v2565_v3  ;;  %2314 = vmatprep.subr.bf16.mxu0 %v2566_v54 }
 0x98c   : > { %2293 = vmatpush3.bf16.msra.mxu1 %v2567_v55  ;;  %2315 = vmatpush3.bf16.msra.mxu0 %v2568_v56 }
 0x98d   : > { %2294 = vmatprep.subr.bf16.mxu1 %v2569_v57  ;;  %2316 = vmatprep.subr.bf16.mxu0 %v2570_v58 }
 0x990   : > { %2295 = vmatpush3.bf16.msra.mxu1 %v2571_v59  ;;  %2317 = vmatpush3.bf16.msra.mxu0 %v2572_v61 }
 0x991   : > { %2296 = vmatprep.subr.bf16.mxu1 %v2573_v62  ;;  %2318 = vmatprep.subr.bf16.mxu0 %v2574_v1  ;;  %v2221_v1 = vld [vmem:[%s3081_s12] ss:$0 sm:$0xff] }
 0x994   : > { %2297 = vmatpush3.bf16.msra.mxu1 %v2575_v2  ;;  %2319 = vmatpush3.bf16.msra.mxu0 %v2576_v4 }
 0x995   : > { %2298 = vmatprep.subr.bf16.mxu1 %v2577_v5  ;;  %2320 = vmatprep.subr.bf16.mxu0 %v2578_v6 }
 0x998   : > { %2299 = vmatpush3.bf16.msra.mxu1 %v2579_v22  ;;  %2321 = vmatpush3.bf16.msra.mxu0 %v2580_v7 }
 0x999   : > { %2300 = vmatprep.subr.bf16.mxu1 %v2581_v8  ;;  %2322 = vmatprep.subr.bf16.mxu0 %v2582_v0 }
 0x99c   : > { %2301 = vmatpush3.bf16.msra.mxu1 %v2583_v9  ;;  %2323 = vmatpush3.bf16.msra.mxu0 %v2584_v10 }
 0x99d   : > { %2302 = vmatprep.subr.bf16.mxu1 %v2585_v11  ;;  %2324 = vmatprep.subr.bf16.mxu0 %v2586_v12 }
 0x9a0   : > { %2303 = vmatpush3.bf16.msra.mxu1 %v2587_v13  ;;  %2325 = vmatpush3.bf16.msra.mxu0 %v2588_v14 }
 0x9a1   : > { %2304 = vmatprep.subr.bf16.mxu1 %v2589_v15  ;;  %2326 = vmatprep.subr.bf16.mxu0 %v2590_v16 }
 0x9a4   : > { %2305 = vmatpush3.bf16.msra.mxu1 %v2591_v17  ;;  %2327 = vmatpush3.bf16.msra.mxu0 %v2592_v18 }
 0xa47   : > { %v1630_v23 = vpop.f32.mrf.mxu1  ;;  %v1671_v24 = vpop.f32.mrf.mxu0 }
 0xa48   : > { %v1631_v27 = vadd.f32 %v1630_v23, %v1419_v63  ;;  %v1672_v28 = vadd.f32 %v1671_v24, %v1427_v21 }
 0xa49   : > { %v1632_v29 = vpop.f32.mrf.mxu1  ;;  %v1673_v30 = vpop.f32.mrf.mxu0 }
 0xa4a   : > { %v1682_v31 = vmul.f32 0.70710677, %v1631_v27  ;;  %v1684_v32 = vmul.f32 0.70710677, %v1672_v28  ;;  %v1633_v33 = vadd.f32 %v1632_v29, %v1423_v25  ;;  %v1674_v34 = vadd.f32 %v1673_v30, %v1431_v26 }
 0xa4b   : > { %v1634_v35 = vpop.f32.mrf.mxu1  ;;  %v1675_v36 = vpop.f32.mrf.mxu0  ;;  %v1678_v44 = vmul.f32 0.5, %v1631_v27  ;;  %v1680_v47 = vmul.f32 0.5, %v1672_v28 }
 0xa4c   : > { %2613 = verf.f32 %v1682_v31  ;;  %v1683_v49 = vmul.f32 0.70710677, %v1633_v33  ;;  %v1685_v38 = vmul.f32 0.70710677, %v1674_v34  ;;  %v1679_v48 = vmul.f32 0.5, %v1633_v33 }
 0xa4d   : > { %2615 = verf.f32 %v1684_v32  ;;  %v1635_v45 = vpop.f32.mrf.mxu1  ;;  %v1676_v37 = vpop.f32.mrf.mxu0  ;;  %v1681_v52 = vmul.f32 0.5, %v1674_v34 }
 0xa4e   : > { %2617 = verf.f32 %v1683_v49 }
 0xa4f   : > { %2619 = verf.f32 %v1685_v38 }
 0xa59   : > { %v2614_v42 = vpop.eup %2613 }
 0xa5a   : > { %v2616_v43 = vpop.eup %2615  ;;  %v1690_v39 = vadd.f32 1.0, %v2614_v42 }
 0xa5b   : > { %v1692_v40 = vadd.f32 1.0, %v2616_v43  ;;  %v2618_v41 = vpop.eup %2617 }
 0xa5c   : > { %v2620_v46 = vpop.eup %2619  ;;  %v1691_v50 = vadd.f32 1.0, %v2618_v41  ;;  %v1694_v51 = vmul.f32 %v1690_v39, %v1678_v44 }
 0xa5d   : > { %v1693_v53 = vadd.f32 1.0, %v2620_v46  ;;  %v1696_v3 = vmul.f32 %v1692_v40, %v1680_v47 }
 0xa5e   : > { %v1695_v54 = vmul.f32 %v1691_v50, %v1679_v48  ;;  %v1698_v57 = vpack.c.bf16 %v1694_v51, %v1694_v51 }
 0xa5f   : > { %v1697_v55 = vmul.f32 %v1693_v53, %v1681_v52  ;;  %v1700_v59 = vpack.c.bf16 %v1696_v3, %v1696_v3 }
 0xa60   : > { %v1699_v56 = vpack.c.bf16 %v1695_v54, %v1695_v54 }
 0xa61   : > { %v1701_v58 = vpack.c.bf16 %v1697_v55, %v1697_v55 }
 0xa62   : > { %1997 = vmatprep.mubr.bf16.mxu1 %v1699_v56 }
 0xa63   : > { %2037 = vmatprep.mubr.bf16.mxu0 %v1701_v58  ;;  %1998 = vmatmul.mubr.bf16.vlgmr.msra.gmra.mxu1 %v1698_v57 }
 0xa64   : > { %2038 = vmatmul.mubr.bf16.vlgmr.msra.gmra.mxu0 %v1700_v59 }
 0xb23   : > { %v2306_v61 = vpop.f32.mrf.mxu1 }
 0xb24   : > { %v2328_v62 = vpop.f32.mrf.mxu0 }
 0xb25   : > { %v2307_v2 = vpop.f32.mrf.mxu1 }
 0xb26   : > { %v2308_v4 = vadd.f32 %v2307_v2, %v2306_v61  ;;  %v2329_v5 = vpop.f32.mrf.mxu0 }
 0xb27   : > { %v2309_v6 = vpop.f32.mrf.mxu1  ;;  %v2330_v7 = vadd.f32 %v2329_v5, %v2328_v62 }
 0xb28   : > { %v2000_v22 = vadd.f32 %v2308_v4, %v2221_v1  ;;  %v2331_v8 = vpop.f32.mrf.mxu0 }
 0xb29   : > { %v2310_v0 = vpop.f32.mrf.mxu1 }
 0xb2a   : > { %v2040_v9 = vadd.f32 %v2330_v7, %v2000_v22  ;;  %v2332_v10 = vpop.f32.mrf.mxu0 }
 0xb2c   : > { %v2045_v11 = vadd.f32 %v2040_v9, %v3037_v60 }
 0xb2e   : > { %2046 = vst [vmem:[%s479_s15] sm:$0xff] %v2045_v11 }
 0xb2f PF: > { %s25_s25 = sadd.s32 1, %s2713_s25  }
 0xb30   : > { %p22_p2 = scmp.ge.s32.totalorder %s25_s25, 4  }
 0xb32   :  { %24 = sbr.rel (!%p22_p2) target bundleno = 2 (0x2), region = 115 }
 0xb37   :  { %2066 = vsyncpa [#allocation4], 1 }
 0xb38   :  { %2068 = vsyncpa [#allocation4 + $0x1], 1 }
 0xb39   :  { %2069 = vsyncpa [#allocation6], 1 }

</bundles_post_ra>
